<compile_context>
chip_gen: v5e
topology: v5e:2x2
jax: 0.10.0
libtpu: 0.0.40
codegen_flags: <defaults>
</compile_context>

<pallas_src>
import functools
import math

import jax
import jax.numpy as jnp
from jax import lax
from jax.experimental import pallas as pl
from jax.experimental.pallas import tpu as pltpu


def _round_up(x, m):
    return ((x + m - 1) // m) * m


def _sigmoid(x):
    return 1.0 / (1.0 + jnp.exp(-x))


def rbm_cdk_kernel(v_ref, w_ref, hb_ref, vb_ref, uh_ref, uv_ref, vk_ref, *, cd_k):
    """One batch tile of the CD-k Gibbs chain, fully resident in VMEM.

    v_ref : (TB, Vp)        f32  visible tile
    w_ref : (Hp, Vp)        bf16 weights (resident across the grid)
    hb_ref: (1, Hp)         f32  hidden bias
    vb_ref: (1, Vp)         f32  visible bias
    uh_ref: (cd_k, TB, Hp)  f32  uniforms for v->h Bernoulli sampling
    uv_ref: (cd_k, TB, Vp)  f32  uniforms for h->v Bernoulli sampling
    vk_ref: (TB, Vp)        bf16 output (reconstructed visible sample)
    """
    v0 = v_ref[...]
    Wb = w_ref[...]          # single bf16 copy, used for both directions
    hb = hb_ref[...]
    vb = vb_ref[...]

    def v_to_h(v, u):
        # v @ W.T -> (TB, Hp); MXU takes W with a transposed contraction,
        # no W.T copy in VMEM.
        logits = lax.dot_general(
            v.astype(jnp.bfloat16), Wb,
            dimension_numbers=(((1,), (1,)), ((), ())),
            preferred_element_type=jnp.float32)
        p_h = _sigmoid(logits + hb)
        return (u < p_h).astype(jnp.float32)      # Bernoulli(p_h)

    def h_to_v(h, u):
        # h @ W -> (TB, Vp)
        logits = lax.dot_general(
            h.astype(jnp.bfloat16), Wb,
            dimension_numbers=(((1,), (0,)), ((), ())),
            preferred_element_type=jnp.float32)
        p_v = _sigmoid(logits + vb)
        return (u < p_v).astype(jnp.float32)      # Bernoulli(p_v)

    # forward(): h1 = sample(v_to_h(v)); CD_k Gibbs steps.  The v_to_h of the
    # last PyTorch iteration is dead (its h is never consumed), so the chain
    # is restructured to end on h_to_v.
    h = v_to_h(v0, uh_ref[0])
    for i in range(cd_k - 1):                     # cd_k is static -> unrolled
        v_ = h_to_v(h, uv_ref[i])
        h = v_to_h(v_, uh_ref[i + 1])
    v_k = h_to_v(h, uv_ref[cd_k - 1])

    vk_ref[...] = v_k.astype(vk_ref.dtype)


def rbm_forward(v, W, h_bias, v_bias, key, cd_k=10, tile_b=None):
    """Equivalent of RBM.forward(v, CD_k): returns (v, v_k)."""
    assert cd_k >= 1
    B, n_visible = v.shape
    n_hidden = W.shape[0]
    f32 = jnp.float32

    # Lane-dense padding (zero weights/biases on the pad -> semantics preserved).
    Vp = _round_up(n_visible, 128)
    Hp = _round_up(n_hidden, 128)
    # tile_b multiple of 16 so the bf16 output block is sublane-aligned.
    if tile_b is None:
        tile_b = min(_round_up(B, 16), 128)
    Bp = _round_up(B, tile_b)

    Wpad = jnp.zeros((Hp, Vp), jnp.bfloat16).at[:n_hidden, :n_visible].set(
        W.astype(jnp.bfloat16))
    hbp = jnp.zeros((1, Hp), f32).at[0, :n_hidden].set(h_bias.astype(f32))
    vbp = jnp.zeros((1, Vp), f32).at[0, :n_visible].set(v_bias.astype(f32))
    vpad = jnp.zeros((Bp, Vp), f32).at[:B, :n_visible].set(v.astype(f32))

    # Uniforms are independent per batch row, so batch tiles never replay the
    # same random stream.
    k_h, k_v = jax.random.split(key)
    u_h = jax.random.uniform(k_h, (cd_k, Bp, Hp), dtype=f32)
    u_v = jax.random.uniform(k_v, (cd_k, Bp, Vp), dtype=f32)

    grid = (Bp // tile_b,)

    def nbytes(shape, dt):
        return math.prod(shape) * jnp.dtype(dt).itemsize

    vmem_est = 2 * (
        nbytes((tile_b, Vp), f32)                       # v tile
        + nbytes((Hp, Vp), jnp.bfloat16)                # W
        + nbytes((1, Hp), f32) + nbytes((1, Vp), f32)   # biases
        + nbytes((cd_k, tile_b, Hp), f32)               # u_h tile
        + nbytes((cd_k, tile_b, Vp), f32)               # u_v tile
        + nbytes((tile_b, Vp), jnp.bfloat16))           # out tile
    vmem_limit = int(min(max(2 * vmem_est + (4 << 20), 32 << 20), 100 << 20))

    cost = pl.CostEstimate(
        flops=2 * 2 * cd_k * Bp * Vp * Hp,
        transcendentals=cd_k * Bp * (Hp + Vp),
        bytes_accessed=(nbytes((Bp, Vp), f32)
                        + nbytes((Hp, Vp), jnp.bfloat16)
                        + nbytes((cd_k, Bp, Hp), f32)
                        + nbytes((cd_k, Bp, Vp), f32)
                        + nbytes((Bp, Vp), jnp.bfloat16)))

    kernel = functools.partial(rbm_cdk_kernel, cd_k=cd_k)
    v_k = pl.pallas_call(
        kernel,
        out_shape=jax.ShapeDtypeStruct((Bp, Vp), jnp.bfloat16),
        grid=grid,
        in_specs=[
            pl.BlockSpec((tile_b, Vp), lambda i: (i, 0)),           # v tile
            pl.BlockSpec((Hp, Vp), lambda i: (0, 0)),               # W (resident)
            pl.BlockSpec((1, Hp), lambda i: (0, 0)),                # h_bias
            pl.BlockSpec((1, Vp), lambda i: (0, 0)),                # v_bias
            pl.BlockSpec((cd_k, tile_b, Hp), lambda i: (0, i, 0)),  # u_h tile
            pl.BlockSpec((cd_k, tile_b, Vp), lambda i: (0, i, 0)),  # u_v tile
        ],
        out_specs=pl.BlockSpec((tile_b, Vp), lambda i: (i, 0)),
        compiler_params=pltpu.CompilerParams(
            dimension_semantics=("parallel",),
            vmem_limit_bytes=vmem_limit),
        cost_estimate=cost,
    )(vpad, Wpad, hbp, vbp, u_h, u_v)

    return v, v_k[:B, :n_visible].astype(f32)


if __name__ == "__main__":
    n_visible, n_hidden = 256, 64     # module defaults
    batch = 32
    cd_k = 10

    key = jax.random.PRNGKey(0)
    k_w, k_v, k_rng = jax.random.split(key, 3)

    # Deterministic parameter init mirroring the PyTorch __init__.
    bound = 1.0 / (n_visible + n_hidden)
    W = jax.random.uniform(k_w, (n_hidden, n_visible),
                           minval=-bound, maxval=bound, dtype=jnp.float32)
    v_bias = jnp.zeros((n_visible,), dtype=jnp.float32)
    h_bias = jnp.zeros((n_hidden,), dtype=jnp.float32)

    # Binary visible input (typical RBM input).
    v = (jax.random.uniform(k_v, (batch, n_visible)) < 0.5).astype(jnp.float32)

    v_out, v_k = rbm_forward(v, W, h_bias, v_bias, k_rng, cd_k=cd_k, tile_b=16)
    jax.block_until_ready((v_out, v_k))

    assert v_out.shape == (batch, n_visible)
    assert v_k.shape == (batch, n_visible)
    # v is passed through untouched; samples are exactly 0/1.
    assert bool(jnp.all(v_out == v))
    assert bool(jnp.all((v_k == 0.0) | (v_k == 1.0)))

    print("KERNEL_OK")
</pallas_src>

<mosaic_0001>
module attributes {stable_mosaic.version = 11 : i64} {
  func.func @rbm_cdk_kernel(%arg0: i32, %arg1: memref<16x256xf32, #tpu.memory_space<vmem>>, %arg2: memref<128x256xbf16, #tpu.memory_space<vmem>>, %arg3: memref<1x128xf32, #tpu.memory_space<vmem>>, %arg4: memref<1x256xf32, #tpu.memory_space<vmem>>, %arg5: memref<10x16x128xf32, #tpu.memory_space<vmem>>, %arg6: memref<10x16x256xf32, #tpu.memory_space<vmem>>, %arg7: memref<16x256xbf16, #tpu.memory_space<vmem>>) attributes {dimension_semantics = [#tpu.dimension_semantics<parallel>], iteration_bounds = array<i64: 2>, scalar_prefetch = 0 : i64, scratch_operands = 0 : i64, tpu.core_type = #tpu.core_type<tc>, window_params = [{transform_indices = @transform_0, window_bounds = array<i64: 16, 256>}, {pipeline_mode = #tpu.pipeline_mode<synchronous>, transform_indices = @transform_1, window_bounds = array<i64: 128, 256>}, {pipeline_mode = #tpu.pipeline_mode<synchronous>, transform_indices = @transform_2, window_bounds = array<i64: 1, 128>}, {pipeline_mode = #tpu.pipeline_mode<synchronous>, transform_indices = @transform_3, window_bounds = array<i64: 1, 256>}, {transform_indices = @transform_4, window_bounds = array<i64: 10, 16, 128>}, {transform_indices = @transform_5, window_bounds = array<i64: 10, 16, 256>}, {transform_indices = @transform_6, window_bounds = array<i64: 16, 256>}]} {
    %c0 = arith.constant 0 : index
    %c0_0 = arith.constant 0 : index
    %0 = vector.load %arg1[%c0, %c0_0] : memref<16x256xf32, #tpu.memory_space<vmem>>, vector<16x256xf32>
    %c0_1 = arith.constant 0 : index
    %c0_2 = arith.constant 0 : index
    %1 = vector.load %arg2[%c0_1, %c0_2] : memref<128x256xbf16, #tpu.memory_space<vmem>>, vector<128x256xbf16>
    %c0_3 = arith.constant 0 : index
    %c0_4 = arith.constant 0 : index
    %2 = vector.load %arg3[%c0_3, %c0_4] : memref<1x128xf32, #tpu.memory_space<vmem>>, vector<1x128xf32>
    %c0_5 = arith.constant 0 : index
    %c0_6 = arith.constant 0 : index
    %3 = vector.load %arg4[%c0_5, %c0_6] : memref<1x256xf32, #tpu.memory_space<vmem>>, vector<1x256xf32>
    %c0_7 = arith.constant 0 : index
    %c0_8 = arith.constant 0 : index
    %c0_9 = arith.constant 0 : index
    %4 = vector.load %arg5[%c0_7, %c0_8, %c0_9] : memref<10x16x128xf32, #tpu.memory_space<vmem>>, vector<1x16x128xf32>
    %5 = vector.shape_cast %4 : vector<1x16x128xf32> to vector<16x128xf32>
    %6 = arith.truncf %0 : vector<16x256xf32> to vector<16x256xbf16>
    %cst = arith.constant dense<0.000000e+00> : vector<16x128xf32>
    %7 = tpu.matmul %6, %1, %cst {dimension_numbers = #tpu.dot_dimension_numbers<[1], [1], [0], [0], [0, 0, 1, 0], [], []>} : vector<16x256xbf16>, vector<128x256xbf16>, vector<16x128xf32> -> vector<16x128xf32>
    %8 = vector.broadcast %2 : vector<1x128xf32> to vector<16x128xf32>
    %9 = arith.addf %7, %8 : vector<16x128xf32>
    %cst_10 = arith.constant 0.000000e+00 : f32
    %10 = vector.broadcast %cst_10 : f32 to vector<16x128xf32>
    %11 = arith.subf %10, %9 : vector<16x128xf32>
    %12 = math.exp %11 : vector<16x128xf32>
    %cst_11 = arith.constant 1.000000e+00 : f32
    %13 = vector.broadcast %cst_11 : f32 to vector<16x128xf32>
    %14 = arith.addf %13, %12 : vector<16x128xf32>
    %cst_12 = arith.constant 1.000000e+00 : f32
    %15 = vector.broadcast %cst_12 : f32 to vector<16x128xf32>
    %16 = arith.divf %15, %14 : vector<16x128xf32>
    %17 = arith.cmpf olt, %5, %16 : vector<16x128xf32>
    %18 = arith.extui %17 : vector<16x128xi1> to vector<16x128xi32>
    %19 = arith.sitofp %18 : vector<16x128xi32> to vector<16x128xf32>
    %c0_13 = arith.constant 0 : index
    %c0_14 = arith.constant 0 : index
    %c0_15 = arith.constant 0 : index
    %20 = vector.load %arg6[%c0_13, %c0_14, %c0_15] : memref<10x16x256xf32, #tpu.memory_space<vmem>>, vector<1x16x256xf32>
    %21 = vector.shape_cast %20 : vector<1x16x256xf32> to vector<16x256xf32>
    %22 = arith.truncf %19 : vector<16x128xf32> to vector<16x128xbf16>
    %cst_16 = arith.constant dense<0.000000e+00> : vector<16x256xf32>
    %23 = tpu.matmul %22, %1, %cst_16 {dimension_numbers = #tpu.dot_dimension_numbers<[1], [0], [0], [1], [0, 0, 1, 1], [], []>} : vector<16x128xbf16>, vector<128x256xbf16>, vector<16x256xf32> -> vector<16x256xf32>
    %24 = vector.broadcast %3 : vector<1x256xf32> to vector<16x256xf32>
    %25 = arith.addf %23, %24 : vector<16x256xf32>
    %cst_17 = arith.constant 0.000000e+00 : f32
    %26 = vector.broadcast %cst_17 : f32 to vector<16x256xf32>
    %27 = arith.subf %26, %25 : vector<16x256xf32>
    %28 = math.exp %27 : vector<16x256xf32>
    %cst_18 = arith.constant 1.000000e+00 : f32
    %29 = vector.broadcast %cst_18 : f32 to vector<16x256xf32>
    %30 = arith.addf %29, %28 : vector<16x256xf32>
    %cst_19 = arith.constant 1.000000e+00 : f32
    %31 = vector.broadcast %cst_19 : f32 to vector<16x256xf32>
    %32 = arith.divf %31, %30 : vector<16x256xf32>
    %33 = arith.cmpf olt, %21, %32 : vector<16x256xf32>
    %34 = arith.extui %33 : vector<16x256xi1> to vector<16x256xi32>
    %35 = arith.sitofp %34 : vector<16x256xi32> to vector<16x256xf32>
    %c1 = arith.constant 1 : index
    %c0_20 = arith.constant 0 : index
    %c0_21 = arith.constant 0 : index
    %36 = vector.load %arg5[%c1, %c0_20, %c0_21] : memref<10x16x128xf32, #tpu.memory_space<vmem>>, vector<1x16x128xf32>
    %37 = vector.shape_cast %36 : vector<1x16x128xf32> to vector<16x128xf32>
    %38 = arith.truncf %35 : vector<16x256xf32> to vector<16x256xbf16>
    %cst_22 = arith.constant dense<0.000000e+00> : vector<16x128xf32>
    %39 = tpu.matmul %38, %1, %cst_22 {dimension_numbers = #tpu.dot_dimension_numbers<[1], [1], [0], [0], [0, 0, 1, 0], [], []>} : vector<16x256xbf16>, vector<128x256xbf16>, vector<16x128xf32> -> vector<16x128xf32>
    %40 = vector.broadcast %2 : vector<1x128xf32> to vector<16x128xf32>
    %41 = arith.addf %39, %40 : vector<16x128xf32>
    %cst_23 = arith.constant 0.000000e+00 : f32
    %42 = vector.broadcast %cst_23 : f32 to vector<16x128xf32>
    %43 = arith.subf %42, %41 : vector<16x128xf32>
    %44 = math.exp %43 : vector<16x128xf32>
    %cst_24 = arith.constant 1.000000e+00 : f32
    %45 = vector.broadcast %cst_24 : f32 to vector<16x128xf32>
    %46 = arith.addf %45, %44 : vector<16x128xf32>
    %cst_25 = arith.constant 1.000000e+00 : f32
    %47 = vector.broadcast %cst_25 : f32 to vector<16x128xf32>
    %48 = arith.divf %47, %46 : vector<16x128xf32>
    %49 = arith.cmpf olt, %37, %48 : vector<16x128xf32>
    %50 = arith.extui %49 : vector<16x128xi1> to vector<16x128xi32>
    %51 = arith.sitofp %50 : vector<16x128xi32> to vector<16x128xf32>
    %c1_26 = arith.constant 1 : index
    %c0_27 = arith.constant 0 : index
    %c0_28 = arith.constant 0 : index
    %52 = vector.load %arg6[%c1_26, %c0_27, %c0_28] : memref<10x16x256xf32, #tpu.memory_space<vmem>>, vector<1x16x256xf32>
    %53 = vector.shape_cast %52 : vector<1x16x256xf32> to vector<16x256xf32>
    %54 = arith.truncf %51 : vector<16x128xf32> to vector<16x128xbf16>
    %cst_29 = arith.constant dense<0.000000e+00> : vector<16x256xf32>
    %55 = tpu.matmul %54, %1, %cst_29 {dimension_numbers = #tpu.dot_dimension_numbers<[1], [0], [0], [1], [0, 0, 1, 1], [], []>} : vector<16x128xbf16>, vector<128x256xbf16>, vector<16x256xf32> -> vector<16x256xf32>
    %56 = vector.broadcast %3 : vector<1x256xf32> to vector<16x256xf32>
    %57 = arith.addf %55, %56 : vector<16x256xf32>
    %cst_30 = arith.constant 0.000000e+00 : f32
    %58 = vector.broadcast %cst_30 : f32 to vector<16x256xf32>
    %59 = arith.subf %58, %57 : vector<16x256xf32>
    %60 = math.exp %59 : vector<16x256xf32>
    %cst_31 = arith.constant 1.000000e+00 : f32
    %61 = vector.broadcast %cst_31 : f32 to vector<16x256xf32>
    %62 = arith.addf %61, %60 : vector<16x256xf32>
    %cst_32 = arith.constant 1.000000e+00 : f32
    %63 = vector.broadcast %cst_32 : f32 to vector<16x256xf32>
    %64 = arith.divf %63, %62 : vector<16x256xf32>
    %65 = arith.cmpf olt, %53, %64 : vector<16x256xf32>
    %66 = arith.extui %65 : vector<16x256xi1> to vector<16x256xi32>
    %67 = arith.sitofp %66 : vector<16x256xi32> to vector<16x256xf32>
    %c2 = arith.constant 2 : index
    %c0_33 = arith.constant 0 : index
    %c0_34 = arith.constant 0 : index
    %68 = vector.load %arg5[%c2, %c0_33, %c0_34] : memref<10x16x128xf32, #tpu.memory_space<vmem>>, vector<1x16x128xf32>
    %69 = vector.shape_cast %68 : vector<1x16x128xf32> to vector<16x128xf32>
    %70 = arith.truncf %67 : vector<16x256xf32> to vector<16x256xbf16>
    %cst_35 = arith.constant dense<0.000000e+00> : vector<16x128xf32>
    %71 = tpu.matmul %70, %1, %cst_35 {dimension_numbers = #tpu.dot_dimension_numbers<[1], [1], [0], [0], [0, 0, 1, 0], [], []>} : vector<16x256xbf16>, vector<128x256xbf16>, vector<16x128xf32> -> vector<16x128xf32>
    %72 = vector.broadcast %2 : vector<1x128xf32> to vector<16x128xf32>
    %73 = arith.addf %71, %72 : vector<16x128xf32>
    %cst_36 = arith.constant 0.000000e+00 : f32
    %74 = vector.broadcast %cst_36 : f32 to vector<16x128xf32>
    %75 = arith.subf %74, %73 : vector<16x128xf32>
    %76 = math.exp %75 : vector<16x128xf32>
    %cst_37 = arith.constant 1.000000e+00 : f32
    %77 = vector.broadcast %cst_37 : f32 to vector<16x128xf32>
    %78 = arith.addf %77, %76 : vector<16x128xf32>
    %cst_38 = arith.constant 1.000000e+00 : f32
    %79 = vector.broadcast %cst_38 : f32 to vector<16x128xf32>
    %80 = arith.divf %79, %78 : vector<16x128xf32>
    %81 = arith.cmpf olt, %69, %80 : vector<16x128xf32>
    %82 = arith.extui %81 : vector<16x128xi1> to vector<16x128xi32>
    %83 = arith.sitofp %82 : vector<16x128xi32> to vector<16x128xf32>
    %c2_39 = arith.constant 2 : index
    %c0_40 = arith.constant 0 : index
    %c0_41 = arith.constant 0 : index
    %84 = vector.load %arg6[%c2_39, %c0_40, %c0_41] : memref<10x16x256xf32, #tpu.memory_space<vmem>>, vector<1x16x256xf32>
    %85 = vector.shape_cast %84 : vector<1x16x256xf32> to vector<16x256xf32>
    %86 = arith.truncf %83 : vector<16x128xf32> to vector<16x128xbf16>
    %cst_42 = arith.constant dense<0.000000e+00> : vector<16x256xf32>
    %87 = tpu.matmul %86, %1, %cst_42 {dimension_numbers = #tpu.dot_dimension_numbers<[1], [0], [0], [1], [0, 0, 1, 1], [], []>} : vector<16x128xbf16>, vector<128x256xbf16>, vector<16x256xf32> -> vector<16x256xf32>
    %88 = vector.broadcast %3 : vector<1x256xf32> to vector<16x256xf32>
    %89 = arith.addf %87, %88 : vector<16x256xf32>
    %cst_43 = arith.constant 0.000000e+00 : f32
    %90 = vector.broadcast %cst_43 : f32 to vector<16x256xf32>
    %91 = arith.subf %90, %89 : vector<16x256xf32>
    %92 = math.exp %91 : vector<16x256xf32>
    %cst_44 = arith.constant 1.000000e+00 : f32
    %93 = vector.broadcast %cst_44 : f32 to vector<16x256xf32>
    %94 = arith.addf %93, %92 : vector<16x256xf32>
    %cst_45 = arith.constant 1.000000e+00 : f32
    %95 = vector.broadcast %cst_45 : f32 to vector<16x256xf32>
    %96 = arith.divf %95, %94 : vector<16x256xf32>
    %97 = arith.cmpf olt, %85, %96 : vector<16x256xf32>
    %98 = arith.extui %97 : vector<16x256xi1> to vector<16x256xi32>
    %99 = arith.sitofp %98 : vector<16x256xi32> to vector<16x256xf32>
    %c3 = arith.constant 3 : index
    %c0_46 = arith.constant 0 : index
    %c0_47 = arith.constant 0 : index
    %100 = vector.load %arg5[%c3, %c0_46, %c0_47] : memref<10x16x128xf32, #tpu.memory_space<vmem>>, vector<1x16x128xf32>
    %101 = vector.shape_cast %100 : vector<1x16x128xf32> to vector<16x128xf32>
    %102 = arith.truncf %99 : vector<16x256xf32> to vector<16x256xbf16>
    %cst_48 = arith.constant dense<0.000000e+00> : vector<16x128xf32>
    %103 = tpu.matmul %102, %1, %cst_48 {dimension_numbers = #tpu.dot_dimension_numbers<[1], [1], [0], [0], [0, 0, 1, 0], [], []>} : vector<16x256xbf16>, vector<128x256xbf16>, vector<16x128xf32> -> vector<16x128xf32>
    %104 = vector.broadcast %2 : vector<1x128xf32> to vector<16x128xf32>
    %105 = arith.addf %103, %104 : vector<16x128xf32>
    %cst_49 = arith.constant 0.000000e+00 : f32
    %106 = vector.broadcast %cst_49 : f32 to vector<16x128xf32>
    %107 = arith.subf %106, %105 : vector<16x128xf32>
    %108 = math.exp %107 : vector<16x128xf32>
    %cst_50 = arith.constant 1.000000e+00 : f32
    %109 = vector.broadcast %cst_50 : f32 to vector<16x128xf32>
    %110 = arith.addf %109, %108 : vector<16x128xf32>
    %cst_51 = arith.constant 1.000000e+00 : f32
    %111 = vector.broadcast %cst_51 : f32 to vector<16x128xf32>
    %112 = arith.divf %111, %110 : vector<16x128xf32>
    %113 = arith.cmpf olt, %101, %112 : vector<16x128xf32>
    %114 = arith.extui %113 : vector<16x128xi1> to vector<16x128xi32>
    %115 = arith.sitofp %114 : vector<16x128xi32> to vector<16x128xf32>
    %c3_52 = arith.constant 3 : index
    %c0_53 = arith.constant 0 : index
    %c0_54 = arith.constant 0 : index
    %116 = vector.load %arg6[%c3_52, %c0_53, %c0_54] : memref<10x16x256xf32, #tpu.memory_space<vmem>>, vector<1x16x256xf32>
    %117 = vector.shape_cast %116 : vector<1x16x256xf32> to vector<16x256xf32>
    %118 = arith.truncf %115 : vector<16x128xf32> to vector<16x128xbf16>
    %cst_55 = arith.constant dense<0.000000e+00> : vector<16x256xf32>
    %119 = tpu.matmul %118, %1, %cst_55 {dimension_numbers = #tpu.dot_dimension_numbers<[1], [0], [0], [1], [0, 0, 1, 1], [], []>} : vector<16x128xbf16>, vector<128x256xbf16>, vector<16x256xf32> -> vector<16x256xf32>
    %120 = vector.broadcast %3 : vector<1x256xf32> to vector<16x256xf32>
    %121 = arith.addf %119, %120 : vector<16x256xf32>
    %cst_56 = arith.constant 0.000000e+00 : f32
    %122 = vector.broadcast %cst_56 : f32 to vector<16x256xf32>
    %123 = arith.subf %122, %121 : vector<16x256xf32>
    %124 = math.exp %123 : vector<16x256xf32>
    %cst_57 = arith.constant 1.000000e+00 : f32
    %125 = vector.broadcast %cst_57 : f32 to vector<16x256xf32>
    %126 = arith.addf %125, %124 : vector<16x256xf32>
    %cst_58 = arith.constant 1.000000e+00 : f32
    %127 = vector.broadcast %cst_58 : f32 to vector<16x256xf32>
    %128 = arith.divf %127, %126 : vector<16x256xf32>
    %129 = arith.cmpf olt, %117, %128 : vector<16x256xf32>
    %130 = arith.extui %129 : vector<16x256xi1> to vector<16x256xi32>
    %131 = arith.sitofp %130 : vector<16x256xi32> to vector<16x256xf32>
    %c4 = arith.constant 4 : index
    %c0_59 = arith.constant 0 : index
    %c0_60 = arith.constant 0 : index
    %132 = vector.load %arg5[%c4, %c0_59, %c0_60] : memref<10x16x128xf32, #tpu.memory_space<vmem>>, vector<1x16x128xf32>
    %133 = vector.shape_cast %132 : vector<1x16x128xf32> to vector<16x128xf32>
    %134 = arith.truncf %131 : vector<16x256xf32> to vector<16x256xbf16>
    %cst_61 = arith.constant dense<0.000000e+00> : vector<16x128xf32>
    %135 = tpu.matmul %134, %1, %cst_61 {dimension_numbers = #tpu.dot_dimension_numbers<[1], [1], [0], [0], [0, 0, 1, 0], [], []>} : vector<16x256xbf16>, vector<128x256xbf16>, vector<16x128xf32> -> vector<16x128xf32>
    %136 = vector.broadcast %2 : vector<1x128xf32> to vector<16x128xf32>
    %137 = arith.addf %135, %136 : vector<16x128xf32>
    %cst_62 = arith.constant 0.000000e+00 : f32
    %138 = vector.broadcast %cst_62 : f32 to vector<16x128xf32>
    %139 = arith.subf %138, %137 : vector<16x128xf32>
    %140 = math.exp %139 : vector<16x128xf32>
    %cst_63 = arith.constant 1.000000e+00 : f32
    %141 = vector.broadcast %cst_63 : f32 to vector<16x128xf32>
    %142 = arith.addf %141, %140 : vector<16x128xf32>
    %cst_64 = arith.constant 1.000000e+00 : f32
    %143 = vector.broadcast %cst_64 : f32 to vector<16x128xf32>
    %144 = arith.divf %143, %142 : vector<16x128xf32>
    %145 = arith.cmpf olt, %133, %144 : vector<16x128xf32>
    %146 = arith.extui %145 : vector<16x128xi1> to vector<16x128xi32>
    %147 = arith.sitofp %146 : vector<16x128xi32> to vector<16x128xf32>
    %c4_65 = arith.constant 4 : index
    %c0_66 = arith.constant 0 : index
    %c0_67 = arith.constant 0 : index
    %148 = vector.load %arg6[%c4_65, %c0_66, %c0_67] : memref<10x16x256xf32, #tpu.memory_space<vmem>>, vector<1x16x256xf32>
    %149 = vector.shape_cast %148 : vector<1x16x256xf32> to vector<16x256xf32>
    %150 = arith.truncf %147 : vector<16x128xf32> to vector<16x128xbf16>
    %cst_68 = arith.constant dense<0.000000e+00> : vector<16x256xf32>
    %151 = tpu.matmul %150, %1, %cst_68 {dimension_numbers = #tpu.dot_dimension_numbers<[1], [0], [0], [1], [0, 0, 1, 1], [], []>} : vector<16x128xbf16>, vector<128x256xbf16>, vector<16x256xf32> -> vector<16x256xf32>
    %152 = vector.broadcast %3 : vector<1x256xf32> to vector<16x256xf32>
    %153 = arith.addf %151, %152 : vector<16x256xf32>
    %cst_69 = arith.constant 0.000000e+00 : f32
    %154 = vector.broadcast %cst_69 : f32 to vector<16x256xf32>
    %155 = arith.subf %154, %153 : vector<16x256xf32>
    %156 = math.exp %155 : vector<16x256xf32>
    %cst_70 = arith.constant 1.000000e+00 : f32
    %157 = vector.broadcast %cst_70 : f32 to vector<16x256xf32>
    %158 = arith.addf %157, %156 : vector<16x256xf32>
    %cst_71 = arith.constant 1.000000e+00 : f32
    %159 = vector.broadcast %cst_71 : f32 to vector<16x256xf32>
    %160 = arith.divf %159, %158 : vector<16x256xf32>
    %161 = arith.cmpf olt, %149, %160 : vector<16x256xf32>
    %162 = arith.extui %161 : vector<16x256xi1> to vector<16x256xi32>
    %163 = arith.sitofp %162 : vector<16x256xi32> to vector<16x256xf32>
    %c5 = arith.constant 5 : index
    %c0_72 = arith.constant 0 : index
    %c0_73 = arith.constant 0 : index
    %164 = vector.load %arg5[%c5, %c0_72, %c0_73] : memref<10x16x128xf32, #tpu.memory_space<vmem>>, vector<1x16x128xf32>
    %165 = vector.shape_cast %164 : vector<1x16x128xf32> to vector<16x128xf32>
    %166 = arith.truncf %163 : vector<16x256xf32> to vector<16x256xbf16>
    %cst_74 = arith.constant dense<0.000000e+00> : vector<16x128xf32>
    %167 = tpu.matmul %166, %1, %cst_74 {dimension_numbers = #tpu.dot_dimension_numbers<[1], [1], [0], [0], [0, 0, 1, 0], [], []>} : vector<16x256xbf16>, vector<128x256xbf16>, vector<16x128xf32> -> vector<16x128xf32>
    %168 = vector.broadcast %2 : vector<1x128xf32> to vector<16x128xf32>
    %169 = arith.addf %167, %168 : vector<16x128xf32>
    %cst_75 = arith.constant 0.000000e+00 : f32
    %170 = vector.broadcast %cst_75 : f32 to vector<16x128xf32>
    %171 = arith.subf %170, %169 : vector<16x128xf32>
    %172 = math.exp %171 : vector<16x128xf32>
    %cst_76 = arith.constant 1.000000e+00 : f32
    %173 = vector.broadcast %cst_76 : f32 to vector<16x128xf32>
    %174 = arith.addf %173, %172 : vector<16x128xf32>
    %cst_77 = arith.constant 1.000000e+00 : f32
    %175 = vector.broadcast %cst_77 : f32 to vector<16x128xf32>
    %176 = arith.divf %175, %174 : vector<16x128xf32>
    %177 = arith.cmpf olt, %165, %176 : vector<16x128xf32>
    %178 = arith.extui %177 : vector<16x128xi1> to vector<16x128xi32>
    %179 = arith.sitofp %178 : vector<16x128xi32> to vector<16x128xf32>
    %c5_78 = arith.constant 5 : index
    %c0_79 = arith.constant 0 : index
    %c0_80 = arith.constant 0 : index
    %180 = vector.load %arg6[%c5_78, %c0_79, %c0_80] : memref<10x16x256xf32, #tpu.memory_space<vmem>>, vector<1x16x256xf32>
    %181 = vector.shape_cast %180 : vector<1x16x256xf32> to vector<16x256xf32>
    %182 = arith.truncf %179 : vector<16x128xf32> to vector<16x128xbf16>
    %cst_81 = arith.constant dense<0.000000e+00> : vector<16x256xf32>
    %183 = tpu.matmul %182, %1, %cst_81 {dimension_numbers = #tpu.dot_dimension_numbers<[1], [0], [0], [1], [0, 0, 1, 1], [], []>} : vector<16x128xbf16>, vector<128x256xbf16>, vector<16x256xf32> -> vector<16x256xf32>
    %184 = vector.broadcast %3 : vector<1x256xf32> to vector<16x256xf32>
    %185 = arith.addf %183, %184 : vector<16x256xf32>
    %cst_82 = arith.constant 0.000000e+00 : f32
    %186 = vector.broadcast %cst_82 : f32 to vector<16x256xf32>
    %187 = arith.subf %186, %185 : vector<16x256xf32>
    %188 = math.exp %187 : vector<16x256xf32>
    %cst_83 = arith.constant 1.000000e+00 : f32
    %189 = vector.broadcast %cst_83 : f32 to vector<16x256xf32>
    %190 = arith.addf %189, %188 : vector<16x256xf32>
    %cst_84 = arith.constant 1.000000e+00 : f32
    %191 = vector.broadcast %cst_84 : f32 to vector<16x256xf32>
    %192 = arith.divf %191, %190 : vector<16x256xf32>
    %193 = arith.cmpf olt, %181, %192 : vector<16x256xf32>
    %194 = arith.extui %193 : vector<16x256xi1> to vector<16x256xi32>
    %195 = arith.sitofp %194 : vector<16x256xi32> to vector<16x256xf32>
    %c6 = arith.constant 6 : index
    %c0_85 = arith.constant 0 : index
    %c0_86 = arith.constant 0 : index
    %196 = vector.load %arg5[%c6, %c0_85, %c0_86] : memref<10x16x128xf32, #tpu.memory_space<vmem>>, vector<1x16x128xf32>
    %197 = vector.shape_cast %196 : vector<1x16x128xf32> to vector<16x128xf32>
    %198 = arith.truncf %195 : vector<16x256xf32> to vector<16x256xbf16>
    %cst_87 = arith.constant dense<0.000000e+00> : vector<16x128xf32>
    %199 = tpu.matmul %198, %1, %cst_87 {dimension_numbers = #tpu.dot_dimension_numbers<[1], [1], [0], [0], [0, 0, 1, 0], [], []>} : vector<16x256xbf16>, vector<128x256xbf16>, vector<16x128xf32> -> vector<16x128xf32>
    %200 = vector.broadcast %2 : vector<1x128xf32> to vector<16x128xf32>
    %201 = arith.addf %199, %200 : vector<16x128xf32>
    %cst_88 = arith.constant 0.000000e+00 : f32
    %202 = vector.broadcast %cst_88 : f32 to vector<16x128xf32>
    %203 = arith.subf %202, %201 : vector<16x128xf32>
    %204 = math.exp %203 : vector<16x128xf32>
    %cst_89 = arith.constant 1.000000e+00 : f32
    %205 = vector.broadcast %cst_89 : f32 to vector<16x128xf32>
    %206 = arith.addf %205, %204 : vector<16x128xf32>
    %cst_90 = arith.constant 1.000000e+00 : f32
    %207 = vector.broadcast %cst_90 : f32 to vector<16x128xf32>
    %208 = arith.divf %207, %206 : vector<16x128xf32>
    %209 = arith.cmpf olt, %197, %208 : vector<16x128xf32>
    %210 = arith.extui %209 : vector<16x128xi1> to vector<16x128xi32>
    %211 = arith.sitofp %210 : vector<16x128xi32> to vector<16x128xf32>
    %c6_91 = arith.constant 6 : index
    %c0_92 = arith.constant 0 : index
    %c0_93 = arith.constant 0 : index
    %212 = vector.load %arg6[%c6_91, %c0_92, %c0_93] : memref<10x16x256xf32, #tpu.memory_space<vmem>>, vector<1x16x256xf32>
    %213 = vector.shape_cast %212 : vector<1x16x256xf32> to vector<16x256xf32>
    %214 = arith.truncf %211 : vector<16x128xf32> to vector<16x128xbf16>
    %cst_94 = arith.constant dense<0.000000e+00> : vector<16x256xf32>
    %215 = tpu.matmul %214, %1, %cst_94 {dimension_numbers = #tpu.dot_dimension_numbers<[1], [0], [0], [1], [0, 0, 1, 1], [], []>} : vector<16x128xbf16>, vector<128x256xbf16>, vector<16x256xf32> -> vector<16x256xf32>
    %216 = vector.broadcast %3 : vector<1x256xf32> to vector<16x256xf32>
    %217 = arith.addf %215, %216 : vector<16x256xf32>
    %cst_95 = arith.constant 0.000000e+00 : f32
    %218 = vector.broadcast %cst_95 : f32 to vector<16x256xf32>
    %219 = arith.subf %218, %217 : vector<16x256xf32>
    %220 = math.exp %219 : vector<16x256xf32>
    %cst_96 = arith.constant 1.000000e+00 : f32
    %221 = vector.broadcast %cst_96 : f32 to vector<16x256xf32>
    %222 = arith.addf %221, %220 : vector<16x256xf32>
    %cst_97 = arith.constant 1.000000e+00 : f32
    %223 = vector.broadcast %cst_97 : f32 to vector<16x256xf32>
    %224 = arith.divf %223, %222 : vector<16x256xf32>
    %225 = arith.cmpf olt, %213, %224 : vector<16x256xf32>
    %226 = arith.extui %225 : vector<16x256xi1> to vector<16x256xi32>
    %227 = arith.sitofp %226 : vector<16x256xi32> to vector<16x256xf32>
    %c7 = arith.constant 7 : index
    %c0_98 = arith.constant 0 : index
    %c0_99 = arith.constant 0 : index
    %228 = vector.load %arg5[%c7, %c0_98, %c0_99] : memref<10x16x128xf32, #tpu.memory_space<vmem>>, vector<1x16x128xf32>
    %229 = vector.shape_cast %228 : vector<1x16x128xf32> to vector<16x128xf32>
    %230 = arith.truncf %227 : vector<16x256xf32> to vector<16x256xbf16>
    %cst_100 = arith.constant dense<0.000000e+00> : vector<16x128xf32>
    %231 = tpu.matmul %230, %1, %cst_100 {dimension_numbers = #tpu.dot_dimension_numbers<[1], [1], [0], [0], [0, 0, 1, 0], [], []>} : vector<16x256xbf16>, vector<128x256xbf16>, vector<16x128xf32> -> vector<16x128xf32>
    %232 = vector.broadcast %2 : vector<1x128xf32> to vector<16x128xf32>
    %233 = arith.addf %231, %232 : vector<16x128xf32>
    %cst_101 = arith.constant 0.000000e+00 : f32
    %234 = vector.broadcast %cst_101 : f32 to vector<16x128xf32>
    %235 = arith.subf %234, %233 : vector<16x128xf32>
    %236 = math.exp %235 : vector<16x128xf32>
    %cst_102 = arith.constant 1.000000e+00 : f32
    %237 = vector.broadcast %cst_102 : f32 to vector<16x128xf32>
    %238 = arith.addf %237, %236 : vector<16x128xf32>
    %cst_103 = arith.constant 1.000000e+00 : f32
    %239 = vector.broadcast %cst_103 : f32 to vector<16x128xf32>
    %240 = arith.divf %239, %238 : vector<16x128xf32>
    %241 = arith.cmpf olt, %229, %240 : vector<16x128xf32>
    %242 = arith.extui %241 : vector<16x128xi1> to vector<16x128xi32>
    %243 = arith.sitofp %242 : vector<16x128xi32> to vector<16x128xf32>
    %c7_104 = arith.constant 7 : index
    %c0_105 = arith.constant 0 : index
    %c0_106 = arith.constant 0 : index
    %244 = vector.load %arg6[%c7_104, %c0_105, %c0_106] : memref<10x16x256xf32, #tpu.memory_space<vmem>>, vector<1x16x256xf32>
    %245 = vector.shape_cast %244 : vector<1x16x256xf32> to vector<16x256xf32>
    %246 = arith.truncf %243 : vector<16x128xf32> to vector<16x128xbf16>
    %cst_107 = arith.constant dense<0.000000e+00> : vector<16x256xf32>
    %247 = tpu.matmul %246, %1, %cst_107 {dimension_numbers = #tpu.dot_dimension_numbers<[1], [0], [0], [1], [0, 0, 1, 1], [], []>} : vector<16x128xbf16>, vector<128x256xbf16>, vector<16x256xf32> -> vector<16x256xf32>
    %248 = vector.broadcast %3 : vector<1x256xf32> to vector<16x256xf32>
    %249 = arith.addf %247, %248 : vector<16x256xf32>
    %cst_108 = arith.constant 0.000000e+00 : f32
    %250 = vector.broadcast %cst_108 : f32 to vector<16x256xf32>
    %251 = arith.subf %250, %249 : vector<16x256xf32>
    %252 = math.exp %251 : vector<16x256xf32>
    %cst_109 = arith.constant 1.000000e+00 : f32
    %253 = vector.broadcast %cst_109 : f32 to vector<16x256xf32>
    %254 = arith.addf %253, %252 : vector<16x256xf32>
    %cst_110 = arith.constant 1.000000e+00 : f32
    %255 = vector.broadcast %cst_110 : f32 to vector<16x256xf32>
    %256 = arith.divf %255, %254 : vector<16x256xf32>
    %257 = arith.cmpf olt, %245, %256 : vector<16x256xf32>
    %258 = arith.extui %257 : vector<16x256xi1> to vector<16x256xi32>
    %259 = arith.sitofp %258 : vector<16x256xi32> to vector<16x256xf32>
    %c8 = arith.constant 8 : index
    %c0_111 = arith.constant 0 : index
    %c0_112 = arith.constant 0 : index
    %260 = vector.load %arg5[%c8, %c0_111, %c0_112] : memref<10x16x128xf32, #tpu.memory_space<vmem>>, vector<1x16x128xf32>
    %261 = vector.shape_cast %260 : vector<1x16x128xf32> to vector<16x128xf32>
    %262 = arith.truncf %259 : vector<16x256xf32> to vector<16x256xbf16>
    %cst_113 = arith.constant dense<0.000000e+00> : vector<16x128xf32>
    %263 = tpu.matmul %262, %1, %cst_113 {dimension_numbers = #tpu.dot_dimension_numbers<[1], [1], [0], [0], [0, 0, 1, 0], [], []>} : vector<16x256xbf16>, vector<128x256xbf16>, vector<16x128xf32> -> vector<16x128xf32>
    %264 = vector.broadcast %2 : vector<1x128xf32> to vector<16x128xf32>
    %265 = arith.addf %263, %264 : vector<16x128xf32>
    %cst_114 = arith.constant 0.000000e+00 : f32
    %266 = vector.broadcast %cst_114 : f32 to vector<16x128xf32>
    %267 = arith.subf %266, %265 : vector<16x128xf32>
    %268 = math.exp %267 : vector<16x128xf32>
    %cst_115 = arith.constant 1.000000e+00 : f32
    %269 = vector.broadcast %cst_115 : f32 to vector<16x128xf32>
    %270 = arith.addf %269, %268 : vector<16x128xf32>
    %cst_116 = arith.constant 1.000000e+00 : f32
    %271 = vector.broadcast %cst_116 : f32 to vector<16x128xf32>
    %272 = arith.divf %271, %270 : vector<16x128xf32>
    %273 = arith.cmpf olt, %261, %272 : vector<16x128xf32>
    %274 = arith.extui %273 : vector<16x128xi1> to vector<16x128xi32>
    %275 = arith.sitofp %274 : vector<16x128xi32> to vector<16x128xf32>
    %c8_117 = arith.constant 8 : index
    %c0_118 = arith.constant 0 : index
    %c0_119 = arith.constant 0 : index
    %276 = vector.load %arg6[%c8_117, %c0_118, %c0_119] : memref<10x16x256xf32, #tpu.memory_space<vmem>>, vector<1x16x256xf32>
    %277 = vector.shape_cast %276 : vector<1x16x256xf32> to vector<16x256xf32>
    %278 = arith.truncf %275 : vector<16x128xf32> to vector<16x128xbf16>
    %cst_120 = arith.constant dense<0.000000e+00> : vector<16x256xf32>
    %279 = tpu.matmul %278, %1, %cst_120 {dimension_numbers = #tpu.dot_dimension_numbers<[1], [0], [0], [1], [0, 0, 1, 1], [], []>} : vector<16x128xbf16>, vector<128x256xbf16>, vector<16x256xf32> -> vector<16x256xf32>
    %280 = vector.broadcast %3 : vector<1x256xf32> to vector<16x256xf32>
    %281 = arith.addf %279, %280 : vector<16x256xf32>
    %cst_121 = arith.constant 0.000000e+00 : f32
    %282 = vector.broadcast %cst_121 : f32 to vector<16x256xf32>
    %283 = arith.subf %282, %281 : vector<16x256xf32>
    %284 = math.exp %283 : vector<16x256xf32>
    %cst_122 = arith.constant 1.000000e+00 : f32
    %285 = vector.broadcast %cst_122 : f32 to vector<16x256xf32>
    %286 = arith.addf %285, %284 : vector<16x256xf32>
    %cst_123 = arith.constant 1.000000e+00 : f32
    %287 = vector.broadcast %cst_123 : f32 to vector<16x256xf32>
    %288 = arith.divf %287, %286 : vector<16x256xf32>
    %289 = arith.cmpf olt, %277, %288 : vector<16x256xf32>
    %290 = arith.extui %289 : vector<16x256xi1> to vector<16x256xi32>
    %291 = arith.sitofp %290 : vector<16x256xi32> to vector<16x256xf32>
    %c9 = arith.constant 9 : index
    %c0_124 = arith.constant 0 : index
    %c0_125 = arith.constant 0 : index
    %292 = vector.load %arg5[%c9, %c0_124, %c0_125] : memref<10x16x128xf32, #tpu.memory_space<vmem>>, vector<1x16x128xf32>
    %293 = vector.shape_cast %292 : vector<1x16x128xf32> to vector<16x128xf32>
    %294 = arith.truncf %291 : vector<16x256xf32> to vector<16x256xbf16>
    %cst_126 = arith.constant dense<0.000000e+00> : vector<16x128xf32>
    %295 = tpu.matmul %294, %1, %cst_126 {dimension_numbers = #tpu.dot_dimension_numbers<[1], [1], [0], [0], [0, 0, 1, 0], [], []>} : vector<16x256xbf16>, vector<128x256xbf16>, vector<16x128xf32> -> vector<16x128xf32>
    %296 = vector.broadcast %2 : vector<1x128xf32> to vector<16x128xf32>
    %297 = arith.addf %295, %296 : vector<16x128xf32>
    %cst_127 = arith.constant 0.000000e+00 : f32
    %298 = vector.broadcast %cst_127 : f32 to vector<16x128xf32>
    %299 = arith.subf %298, %297 : vector<16x128xf32>
    %300 = math.exp %299 : vector<16x128xf32>
    %cst_128 = arith.constant 1.000000e+00 : f32
    %301 = vector.broadcast %cst_128 : f32 to vector<16x128xf32>
    %302 = arith.addf %301, %300 : vector<16x128xf32>
    %cst_129 = arith.constant 1.000000e+00 : f32
    %303 = vector.broadcast %cst_129 : f32 to vector<16x128xf32>
    %304 = arith.divf %303, %302 : vector<16x128xf32>
    %305 = arith.cmpf olt, %293, %304 : vector<16x128xf32>
    %306 = arith.extui %305 : vector<16x128xi1> to vector<16x128xi32>
    %307 = arith.sitofp %306 : vector<16x128xi32> to vector<16x128xf32>
    %c9_130 = arith.constant 9 : index
    %c0_131 = arith.constant 0 : index
    %c0_132 = arith.constant 0 : index
    %308 = vector.load %arg6[%c9_130, %c0_131, %c0_132] : memref<10x16x256xf32, #tpu.memory_space<vmem>>, vector<1x16x256xf32>
    %309 = vector.shape_cast %308 : vector<1x16x256xf32> to vector<16x256xf32>
    %310 = arith.truncf %307 : vector<16x128xf32> to vector<16x128xbf16>
    %cst_133 = arith.constant dense<0.000000e+00> : vector<16x256xf32>
    %311 = tpu.matmul %310, %1, %cst_133 {dimension_numbers = #tpu.dot_dimension_numbers<[1], [0], [0], [1], [0, 0, 1, 1], [], []>} : vector<16x128xbf16>, vector<128x256xbf16>, vector<16x256xf32> -> vector<16x256xf32>
    %312 = vector.broadcast %3 : vector<1x256xf32> to vector<16x256xf32>
    %313 = arith.addf %311, %312 : vector<16x256xf32>
    %cst_134 = arith.constant 0.000000e+00 : f32
    %314 = vector.broadcast %cst_134 : f32 to vector<16x256xf32>
    %315 = arith.subf %314, %313 : vector<16x256xf32>
    %316 = math.exp %315 : vector<16x256xf32>
    %cst_135 = arith.constant 1.000000e+00 : f32
    %317 = vector.broadcast %cst_135 : f32 to vector<16x256xf32>
    %318 = arith.addf %317, %316 : vector<16x256xf32>
    %cst_136 = arith.constant 1.000000e+00 : f32
    %319 = vector.broadcast %cst_136 : f32 to vector<16x256xf32>
    %320 = arith.divf %319, %318 : vector<16x256xf32>
    %321 = arith.cmpf olt, %309, %320 : vector<16x256xf32>
    %322 = arith.extui %321 : vector<16x256xi1> to vector<16x256xi32>
    %323 = arith.sitofp %322 : vector<16x256xi32> to vector<16x256xf32>
    %324 = arith.truncf %323 : vector<16x256xf32> to vector<16x256xbf16>
    %c0_137 = arith.constant 0 : index
    %c0_138 = arith.constant 0 : index
    %325 = vector.load %arg7[%c0_137, %c0_138] : memref<16x256xbf16, #tpu.memory_space<vmem>>, vector<16x256xbf16>
    tpu.vector_store %arg7[%c0_137, %c0_138], %324 {strides = array<i32>} : memref<16x256xbf16, #tpu.memory_space<vmem>>, vector<16x256xbf16>,
    return
  }
  func.func @transform_0(%arg0: i32) -> (i32, i32) {
    %c0_i32 = arith.constant 0 : i32
    %c0_i32_0 = arith.constant 0 : i32
    return %arg0, %c0_i32 : i32, i32
  }
  func.func @transform_1(%arg0: i32) -> (i32, i32) {
    %c0_i32 = arith.constant 0 : i32
    %c0_i32_0 = arith.constant 0 : i32
    %c0_i32_1 = arith.constant 0 : i32
    return %c0_i32, %c0_i32_0 : i32, i32
  }
  func.func @transform_2(%arg0: i32) -> (i32, i32) {
    %c0_i32 = arith.constant 0 : i32
    %c0_i32_0 = arith.constant 0 : i32
    %c0_i32_1 = arith.constant 0 : i32
    return %c0_i32, %c0_i32_0 : i32, i32
  }
  func.func @transform_3(%arg0: i32) -> (i32, i32) {
    %c0_i32 = arith.constant 0 : i32
    %c0_i32_0 = arith.constant 0 : i32
    %c0_i32_1 = arith.constant 0 : i32
    return %c0_i32, %c0_i32_0 : i32, i32
  }
  func.func @transform_4(%arg0: i32) -> (i32, i32, i32) {
    %c0_i32 = arith.constant 0 : i32
    %c0_i32_0 = arith.constant 0 : i32
    %c0_i32_1 = arith.constant 0 : i32
    return %c0_i32, %arg0, %c0_i32_0 : i32, i32, i32
  }
  func.func @transform_5(%arg0: i32) -> (i32, i32, i32) {
    %c0_i32 = arith.constant 0 : i32
    %c0_i32_0 = arith.constant 0 : i32
    %c0_i32_1 = arith.constant 0 : i32
    return %c0_i32, %arg0, %c0_i32_0 : i32, i32, i32
  }
  func.func @transform_6(%arg0: i32) -> (i32, i32) {
    %c0_i32 = arith.constant 0 : i32
    %c0_i32_0 = arith.constant 0 : i32
    return %arg0, %c0_i32 : i32, i32
  }
}

</mosaic_0001>

<bundles_post_ra>
// kernel: tpu_custom_call.1
= control target key start
LH: loop header
LB: loop body
LE: loop exit
PB: predicated region body
PF: predicated region fallthrough
CT: control target
= control target key end

     0   :  { %s4449_s0 = inlined_call_operand.hbm [shape: f32[32,256], index: 0, kind: input, shape index: {}]   ;;  %s4450_s1 = inlined_call_operand.hbm [shape: bf16[128,256], index: 1, kind: input, shape index: {}]   ;;  %s4451_s2 = inlined_call_operand.hbm [shape: f32[1,128], index: 2, kind: input, shape index: {}]   ;;  %s4452_s3 = inlined_call_operand.vmem [shape: f32[1,256], index: 3, kind: input, shape index: {}]   ;;  %s4453_s4 = inlined_call_operand.hbm [shape: f32[10,32,128], index: 4, kind: input, shape index: {}]   ;;  %s4454_s5 = inlined_call_operand.hbm [shape: f32[10,32,256], index: 5, kind: input, shape index: {}]   ;;  %s4455_s6 = inlined_call_operand.hbm [shape: bf16[32,256], index: 6, kind: output, shape index: {}]  }
   0x1   :  { %4457 = sst [smem:[#allocation24_spill]] %s4450_s1 }
   0x2   :  { %4458 = sst [smem:[#allocation25_spill]] %s4451_s2 }
   0x3   :  { %11 = vsyncpa [#allocation3], 0 }
   0x4   :  { %13 = vsyncpa [#allocation3 + $0x1], 0 }
   0x5   :  { %14 = vsyncpa [#allocation6], 0 }
   0x6   :  { %15 = vsyncpa [#allocation9], 0 }
   0x7   :  { %17 = vsyncpa [#allocation9 + $0x1], 0 }
   0x8   :  { %18 = vsyncpa [#allocation4], 0 }
   0x9   :  { %20 = vsyncpa [#allocation4 + $0x1], 0  ;;  %s3569_s21 = smov 0   ;;  %s3571_s22 = smov 0  }
   0xa   :  { %s3573_s23 = smov 0   ;;  %s3575_s24 = smov 0  }
   0xb LB: > { %4459 = sst [smem:[#allocation22_spill]] %s3506_s23  ;;  %s3590_s25 = sadd.s32 4294967295, %s3510_s24   ;;  %s3510_s24 = sphi %s3575_s24, %s4508_s24   ;;  %s3506_s23 = sphi %s3573_s23, %s4505_s23   ;;  %s3502_s22 = sphi %s3571_s22, %s4507_s22   ;;  %s3498_s21 = sphi %s3569_s21, %s4506_s21  }
   0xc   : > { %s2694_s26 = sadd.s32 4294967294, %s3510_s24   ;;  %s3594_s27 = sadd.s32 1, %s3510_s24  }
   0xd   : > { %s33_s28 = sadd.s32 1, %s3506_s23  ;;  %s30_s29 = ssub.s32 %s3510_s24, %s3594_s27 }
   0xe   : > { %p40_p0 = scmp.ne.s32.totalorder %s3506_s23, %s3502_s22  ;;  %p31_p1 = scmp.eq.s32.totalorder %s30_s29, 0 }
   0xf   : > { %p41_p2 = scmp.eq.s32.totalorder %s3510_s24, 0  ;;  %p46_p3 = scmp.ne.s32.totalorder %s3502_s22, %s3498_s21 }
  0x10   : > { %p47_p4 = scmp.eq.s32.totalorder %s3590_s25, 0  ;;  %p185_p7 = scmp.eq.s32.totalorder %s3590_s25, 1 }
  0x11   : > { %s3606_s30 = scalar_select %p31_p1, %s3506_s23, %s33_s28  }
  0x12   : > { %p3608_p5 = por %p41_p2, %p40_p0  ;;  %p3614_p6 = por %p47_p4, %p46_p3 }
  0x13   : > { %4460 = sst [smem:[#allocation23_spill]] %s3606_s30  ;;  %p191_p8 = scmp.eq.s32.totalorder %s2694_s26, 1 }
  0x14   : > { %p2695_p9 = scmp.ge.s32.totalorder %s3510_s24, 1  ;;  %p198_p10 = scmp.lt.s32.totalorder %s3510_s24, 3 }
  0x15   : > { %p3621_p11 = por %p185_p7, %p40_p0  ;;  %p3625_p12 = por %p191_p8, %p46_p3 }
  0x16   : > { %p3629_p13 = pnand %p2695_p9, %p198_p10  ;;  %s4466_s1 = sld [smem:[#allocation24_spill]] }
  0x17   : > { %s3512_s15 = smov [#allocation5]   ;;  %s4467_s2 = sld [smem:[#allocation25_spill]] }
  0x18   : > { %p3034_p1 = pneg %p3629_p13  ;;  %s211_s16 = sshll.u32 %s3512_s15, 4  ;;  %s212_s16 = int_to_ptr.vmem [resolvable:$true] %s211_s16 }
  0x19   : > { %s3513_s20 = smov 128   ;;  %s3514_s26 = smov 8  }
  0x1a   : > { %p3035_p0 = pnand %p3034_p1, %p47_p4  ;;  %s3515_s28 = smov [#allocation7]  }
  0x1b   : > { %s226_s29 = sshll.u32 %s3515_s28, 4  ;;  %p2698_p2 = scmp.ge.s32.totalorder %s3510_s24, 2  ;;  %s227_s29 = int_to_ptr.vmem [resolvable:$true] %s226_s29 }
  0x1c   : > { %s209_s14 = sshll.u32 %s4466_s1, 4  ;;  %s3647_s12 = sand.u32 (!%p2698_p2), 1, %s3506_s23   ;;  %s210_s14 = int_to_ptr.hbm [resolvable:$true] %s209_s14 }
  0x1d   : > { %s224_s19 = sshll.u32 %s4467_s2, 4  ;;  %236 = sbr.rel (%p2698_p2) target bundleno = 74 (0x4a), region = 28  ;;  %s225_s19 = int_to_ptr.hbm [resolvable:$true] %s224_s19 }
  0x1e   : > { %3037 = dma.hbm_to_vmem [thread:$0]  (!%p3035_p0), %s210_s14, 2048, %s212_s16, [#allocation6], %s3513_s20, %s3513_s20, %s3514_s26  }
  0x1f   : > { %3040 = dma.hbm_to_vmem [thread:$0]  (!%p3035_p0), %s225_s19, 16, %s227_s29, [#allocation6]  }
  0x20   : > { %s2978_s13 = sshll.u32 (!%p2698_p2), %s3510_s24, 5  ;;  %s2699_s14 = sshll.u32 (!%p2698_p2), %s3647_s12, 5 }
  0x21   : > { %s250_s17 = scalar_lea.hbm (!%p2698_p2), %s4449_s0, %s2978_s13  ;;  %s244_s19 = scalar_lea.vmem (!%p2698_p2), [#allocation2], %s2699_s14 }
  0x22   : > { %s251_s18 = sshll.u32 %s250_s17, 4  ;;  %s253_s20 = sshll.u32 %s244_s19, 4  ;;  %s252_s18 = int_to_ptr.hbm [resolvable:$true] %s251_s18  ;;  %s254_s20 = int_to_ptr.vmem [resolvable:$true] %s253_s20 }
  0x23   : > { %s241_s26 = scalar_lea.sflag [#allocation3], %s3647_s12  ;;  %s3408_s28 = sshra.s32 %s252_s18, 4  ;;  %s3409_s28 = int_to_ptr.hbm [resolvable:$true] %s3408_s28 }
  0x24   : > { %s3410_s29 = scalar_lea.hbm %s3409_s28, 32  ;;  %s3414_s30 = scalar_lea.hbm %s4449_s0, 64 }
  0x25   : > { %p3411_p3 = scmp.ne.s32.totalorder %s3409_s28, %s3410_s29  ;;  %p3415_p9 = scmp.lt.s32.totalorder %s3409_s28, %s4449_s0 }
  0x26   : > { %p3416_p10 = scmp.lt.s32.totalorder %s3414_s30, %s3410_s29 }
  0x27   : > { %p3412_p7 = pnand %p3411_p3, %p3608_p5 }
  0x28   : > { %p3417_p1 = por %p3416_p10, %p3415_p9 }
  0x29   : > { %p3413_p8 = pneg %p3412_p7 }
  0x2b   : > { %p3418_p0 = pnand %p3417_p1, %p3413_p8 }
  0x2d   : > { %3421 = shalt.err (!%p3418_p0)
}
  0x2e   : > { %s3516_s14 = smov 256   ;;  %s3517_s16 = smov 16  }
  0x2f   : > { %3008 = dma.hbm_to_vmem [thread:$0]  (%p3608_p5), %s252_s18, 512, %s254_s20, %s241_s26, %s3516_s14, %s3516_s14, %s3517_s16  }
  0x30   : > { %s263_s1 = sand.u32 1, %s3510_s24   ;;  %s3000_s2 = smul.u32 160, %s3647_s12 }
  0x31   : > { %s2979_s23 = sshll.u32 %s3510_s24, 4  ;;  %s3518_s15 = smov 512  }
  0x32   : > { %s272_s19 = scalar_lea.hbm %s4453_s4, %s2979_s23  ;;  %s267_s18 = scalar_lea.vmem [#allocation8], %s3000_s2 }
  0x33   : > { %s3009_s28 = scalar_select %p3608_p5, [#allocation0], [#allocation16] }
  0x34   : > { %s285_s29 = sshll.u32 %s272_s19, 4  ;;  %s287_s20 = sshll.u32 %s267_s18, 4  ;;  %s286_s29 = int_to_ptr.hbm [resolvable:$true] %s285_s29  ;;  %s288_s20 = int_to_ptr.vmem [resolvable:$true] %s287_s20 }
  0x35   : > { %s277_s26 = sld [smem:[%s3009_s28]]   ;;  %s3519_s14 = smov 256  }
  0x36   : > { %3010 = sst [smem:[#allocation13]] (%p3608_p5), %s3518_s15  ;;  %s3520_s16 = smov 2  }
  0x37   : > { %3011 = sst [smem:[#allocation13 + $0x1]] (%p3608_p5), %s3519_s14  ;;  %s3521_s23 = smov 128  }
  0x38   : > { %3012 = sst [smem:[#allocation13 + $0x2]] (%p3608_p5), %s3520_s16  ;;  %s3522_s30 = smov 8  }
  0x39   : > { %3013 = sst [smem:[#allocation13 + $0x3]] (%p3608_p5), %s3521_s23  ;;  %s3687_s19 = scalar_lea.sflag [#allocation9], %s263_s1 }
  0x3a   : > { %3014 = sst [smem:[#allocation13 + $0x4]] (%p3608_p5), %s3521_s23  ;;  %s3523_s28 = smov [#allocation12]  }
  0x3b   : > { %s2705_s17 = sshll.u32 %s277_s26, 26  ;;  %3015 = sst [smem:[#allocation13 + $0x5]] (%p3608_p5), %s3522_s30 }
  0x3c   : > { %s2706_s2 = sadd.s32 134217728, %s2705_s17 }
  0x3d   : > { %3016 = dma.general (%p3608_p5), %s286_s29, 2560, %s288_s20, %s3687_s19, %s3523_s28, [#allocation13], %s2706_s2, 0  }
  0x3e   : > { %s3001_s18 = smul.u32 320, %s3647_s12  ;;  %s320_s14 = scalar_lea.hbm %s4454_s5, %s2978_s13 }
  0x3f   : > { %s3017_s1 = scalar_select %p3608_p5, [#allocation0], [#allocation17] }
  0x40   : > { %s333_s16 = sshll.u32 %s320_s14, 4  ;;  %s314_s29 = scalar_lea.vmem [#allocation10], %s3001_s18  ;;  %s334_s16 = int_to_ptr.hbm [resolvable:$true] %s333_s16 }
  0x41   : > { %s325_s23 = sld [smem:[%s3017_s1]]   ;;  %s335_s20 = sshll.u32 %s314_s29, 4  ;;  %s336_s20 = int_to_ptr.vmem [resolvable:$true] %s335_s20 }
  0x42   : > { %s3524_s17 = smov 1024   ;;  %s3525_s12 = smov 512  }
  0x43   : > { %3018 = sst [smem:[#allocation15]] (%p3608_p5), %s3524_s17  ;;  %s3526_s13 = smov 2  }
  0x44   : > { %3019 = sst [smem:[#allocation15 + $0x1]] (%p3608_p5), %s3525_s12  ;;  %s3527_s30 = smov 256  }
  0x45   : > { %3020 = sst [smem:[#allocation15 + $0x2]] (%p3608_p5), %s3526_s13  ;;  %s3528_s18 = smov 16  }
  0x46   : > { %3021 = sst [smem:[#allocation15 + $0x3]] (%p3608_p5), %s3527_s30  ;;  %s3529_s26 = smov [#allocation14]  }
  0x47   : > { %s2710_s2 = sshll.u32 %s325_s23, 26  ;;  %3022 = sst [smem:[#allocation15 + $0x4]] (%p3608_p5), %s3527_s30 }
  0x48   : > { %s2711_s28 = sadd.s32 134217728, %s2710_s2  ;;  %3023 = sst [smem:[#allocation15 + $0x5]] (%p3608_p5), %s3528_s18 }
  0x49   : > { %3024 = dma.general (%p3608_p5), %s334_s16, 5120, %s336_s20, %s3687_s19, %s3529_s26, [#allocation15], %s2711_s28, 0  }
  0x4a PF: > { %360 = sbr.rel (%p3629_p13) target bundleno = 3611 (0xe1b), region = 44  ;;  %s3718_s15 = sand.u32 (!%p3629_p13), 1, %s3502_s22  }
  0x4b   : > { %s2713_s14 = sshll.u32 (!%p3629_p13), %s3718_s15, 5  ;;  %s363_s1 = scalar_lea.sflag (!%p3629_p13), [#allocation3], %s3718_s15 }
  0x4c   : > { %s3722_s23 = scalar_lea.vmem (!%p3629_p13), [#allocation2], %s2713_s14 }
  0x4f   : > { %3481 = dma.done.wait (%p3614_p6), %s363_s1, 512  }
  0x50   : > { %3483 = vsyncadd (%p3614_p6), %s363_s1, 4294966784 }
  0x51   : > { %3485 = dma.done.wait (%p47_p4), [#allocation6], 2064  }
  0x52   : > { %3487 = vsyncadd (%p47_p4), [#allocation6], 4294965232  ;;  %s382_s7 = sand.u32 1, %s3590_s25   ;;  %s3002_s11 = smul.u32 160, %s3718_s15 }
  0x53   : > { %s383_s19 = scalar_lea.sflag [#allocation9], %s382_s7 }
  0x54   : > { %s3734_s16 = scalar_lea.vmem [#allocation8], %s3002_s11 }
  0x55   : > { %3489 = dma.done.wait (%p3614_p6), %s383_s19, 7680  }
  0x56   : > { %3491 = vsyncadd (%p3614_p6), %s383_s19, 4294959616  ;;  %v2775_v0 = vld [vmem:[#allocation5 + $0x70] sm:$0xf]  ;;  %v2997_v1 = vld [vmem:[#allocation5 + $0x74] sm:$0xf0]  ;;  %s3003_s20 = smul.u32 320, %s3718_s15 }
  0x57   : > { %v2996_v2 = vld [vmem:[#allocation5 + $0x74] sm:$0xf]  ;;  %v3740_v3 = vor.u32 %v2997_v1, %v2775_v0  ;;  %v2777_v4 = vld [vmem:[#allocation5 + $0x78] sm:$0xf0]  ;;  %v2767_v6 = vld [vmem:[#allocation5 + $0x60] sm:$0xf] }
  0x58   : > { %v3742_v5 = vor.u32 %v2996_v2, %v2777_v4  ;;  %v2995_v7 = vld [vmem:[#allocation5 + $0x64] sm:$0xf0]  ;;  %v2994_v8 = vld [vmem:[#allocation5 + $0x64] sm:$0xf]  ;;  %v2769_v9 = vld [vmem:[#allocation5 + $0x68] sm:$0xf0] }
  0x59   : > { %549 = vmatpush.bf16.xpose.msra.mxu0 %v3740_v3  ;;  %631 = vmatpush.bf16.msra.mxu2 %v3740_v3  ;;  %v3748_v10 = vor.u32 %v2995_v7, %v2767_v6  ;;  %v3750_v11 = vor.u32 %v2994_v8, %v2769_v9  ;;  %v2759_v12 = vld [vmem:[#allocation5 + $0x50] sm:$0xf]  ;;  %v2993_v13 = vld [vmem:[#allocation5 + $0x54] sm:$0xf0]  ;;  %v2992_v14 = vld [vmem:[#allocation5 + $0x54] sm:$0xf] }
  0x5a   : > { %563 = vmatpush.bf16.xpose.msra.mxu1 %v3742_v5  ;;  %645 = vmatpush.bf16.msra.mxu3 %v3742_v5  ;;  %v2761_v15 = vld [vmem:[#allocation5 + $0x58] sm:$0xf0]  ;;  %v3754_v16 = vor.u32 %v2993_v13, %v2759_v12  ;;  %v2751_v18 = vld [vmem:[#allocation5 + $0x40] sm:$0xf]  ;;  %v2991_v19 = vld [vmem:[#allocation5 + $0x44] sm:$0xf0] }
  0x5b   : > { %v3756_v17 = vor.u32 %v2992_v14, %v2761_v15  ;;  %v2990_v20 = vld [vmem:[#allocation5 + $0x44] sm:$0xf]  ;;  %v2753_v21 = vld [vmem:[#allocation5 + $0x48] sm:$0xf0]  ;;  %v3762_v22 = vor.u32 %v2991_v19, %v2751_v18  ;;  %v2743_v24 = vld [vmem:[#allocation5 + $0x30] sm:$0xf] }
  0x5c   : > { %v3764_v23 = vor.u32 %v2990_v20, %v2753_v21  ;;  %v2989_v25 = vld [vmem:[#allocation5 + $0x34] sm:$0xf0]  ;;  %v2988_v26 = vld [vmem:[#allocation5 + $0x34] sm:$0xf]  ;;  %v2745_v27 = vld [vmem:[#allocation5 + $0x38] sm:$0xf0] }
  0x5d   : > { %632 = vmatpush.bf16.msra.mxu2 %v3748_v10  ;;  %v3768_v28 = vor.u32 %v2989_v25, %v2743_v24  ;;  %v3770_v29 = vor.u32 %v2988_v26, %v2745_v27  ;;  %v2735_v30 = vld [vmem:[#allocation5 + $0x20] sm:$0xf]  ;;  %v2987_v31 = vld [vmem:[#allocation5 + $0x24] sm:$0xf0]  ;;  %v2986_v32 = vld [vmem:[#allocation5 + $0x24] sm:$0xf] }
  0x5e   : > { %646 = vmatpush.bf16.msra.mxu3 %v3750_v11  ;;  %v2737_v33 = vld [vmem:[#allocation5 + $0x28] sm:$0xf0]  ;;  %v3776_v34 = vor.u32 %v2987_v31, %v2735_v30  ;;  %v2727_v36 = vld [vmem:[#allocation5 + $0x10] sm:$0xf]  ;;  %v2985_v37 = vld [vmem:[#allocation5 + $0x14] sm:$0xf0] }
  0x5f   : > { %v3778_v35 = vor.u32 %v2986_v32, %v2737_v33  ;;  %v2984_v38 = vld [vmem:[#allocation5 + $0x14] sm:$0xf]  ;;  %v2729_v39 = vld [vmem:[#allocation5 + $0x18] sm:$0xf0]  ;;  %v3782_v40 = vor.u32 %v2985_v37, %v2727_v36  ;;  %v2719_v42 = vld [vmem:[#allocation5] sm:$0xf] }
  0x60   : > { %v3784_v41 = vor.u32 %v2984_v38, %v2729_v39  ;;  %v2983_v43 = vld [vmem:[#allocation5 + $0x4] sm:$0xf0]  ;;  %v2982_v44 = vld [vmem:[#allocation5 + $0x4] sm:$0xf]  ;;  %v2721_v45 = vld [vmem:[#allocation5 + $0x8] sm:$0xf0] }
  0x61   : > { %550 = vmatpush.bf16.xpose.msra.mxu0 %v3748_v10  ;;  %633 = vmatpush.bf16.msra.mxu2 %v3754_v16  ;;  %v3790_v46 = vor.u32 %v2983_v43, %v2719_v42  ;;  %v3792_v47 = vor.u32 %v2982_v44, %v2721_v45  ;;  %v440_v48 = vld [vmem:[%s3722_s23] sm:$0xff]  ;;  %v442_v49 = vld [vmem:[%s3722_s23 + $0x10] sm:$0xff]  ;;  %v441_v50 = vld [vmem:[%s3722_s23 + $0x8] sm:$0xff]  ;;  %v3530_v43 = vmov 1.0|1.0   ;;  %s3917_s17 = scalar_lea.vmem [#allocation10], %s3003_s20 }
  0x62   : > { %564 = vmatpush.bf16.xpose.msra.mxu1 %v3750_v11  ;;  %647 = vmatpush.bf16.msra.mxu3 %v3756_v17  ;;  %v443_v51 = vld [vmem:[%s3722_s23 + $0x18] sm:$0xff]  ;;  %v464_v52 = vpack.c.bf16 %v442_v49, %v440_v48  ;;  %v3856_v54 = vld [vmem:[#allocation7] ss:$0 sm:$0xff]  ;;  %v462_v33 = vld [vmem:[%s3734_s16] sm:$0xff]  ;;  %s2716_s12 = sshll.u32 %s3718_s15, 4  ;;  %s2999_s13 = sshll.u32 %s3590_s25, 4 }
  0x63   : > { %v465_v53 = vpack.c.bf16 %v443_v51, %v441_v50  ;;  %v463_v36 = vld [vmem:[%s3734_s16 + $0x8] sm:$0xff]  ;;  %v461_v44 = vld [vmem:[%s4452_s3] sm:$0x3]  ;;  %s435_s2 = scalar_lea.vmem [#allocation11], %s2716_s12  ;;  %s2555_s25 = scalar_lea.hbm %s4455_s6, %s2999_s13 }
  0x64   : > { %v3883_v45 = vperm.slane %v461_v44, 0  ;;  %v3885_v48 = vperm.slane %v461_v44, 1  ;;  %s2556_s18 = sshll.u32 %s435_s2, 4  ;;  %s2558_s26 = sshll.u32 %s2555_s25, 4  ;;  %s2557_s18 = int_to_ptr.vmem [resolvable:$true] %s2556_s18  ;;  %s2559_s26 = int_to_ptr.hbm [resolvable:$true] %s2558_s26 }
  0x65   : > { %634 = vmatpush.bf16.msra.mxu2 %v3762_v22  ;;  %s2543_s14 = scalar_lea.sflag [#allocation4], %s3718_s15  ;;  %s3450_s1 = sshra.s32 %s2559_s26, 4  ;;  %s3451_s1 = int_to_ptr.hbm [resolvable:$true] %s3450_s1 }
  0x66   : > { %648 = vmatpush.bf16.msra.mxu3 %v3764_v23  ;;  %s3452_s23 = scalar_lea.hbm %s3451_s1, 16  ;;  %s3456_s19 = scalar_lea.hbm %s4455_s6, 32 }
  0x67   : > { %p3453_p4 = scmp.ne.s32.totalorder %s3451_s1, %s3452_s23  ;;  %p3457_p13 = scmp.lt.s32.totalorder %s3451_s1, %s4455_s6 }
  0x68   : > { %p3458_p3 = scmp.lt.s32.totalorder %s3456_s19, %s3452_s23 }
  0x69   : > { %551 = vmatpush.bf16.xpose.msra.mxu0 %v3754_v16  ;;  %635 = vmatpush.bf16.msra.mxu2 %v3768_v28  ;;  %p3454_p5 = pnand %p3453_p4, %p3621_p11 }
  0x6a   : > { %565 = vmatpush.bf16.xpose.msra.mxu1 %v3756_v17  ;;  %649 = vmatpush.bf16.msra.mxu3 %v3770_v29  ;;  %p3459_p7 = por %p3458_p3, %p3457_p13 }
  0x6b   : > { %p3455_p6 = pneg %p3454_p5 }
  0x6d   : > { %636 = vmatpush.bf16.msra.mxu2 %v3776_v34  ;;  %p3460_p8 = pnand %p3459_p7, %p3455_p6 }
  0x6e   : > { %650 = vmatpush.bf16.msra.mxu3 %v3778_v35 }
  0x71   : > { %552 = vmatpush.bf16.xpose.msra.mxu0 %v3762_v22  ;;  %637 = vmatpush.bf16.msra.mxu2 %v3782_v40 }
  0x72   : > { %566 = vmatpush.bf16.xpose.msra.mxu1 %v3764_v23  ;;  %651 = vmatpush.bf16.msra.mxu3 %v3784_v41 }
  0x75   : > { %638 = vmatpush.bf16.msra.mxu2 %v3790_v46 }
  0x76   : > { %652 = vmatpush.bf16.msra.mxu3 %v3792_v47 }
  0x79   : > { %752 = vmatpush.bf16.xpose.msrb.mxu2 %v3740_v3  ;;  %553 = vmatpush.bf16.xpose.msra.mxu0 %v3768_v28 }
  0x7a   : > { %766 = vmatpush.bf16.xpose.msrb.mxu3 %v3742_v5  ;;  %567 = vmatpush.bf16.xpose.msra.mxu1 %v3770_v29 }
  0x81   : > { %753 = vmatpush.bf16.xpose.msrb.mxu2 %v3748_v10  ;;  %554 = vmatpush.bf16.xpose.msra.mxu0 %v3776_v34 }
  0x82   : > { %767 = vmatpush.bf16.xpose.msrb.mxu3 %v3750_v11  ;;  %568 = vmatpush.bf16.xpose.msra.mxu1 %v3778_v35 }
  0x89   : > { %754 = vmatpush.bf16.xpose.msrb.mxu2 %v3754_v16  ;;  %555 = vmatpush.bf16.xpose.msra.mxu0 %v3782_v40 }
  0x8a   : > { %768 = vmatpush.bf16.xpose.msrb.mxu3 %v3756_v17  ;;  %569 = vmatpush.bf16.xpose.msra.mxu1 %v3784_v41 }
  0x91   : > { %755 = vmatpush.bf16.xpose.msrb.mxu2 %v3762_v22  ;;  %556 = vmatpush.bf16.xpose.msra.mxu0 %v3790_v46 }
  0x92   : > { %769 = vmatpush.bf16.xpose.msrb.mxu3 %v3764_v23  ;;  %570 = vmatpush.bf16.xpose.msra.mxu1 %v3792_v47 }
  0x98   : > { %557 = vmatmul.bf16.vlgmr.msra.gmra.mxu0 %v464_v52 }
  0x99   : > { %830 = vmatpush.bf16.msrb.mxu0 %v3740_v3  ;;  %756 = vmatpush.bf16.xpose.msrb.mxu2 %v3768_v28 }
  0x9a   : > { %844 = vmatpush.bf16.msrb.mxu1 %v3742_v5  ;;  %770 = vmatpush.bf16.xpose.msrb.mxu3 %v3770_v29 }
  0x9b   : > { %571 = vmatmul.bf16.vlgmr.msra.gmra.mxu1 %v465_v53 }
  0x9d   : > { %831 = vmatpush.bf16.msrb.mxu0 %v3748_v10 }
  0x9e   : > { %845 = vmatpush.bf16.msrb.mxu1 %v3750_v11 }
  0xa1   : > { %832 = vmatpush.bf16.msrb.mxu0 %v3754_v16  ;;  %757 = vmatpush.bf16.xpose.msrb.mxu2 %v3776_v34 }
  0xa2   : > { %846 = vmatpush.bf16.msrb.mxu1 %v3756_v17  ;;  %771 = vmatpush.bf16.xpose.msrb.mxu3 %v3778_v35 }
  0xa5   : > { %833 = vmatpush.bf16.msrb.mxu0 %v3762_v22 }
  0xa6   : > { %847 = vmatpush.bf16.msrb.mxu1 %v3764_v23 }
  0xa9   : > { %834 = vmatpush.bf16.msrb.mxu0 %v3768_v28  ;;  %758 = vmatpush.bf16.xpose.msrb.mxu2 %v3782_v40 }
  0xaa   : > { %848 = vmatpush.bf16.msrb.mxu1 %v3770_v29  ;;  %772 = vmatpush.bf16.xpose.msrb.mxu3 %v3784_v41 }
  0xad   : > { %835 = vmatpush.bf16.msrb.mxu0 %v3776_v34 }
  0xae   : > { %849 = vmatpush.bf16.msrb.mxu1 %v3778_v35 }
  0xb1   : > { %836 = vmatpush.bf16.msrb.mxu0 %v3782_v40  ;;  %759 = vmatpush.bf16.xpose.msrb.mxu2 %v3790_v46 }
  0xb2   : > { %850 = vmatpush.bf16.msrb.mxu1 %v3784_v41  ;;  %773 = vmatpush.bf16.xpose.msrb.mxu3 %v3792_v47 }
  0xb5   : > { %837 = vmatpush.bf16.msrb.mxu0 %v3790_v46 }
  0xb6   : > { %851 = vmatpush.bf16.msrb.mxu1 %v3792_v47 }
  0xb9   : > { %951 = vmatpush.bf16.xpose.msra.mxu0 %v3740_v3 }
  0xba   : > { %965 = vmatpush.bf16.xpose.msra.mxu1 %v3742_v5 }
  0xc1   : > { %952 = vmatpush.bf16.xpose.msra.mxu0 %v3748_v10 }
  0xc2   : > { %966 = vmatpush.bf16.xpose.msra.mxu1 %v3750_v11 }
  0xc9   : > { %953 = vmatpush.bf16.xpose.msra.mxu0 %v3754_v16 }
  0xca   : > { %967 = vmatpush.bf16.xpose.msra.mxu1 %v3756_v17 }
  0xd1   : > { %954 = vmatpush.bf16.xpose.msra.mxu0 %v3762_v22 }
  0xd2   : > { %968 = vmatpush.bf16.xpose.msra.mxu1 %v3764_v23 }
  0xd9   : > { %955 = vmatpush.bf16.xpose.msra.mxu0 %v3768_v28 }
  0xda   : > { %969 = vmatpush.bf16.xpose.msra.mxu1 %v3770_v29 }
  0xe1   : > { %956 = vmatpush.bf16.xpose.msra.mxu0 %v3776_v34 }
  0xe2   : > { %970 = vmatpush.bf16.xpose.msra.mxu1 %v3778_v35 }
  0xe9   : > { %957 = vmatpush.bf16.xpose.msra.mxu0 %v3782_v40 }
  0xea   : > { %971 = vmatpush.bf16.xpose.msra.mxu1 %v3784_v41 }
  0xf1   : > { %958 = vmatpush.bf16.xpose.msra.mxu0 %v3790_v46 }
  0xf2   : > { %972 = vmatpush.bf16.xpose.msra.mxu1 %v3792_v47 }
 0x115   : > { %v558_v55 = vpop.f32.mrf.mxu0 }
 0x116   : > { %v559_v56 = vadd.f32 %v3856_v54, %v558_v55 }
 0x118   : > { %v572_v57 = vpop.f32.mrf.mxu1 }
 0x119   : > { %v573_v58 = vadd.f32 %v572_v57, %v559_v56 }
 0x11b   : > { %v577_v59 = vsub.f32 0.0, %v573_v58 }
 0x11d   : > { %v579_v60 = vmul.f32 1.442695, %v577_v59  ;;  %v560_v61 = vpop.f32.mrf.mxu0 }
 0x11e   : > { %v561_v62 = vadd.f32 %v3856_v54, %v560_v61 }
 0x11f   : > { %3105 = vpow2.f32 %v579_v60 }
 0x120   : > { %v574_v63 = vpop.f32.mrf.mxu1 }
 0x121   : > { %v575_v0 = vadd.f32 %v574_v63, %v561_v62 }
 0x123   : > { %v578_v1 = vsub.f32 0.0, %v575_v0 }
 0x125   : > { %v3106_v2 = vpop.eup %3105  ;;  %v581_v4 = vmul.f32 1.442695, %v578_v1 }
 0x126   : > { %v583_v6 = vadd.f32 1.0, %v3106_v2 }
 0x127   : > { %3107 = vpow2.f32 %v581_v4 }
 0x128   : > { %3109 = vrcp.f32 %v583_v6  ;;  %v596_v20 = vand.u32 2147483648, %v583_v6  ;;  %vm590_vm1 = vweird.f32 %v583_v6  ;;  %v594_v21 = vand.u32 2147483647, %v583_v6 }
 0x12a   : > { %v597_v31 = vor.u32 1.1754944e-38, %v596_v20  ;;  %vm595_vm4 = vcmp.eq.f32.partialorder %v594_v21, 8.507059e+37 }
 0x12d   : > { %v3108_v7 = vpop.eup %3107 }
 0x12e   : > { %v3110_v8 = vpop.eup %3109  ;;  %v584_v9 = vadd.f32 1.0, %v3108_v7 }
 0x12f   : > { %v586_v12 = vmul.f32 %v3110_v8, %v583_v6  ;;  %vm591_vm0 = vweird.f32 %v3110_v8 }
 0x130   : > { %3111 = vrcp.f32 %v584_v9  ;;  %vm592_vm2 = vmor %vm590_vm1, %vm591_vm0  ;;  %v611_v25 = vand.u32 2147483648, %v584_v9  ;;  %v609_v30 = vand.u32 2147483647, %v584_v9  ;;  %vm605_vm5 = vweird.f32 %v584_v9 }
 0x131   : > { %v587_v13 = vsub.f32 1.0, %v586_v12 }
 0x132   : > { %v612_v38 = vor.u32 1.1754944e-38, %v611_v25  ;;  %vm610_vm7 = vcmp.eq.f32.partialorder %v609_v30, 8.507059e+37 }
 0x133   : > { %v588_v14 = vmul.f32 %v3110_v8, %v587_v13 }
 0x135   : > { %v589_v18 = vadd.f32 %v3110_v8, %v588_v14 }
 0x136   : > { %v3112_v15 = vpop.eup %3111 }
 0x137   : > { %v601_v19 = vmul.f32 %v3112_v15, %v584_v9  ;;  %v593_v26 = vsel %vm592_vm2, %v3110_v8, %v589_v18  ;;  %vm606_vm3 = vweird.f32 %v3112_v15 }
 0x138   : > { %v598_v37 = vsel %vm595_vm4, %v597_v31, %v593_v26  ;;  %vm607_vm6 = vmor %vm605_vm5, %vm606_vm3 }
 0x139   : > { %v602_v24 = vsub.f32 1.0, %v601_v19  ;;  %vm615_vm8 = vcmp.lt.f32.partialorder %v462_v33, %v598_v37 }
 0x13b   : > { %v603_v27 = vmul.f32 %v3112_v15, %v602_v24 }
 0x13d   : > { %v604_v32 = vadd.f32 %v3112_v15, %v603_v27 }
 0x13f   : > { %v608_v39 = vsel %vm607_vm6, %v3112_v15, %v604_v32 }
 0x140   : > { %v613_v42 = vsel %vm610_vm7, %v612_v38, %v608_v39 }
 0x141   : > { %vm616_vm9 = vcmp.lt.f32.partialorder %v463_v36, %v613_v42 }
 0x142   : > { %vm2783_vm10 = vmpackc.low %vm616_vm9, %vm615_vm8 }
 0x143   : > { %2784 = vmatmul.msk.bf16.vlgmr.msra.gmra.mxu2 %vm2783_vm10, %v3530_v43  ;;  %2786 = vmatmul.msk.bf16.vlgmr.msra.gmra.mxu3 %vm2783_vm10, %v3530_v43 }
 0x144   : > { %1029 = vmatpush.bf16.msra.mxu2 %v3740_v3  ;;  %1043 = vmatpush.bf16.msra.mxu3 %v3742_v5 }
 0x148   : > { %1030 = vmatpush.bf16.msra.mxu2 %v3748_v10  ;;  %1044 = vmatpush.bf16.msra.mxu3 %v3750_v11 }
 0x14c   : > { %1031 = vmatpush.bf16.msra.mxu2 %v3754_v16  ;;  %1045 = vmatpush.bf16.msra.mxu3 %v3756_v17 }
 0x150   : > { %1032 = vmatpush.bf16.msra.mxu2 %v3762_v22  ;;  %1046 = vmatpush.bf16.msra.mxu3 %v3764_v23 }
 0x154   : > { %1033 = vmatpush.bf16.msra.mxu2 %v3768_v28  ;;  %1047 = vmatpush.bf16.msra.mxu3 %v3770_v29 }
 0x158   : > { %1034 = vmatpush.bf16.msra.mxu2 %v3776_v34  ;;  %1048 = vmatpush.bf16.msra.mxu3 %v3778_v35 }
 0x15c   : > { %1035 = vmatpush.bf16.msra.mxu2 %v3782_v40  ;;  %1049 = vmatpush.bf16.msra.mxu3 %v3784_v41 }
 0x160   : > { %1036 = vmatpush.bf16.msra.mxu2 %v3790_v46  ;;  %1050 = vmatpush.bf16.msra.mxu3 %v3792_v47 }
 0x1c6   : > { %v640_v49 = vpop.f32.mrf.mxu2  ;;  %v654_v50 = vpop.f32.mrf.mxu3 }
 0x1c7   : > { %v641_v51 = vadd.f32 %v640_v49, %v3883_v45  ;;  %v655_v52 = vadd.f32 %v654_v50, %v3885_v48 }
 0x1c9   : > { %v659_v53 = vsub.f32 0.0, %v641_v51  ;;  %v660_v55 = vsub.f32 0.0, %v655_v52 }
 0x1cb   : > { %v663_v56 = vmul.f32 1.442695, %v659_v53  ;;  %v665_v57 = vmul.f32 1.442695, %v660_v55 }
 0x1cd   : > { %3113 = vpow2.f32 %v663_v56 }
 0x1ce   : > { %3115 = vpow2.f32 %v665_v57  ;;  %v642_v58 = vpop.f32.mrf.mxu2  ;;  %v656_v59 = vpop.f32.mrf.mxu3 }
 0x1cf   : > { %v643_v60 = vadd.f32 %v642_v58, %v3883_v45  ;;  %v657_v61 = vadd.f32 %v656_v59, %v3885_v48 }
 0x1d1   : > { %v661_v62 = vsub.f32 0.0, %v643_v60  ;;  %v662_v63 = vsub.f32 0.0, %v657_v61  ;;  %v617_v61 = vld [vmem:[%s3917_s17] sm:$0xff] }
 0x1d3   : > { %v3114_v0 = vpop.eup %3113  ;;  %v667_v1 = vmul.f32 1.442695, %v661_v62  ;;  %v669_v6 = vmul.f32 1.442695, %v662_v63  ;;  %v619_v62 = vld [vmem:[%s3917_s17 + $0x10] sm:$0xff] }
 0x1d4   : > { %v3116_v2 = vpop.eup %3115  ;;  %v671_v4 = vadd.f32 1.0, %v3114_v0 }
 0x1d5   : > { %v3891_v7 = vadd.f32 1.0, %v3116_v2  ;;  %3117 = vpow2.f32 %v667_v1 }
 0x1d6   : > { %3119 = vrcp.f32 %v671_v4  ;;  %vm680_vm12 = vweird.f32 %v671_v4  ;;  %v684_v31 = vand.u32 2147483647, %v671_v4  ;;  %v686_v32 = vand.u32 2147483648, %v671_v4 }
 0x1d7   : > { %3121 = vrcp.f32 %v3891_v7  ;;  %vm695_vm13 = vweird.f32 %v3891_v7  ;;  %v699_v38 = vand.u32 2147483647, %v3891_v7  ;;  %v701_v49 = vand.u32 2147483648, %v3891_v7 }
 0x1d8   : > { %3123 = vpow2.f32 %v669_v6  ;;  %vm685_vm1 = vcmp.eq.f32.partialorder %v684_v31, 8.507059e+37  ;;  %v687_v53 = vor.u32 1.1754944e-38, %v686_v32 }
 0x1d9   : > { %vm700_vm7 = vcmp.eq.f32.partialorder %v699_v38, 8.507059e+37 }
 0x1db   : > { %v3118_v8 = vpop.eup %3117 }
 0x1dc   : > { %v3120_v9 = vpop.eup %3119  ;;  %v673_v12 = vadd.f32 1.0, %v3118_v8  ;;  %v618_v8 = vld [vmem:[%s3917_s17 + $0x8] sm:$0xff] }
 0x1dd   : > { %v3894_v13 = vpop.eup %3121  ;;  %v676_v14 = vmul.f32 %v3120_v9, %v671_v4  ;;  %vm681_vm11 = vweird.f32 %v3120_v9  ;;  %v702_v4 = vor.u32 1.1754944e-38, %v701_v49 }
 0x1de   : > { %v3124_v15 = vpop.eup %3123  ;;  %v691_v18 = vmul.f32 %v3894_v13, %v3891_v7  ;;  %3125 = vrcp.f32 %v673_v12  ;;  %v716_v37 = vand.u32 2147483648, %v673_v12  ;;  %vm3902_vm14 = vmor %vm680_vm12, %vm681_vm11  ;;  %vm696_vm15 = vweird.f32 %v3894_v13 }
 0x1df   : > { %v674_v19 = vadd.f32 1.0, %v3124_v15  ;;  %v677_v20 = vsub.f32 1.0, %v676_v14  ;;  %v714_v52 = vand.u32 2147483647, %v673_v12  ;;  %vm710_vm2 = vweird.f32 %v673_v12  ;;  %vm3913_vm3 = vmor %vm695_vm13, %vm696_vm15 }
 0x1e0   : > { %v692_v21 = vsub.f32 1.0, %v691_v18  ;;  %v717_v57 = vor.u32 1.1754944e-38, %v716_v37 }
 0x1e1   : > { %3127 = vrcp.f32 %v674_v19  ;;  %v678_v24 = vmul.f32 %v3120_v9, %v677_v20  ;;  %v729_v59 = vand.u32 2147483647, %v674_v19  ;;  %v731_v60 = vand.u32 2147483648, %v674_v19 }
 0x1e2   : > { %v693_v26 = vmul.f32 %v3894_v13, %v692_v21  ;;  %vm715_vm6 = vcmp.eq.f32.partialorder %v714_v52, 8.507059e+37  ;;  %vm725_vm8 = vweird.f32 %v674_v19 }
 0x1e3   : > { %v679_v30 = vadd.f32 %v3120_v9, %v678_v24  ;;  %v732_v14 = vor.u32 1.1754944e-38, %v731_v60  ;;  %vm730_vm13 = vcmp.eq.f32.partialorder %v729_v59, 8.507059e+37 }
 0x1e4   : > { %v3126_v25 = vpop.eup %3125  ;;  %v694_v44 = vadd.f32 %v3894_v13, %v693_v26 }
 0x1e5   : > { %v706_v27 = vmul.f32 %v3126_v25, %v673_v12  ;;  %v683_v50 = vsel %vm3902_vm14, %v3120_v9, %v679_v30  ;;  %vm711_vm0 = vweird.f32 %v3126_v25  ;;  %v620_v9 = vld [vmem:[%s3917_s17 + $0x18] sm:$0xff] }
 0x1e6   : > { %v688_v63 = vsel %vm685_vm1, %v687_v53, %v683_v50  ;;  %vm712_vm4 = vmor %vm710_vm2, %vm711_vm0  ;;  %v698_v0 = vsel %vm3913_vm3, %v3894_v13, %v694_v44 }
 0x1e7   : > { %v3128_v33 = vpop.eup %3127  ;;  %v707_v36 = vsub.f32 1.0, %v706_v27  ;;  %vm735_vm9 = vcmp.lt.f32.partialorder %v617_v61, %v688_v63  ;;  %v703_v12 = vsel %vm700_vm7, %v702_v4, %v698_v0  ;;  %v2787_v0 = vld [vmem:[%s3734_s16 + $0x10] sm:$0xff] }
 0x1e8   : > { %v721_v39 = vmul.f32 %v3128_v33, %v674_v19  ;;  %vm726_vm5 = vweird.f32 %v3128_v33  ;;  %vm736_vm14 = vcmp.lt.f32.partialorder %v618_v8, %v703_v12 }
 0x1e9   : > { %v708_v51 = vmul.f32 %v3126_v25, %v707_v36  ;;  %vm727_vm11 = vmor %vm725_vm8, %vm726_vm5 }
 0x1ea   : > { %v722_v55 = vsub.f32 1.0, %v721_v39 }
 0x1eb   : > { %v709_v56 = vadd.f32 %v3126_v25, %v708_v51 }
 0x1ec   : > { %v723_v1 = vmul.f32 %v3128_v33, %v722_v55 }
 0x1ed   : > { %v713_v2 = vsel %vm712_vm4, %v3126_v25, %v709_v56 }
 0x1ee   : > { %v718_v6 = vsel %vm715_vm6, %v717_v57, %v713_v2  ;;  %v724_v7 = vadd.f32 %v3128_v33, %v723_v1  ;;  %v2788_v1 = vld [vmem:[%s3734_s16 + $0x18] sm:$0xff] }
 0x1ef   : > { %vm737_vm10 = vcmp.lt.f32.partialorder %v619_v62, %v718_v6 }
 0x1f0   : > { %vm2793_vm12 = vmpackc.low %vm737_vm10, %vm735_vm9  ;;  %v728_v15 = vsel %vm727_vm11, %v3128_v33, %v724_v7 }
 0x1f1   : > { %2794 = vmatmul.msk.bf16.vlgmr.msrb.gmra.mxu2 %vm2793_vm12, %v3530_v43  ;;  %v733_v13 = vsel %vm730_vm13, %v732_v14, %v728_v15 }
 0x1f2   : > { %vm738_vm15 = vcmp.lt.f32.partialorder %v620_v9, %v733_v13  ;;  %1150 = vmatpush.bf16.xpose.msrb.mxu2 %v3740_v3 }
 0x1f3   : > { %vm2795_vm0 = vmpackc.low %vm738_vm15, %vm736_vm14 }
 0x1f4   : > { %2796 = vmatmul.msk.bf16.vlgmr.msrb.gmra.mxu3 %vm2795_vm0, %v3530_v43 }
 0x1f5   : > { %1164 = vmatpush.bf16.xpose.msrb.mxu3 %v3742_v5 }
 0x1fa   : > { %1151 = vmatpush.bf16.xpose.msrb.mxu2 %v3748_v10 }
 0x1fd   : > { %1165 = vmatpush.bf16.xpose.msrb.mxu3 %v3750_v11 }
 0x202   : > { %1152 = vmatpush.bf16.xpose.msrb.mxu2 %v3754_v16 }
 0x205   : > { %1166 = vmatpush.bf16.xpose.msrb.mxu3 %v3756_v17 }
 0x20a   : > { %1153 = vmatpush.bf16.xpose.msrb.mxu2 %v3762_v22 }
 0x20d   : > { %1167 = vmatpush.bf16.xpose.msrb.mxu3 %v3764_v23 }
 0x212   : > { %1154 = vmatpush.bf16.xpose.msrb.mxu2 %v3768_v28 }
 0x215   : > { %1168 = vmatpush.bf16.xpose.msrb.mxu3 %v3770_v29 }
 0x21a   : > { %1155 = vmatpush.bf16.xpose.msrb.mxu2 %v3776_v34 }
 0x21d   : > { %1169 = vmatpush.bf16.xpose.msrb.mxu3 %v3778_v35 }
 0x222   : > { %1156 = vmatpush.bf16.xpose.msrb.mxu2 %v3782_v40 }
 0x225   : > { %1170 = vmatpush.bf16.xpose.msrb.mxu3 %v3784_v41 }
 0x22a   : > { %1157 = vmatpush.bf16.xpose.msrb.mxu2 %v3790_v46 }
 0x22d   : > { %1171 = vmatpush.bf16.xpose.msrb.mxu3 %v3792_v47 }
 0x274   : > { %v761_v18 = vpop.f32.mrf.mxu2 }
 0x275   : > { %v762_v19 = vadd.f32 %v3856_v54, %v761_v18 }
 0x277   : > { %v775_v20 = vpop.f32.mrf.mxu3 }
 0x278   : > { %v776_v21 = vadd.f32 %v775_v20, %v762_v19 }
 0x27a   : > { %v780_v24 = vsub.f32 0.0, %v776_v21 }
 0x27c   : > { %v782_v25 = vmul.f32 1.442695, %v780_v24  ;;  %v763_v26 = vpop.f32.mrf.mxu2 }
 0x27d   : > { %v764_v27 = vadd.f32 %v3856_v54, %v763_v26 }
 0x27e   : > { %3129 = vpow2.f32 %v782_v25 }
 0x27f   : > { %v777_v30 = vpop.f32.mrf.mxu3 }
 0x280   : > { %v778_v31 = vadd.f32 %v777_v30, %v764_v27 }
 0x282   : > { %v781_v32 = vsub.f32 0.0, %v778_v31 }
 0x284   : > { %v3130_v33 = vpop.eup %3129  ;;  %v784_v36 = vmul.f32 1.442695, %v781_v32 }
 0x285   : > { %v786_v37 = vadd.f32 1.0, %v3130_v33 }
 0x286   : > { %3131 = vpow2.f32 %v784_v36 }
 0x287   : > { %3133 = vrcp.f32 %v786_v37  ;;  %v799_v55 = vand.u32 2147483648, %v786_v37  ;;  %vm793_vm2 = vweird.f32 %v786_v37  ;;  %v797_v56 = vand.u32 2147483647, %v786_v37 }
 0x289   : > { %v800_v62 = vor.u32 1.1754944e-38, %v799_v55  ;;  %vm798_vm5 = vcmp.eq.f32.partialorder %v797_v56, 8.507059e+37 }
 0x28c   : > { %v3132_v38 = vpop.eup %3131 }
 0x28d   : > { %v3134_v39 = vpop.eup %3133  ;;  %v787_v42 = vadd.f32 1.0, %v3132_v38 }
 0x28e   : > { %v789_v44 = vmul.f32 %v3134_v39, %v786_v37  ;;  %vm794_vm1 = vweird.f32 %v3134_v39 }
 0x28f   : > { %3135 = vrcp.f32 %v787_v42  ;;  %vm795_vm3 = vmor %vm793_vm2, %vm794_vm1  ;;  %v814_v58 = vand.u32 2147483648, %v787_v42  ;;  %v812_v61 = vand.u32 2147483647, %v787_v42  ;;  %vm808_vm6 = vweird.f32 %v787_v42 }
 0x290   : > { %v790_v49 = vsub.f32 1.0, %v789_v44 }
 0x291   : > { %v815_v4 = vor.u32 1.1754944e-38, %v814_v58  ;;  %vm813_vm8 = vcmp.eq.f32.partialorder %v812_v61, 8.507059e+37 }
 0x292   : > { %v791_v50 = vmul.f32 %v3134_v39, %v790_v49 }
 0x294   : > { %v792_v53 = vadd.f32 %v3134_v39, %v791_v50 }
 0x295   : > { %v3136_v51 = vpop.eup %3135 }
 0x296   : > { %v804_v52 = vmul.f32 %v3136_v51, %v787_v42  ;;  %v796_v59 = vsel %vm795_vm3, %v3134_v39, %v792_v53  ;;  %vm809_vm4 = vweird.f32 %v3136_v51 }
 0x297   : > { %v801_v2 = vsel %vm798_vm5, %v800_v62, %v796_v59  ;;  %vm810_vm7 = vmor %vm808_vm6, %vm809_vm4 }
 0x298   : > { %v805_v57 = vsub.f32 1.0, %v804_v52  ;;  %vm818_vm9 = vcmp.lt.f32.partialorder %v2787_v0, %v801_v2 }
 0x29a   : > { %v806_v60 = vmul.f32 %v3136_v51, %v805_v57 }
 0x29c   : > { %v807_v63 = vadd.f32 %v3136_v51, %v806_v60 }
 0x29e   : > { %v811_v6 = vsel %vm810_vm7, %v3136_v51, %v807_v63 }
 0x29f   : > { %v816_v7 = vsel %vm813_vm8, %v815_v4, %v811_v6 }
 0x2a0   : > { %vm819_vm10 = vcmp.lt.f32.partialorder %v2788_v1, %v816_v7 }
 0x2a1   : > { %vm2803_vm11 = vmpackc.low %vm819_vm10, %vm818_vm9 }
 0x2a2   : > { %2804 = vmatmul.msk.bf16.vlgmr.msrb.gmra.mxu0 %vm2803_vm11, %v3530_v43  ;;  %2806 = vmatmul.msk.bf16.vlgmr.msrb.gmra.mxu1 %vm2803_vm11, %v3530_v43 }
 0x2a3   : > { %1228 = vmatpush.bf16.msrb.mxu0 %v3740_v3  ;;  %1242 = vmatpush.bf16.msrb.mxu1 %v3742_v5 }
 0x2a7   : > { %1229 = vmatpush.bf16.msrb.mxu0 %v3748_v10  ;;  %1243 = vmatpush.bf16.msrb.mxu1 %v3750_v11 }
 0x2ab   : > { %1230 = vmatpush.bf16.msrb.mxu0 %v3754_v16  ;;  %1244 = vmatpush.bf16.msrb.mxu1 %v3756_v17 }
 0x2af   : > { %1231 = vmatpush.bf16.msrb.mxu0 %v3762_v22  ;;  %1245 = vmatpush.bf16.msrb.mxu1 %v3764_v23 }
 0x2b3   : > { %1232 = vmatpush.bf16.msrb.mxu0 %v3768_v28  ;;  %1246 = vmatpush.bf16.msrb.mxu1 %v3770_v29 }
 0x2b7   : > { %1233 = vmatpush.bf16.msrb.mxu0 %v3776_v34  ;;  %1247 = vmatpush.bf16.msrb.mxu1 %v3778_v35 }
 0x2bb   : > { %1234 = vmatpush.bf16.msrb.mxu0 %v3782_v40  ;;  %1248 = vmatpush.bf16.msrb.mxu1 %v3784_v41 }
 0x2bf   : > { %1235 = vmatpush.bf16.msrb.mxu0 %v3790_v46  ;;  %1249 = vmatpush.bf16.msrb.mxu1 %v3792_v47 }
 0x31f   : > { %v839_v8 = vpop.f32.mrf.mxu0  ;;  %v853_v9 = vpop.f32.mrf.mxu1 }
 0x320   : > { %v840_v12 = vadd.f32 %v839_v8, %v3883_v45  ;;  %v854_v14 = vadd.f32 %v853_v9, %v3885_v48 }
 0x322   : > { %v858_v15 = vsub.f32 0.0, %v840_v12  ;;  %v859_v13 = vsub.f32 0.0, %v854_v14 }
 0x324   : > { %v862_v18 = vmul.f32 1.442695, %v858_v15  ;;  %v864_v19 = vmul.f32 1.442695, %v859_v13 }
 0x326   : > { %3137 = vpow2.f32 %v862_v18 }
 0x327   : > { %3139 = vpow2.f32 %v864_v19  ;;  %v841_v20 = vpop.f32.mrf.mxu0  ;;  %v855_v21 = vpop.f32.mrf.mxu1 }
 0x328   : > { %v842_v24 = vadd.f32 %v841_v20, %v3883_v45  ;;  %v856_v25 = vadd.f32 %v855_v21, %v3885_v48 }
 0x32a   : > { %v860_v26 = vsub.f32 0.0, %v842_v24  ;;  %v861_v27 = vsub.f32 0.0, %v856_v25  ;;  %v2797_v25 = vld [vmem:[%s3917_s17 + $0x20] sm:$0xff] }
 0x32c   : > { %v3138_v30 = vpop.eup %3137  ;;  %v866_v31 = vmul.f32 1.442695, %v860_v26  ;;  %v868_v36 = vmul.f32 1.442695, %v861_v27  ;;  %v2799_v26 = vld [vmem:[%s3917_s17 + $0x30] sm:$0xff] }
 0x32d   : > { %v3140_v32 = vpop.eup %3139  ;;  %v870_v33 = vadd.f32 1.0, %v3138_v30 }
 0x32e   : > { %v871_v37 = vadd.f32 1.0, %v3140_v32  ;;  %3141 = vpow2.f32 %v866_v31 }
 0x32f   : > { %3143 = vrcp.f32 %v870_v33  ;;  %vm879_vm13 = vweird.f32 %v870_v33  ;;  %v883_v61 = vand.u32 2147483647, %v870_v33  ;;  %v885_v62 = vand.u32 2147483648, %v870_v33 }
 0x330   : > { %3145 = vrcp.f32 %v871_v37  ;;  %vm894_vm14 = vweird.f32 %v871_v37  ;;  %v898_v2 = vand.u32 2147483647, %v871_v37  ;;  %v900_v8 = vand.u32 2147483648, %v871_v37 }
 0x331   : > { %3147 = vpow2.f32 %v868_v36  ;;  %vm884_vm2 = vcmp.eq.f32.partialorder %v883_v61, 8.507059e+37  ;;  %v886_v13 = vor.u32 1.1754944e-38, %v885_v62 }
 0x332   : > { %vm899_vm8 = vcmp.eq.f32.partialorder %v898_v2, 8.507059e+37 }
 0x334   : > { %v3142_v38 = vpop.eup %3141 }
 0x335   : > { %v3144_v39 = vpop.eup %3143  ;;  %v872_v42 = vadd.f32 1.0, %v3142_v38  ;;  %v2798_v38 = vld [vmem:[%s3917_s17 + $0x28] sm:$0xff] }
 0x336   : > { %v3146_v44 = vpop.eup %3145  ;;  %v875_v49 = vmul.f32 %v3144_v39, %v870_v33  ;;  %vm880_vm12 = vweird.f32 %v3144_v39  ;;  %v901_v33 = vor.u32 1.1754944e-38, %v900_v8 }
 0x337   : > { %v3148_v50 = vpop.eup %3147  ;;  %v890_v51 = vmul.f32 %v3146_v44, %v871_v37  ;;  %3149 = vrcp.f32 %v872_v42  ;;  %v915_v1 = vand.u32 2147483648, %v872_v42  ;;  %vm3971_vm15 = vmor %vm879_vm13, %vm880_vm12  ;;  %vm895_vm0 = vweird.f32 %v3146_v44 }
 0x338   : > { %v876_v52 = vsub.f32 1.0, %v875_v49  ;;  %v873_v53 = vadd.f32 1.0, %v3148_v50  ;;  %v913_v14 = vand.u32 2147483647, %v872_v42  ;;  %vm909_vm3 = vweird.f32 %v872_v42  ;;  %vm3978_vm4 = vmor %vm894_vm14, %vm895_vm0 }
 0x339   : > { %v891_v55 = vsub.f32 1.0, %v890_v51  ;;  %v916_v19 = vor.u32 1.1754944e-38, %v915_v1 }
 0x33a   : > { %3151 = vrcp.f32 %v873_v53  ;;  %v877_v56 = vmul.f32 %v3144_v39, %v876_v52  ;;  %v928_v21 = vand.u32 2147483647, %v873_v53  ;;  %v930_v24 = vand.u32 2147483648, %v873_v53 }
 0x33b   : > { %v892_v58 = vmul.f32 %v3146_v44, %v891_v55  ;;  %vm914_vm7 = vcmp.eq.f32.partialorder %v913_v14, 8.507059e+37  ;;  %vm924_vm9 = vweird.f32 %v873_v53 }
 0x33c   : > { %v878_v60 = vadd.f32 %v3144_v39, %v877_v56  ;;  %v931_v49 = vor.u32 1.1754944e-38, %v930_v24  ;;  %vm929_vm14 = vcmp.eq.f32.partialorder %v928_v21, 8.507059e+37 }
 0x33d   : > { %v3150_v57 = vpop.eup %3149  ;;  %v893_v7 = vadd.f32 %v3146_v44, %v892_v58 }
 0x33e   : > { %v905_v59 = vmul.f32 %v3150_v57, %v872_v42  ;;  %v882_v9 = vsel %vm3971_vm15, %v3144_v39, %v878_v60  ;;  %vm910_vm1 = vweird.f32 %v3150_v57  ;;  %v2800_v39 = vld [vmem:[%s3917_s17 + $0x38] sm:$0xff] }
 0x33f   : > { %v887_v27 = vsel %vm884_vm2, %v886_v13, %v882_v9  ;;  %vm911_vm5 = vmor %vm909_vm3, %vm910_vm1  ;;  %v897_v30 = vsel %vm3978_vm4, %v3146_v44, %v893_v7 }
 0x340   : > { %v3152_v63 = vpop.eup %3151  ;;  %v906_v0 = vsub.f32 1.0, %v905_v59  ;;  %vm934_vm10 = vcmp.lt.f32.partialorder %v2797_v25, %v887_v27  ;;  %v902_v42 = vsel %vm899_vm8, %v901_v33, %v897_v30  ;;  %v2807_v27 = vld [vmem:[%s3734_s16 + $0x20] sm:$0xff]  ;;  %v2808_v30 = vld [vmem:[%s3734_s16 + $0x28] sm:$0xff] }
 0x341   : > { %v920_v4 = vmul.f32 %v3152_v63, %v873_v53  ;;  %vm925_vm6 = vweird.f32 %v3152_v63  ;;  %vm935_vm15 = vcmp.lt.f32.partialorder %v2798_v38, %v902_v42 }
 0x342   : > { %v907_v12 = vmul.f32 %v3150_v57, %v906_v0  ;;  %vm926_vm12 = vmor %vm924_vm9, %vm925_vm6 }
 0x343   : > { %v921_v15 = vsub.f32 1.0, %v920_v4 }
 0x344   : > { %v908_v18 = vadd.f32 %v3150_v57, %v907_v12 }
 0x345   : > { %v922_v31 = vmul.f32 %v3152_v63, %v921_v15 }
 0x346   : > { %v912_v32 = vsel %vm911_vm5, %v3150_v57, %v908_v18 }
 0x347   : > { %v917_v36 = vsel %vm914_vm7, %v916_v19, %v912_v32  ;;  %v923_v37 = vadd.f32 %v3152_v63, %v922_v31 }
 0x348   : > { %vm936_vm11 = vcmp.lt.f32.partialorder %v2799_v26, %v917_v36 }
 0x349   : > { %vm2813_vm13 = vmpackc.low %vm936_vm11, %vm934_vm10  ;;  %v927_v50 = vsel %vm926_vm12, %v3152_v63, %v923_v37 }
 0x34a   : > { %2814 = vmatmul.msk.bf16.vlgmr.msra.gmra.mxu0 %vm2813_vm13, %v3530_v43  ;;  %v932_v44 = vsel %vm929_vm14, %v931_v49, %v927_v50 }
 0x34b   : > { %vm937_vm0 = vcmp.lt.f32.partialorder %v2800_v39, %v932_v44  ;;  %1349 = vmatpush.bf16.xpose.msra.mxu0 %v3740_v3 }
 0x34c   : > { %vm2815_vm1 = vmpackc.low %vm937_vm0, %vm935_vm15 }
 0x34d   : > { %2816 = vmatmul.msk.bf16.vlgmr.msra.gmra.mxu1 %vm2815_vm1, %v3530_v43 }
 0x34e   : > { %1363 = vmatpush.bf16.xpose.msra.mxu1 %v3742_v5 }
 0x353   : > { %1350 = vmatpush.bf16.xpose.msra.mxu0 %v3748_v10 }
 0x356   : > { %1364 = vmatpush.bf16.xpose.msra.mxu1 %v3750_v11 }
 0x35b   : > { %1351 = vmatpush.bf16.xpose.msra.mxu0 %v3754_v16 }
 0x35e   : > { %1365 = vmatpush.bf16.xpose.msra.mxu1 %v3756_v17 }
 0x363   : > { %1352 = vmatpush.bf16.xpose.msra.mxu0 %v3762_v22 }
 0x366   : > { %1366 = vmatpush.bf16.xpose.msra.mxu1 %v3764_v23 }
 0x36b   : > { %1353 = vmatpush.bf16.xpose.msra.mxu0 %v3768_v28 }
 0x36e   : > { %1367 = vmatpush.bf16.xpose.msra.mxu1 %v3770_v29 }
 0x373   : > { %1354 = vmatpush.bf16.xpose.msra.mxu0 %v3776_v34 }
 0x376   : > { %1368 = vmatpush.bf16.xpose.msra.mxu1 %v3778_v35 }
 0x37b   : > { %1355 = vmatpush.bf16.xpose.msra.mxu0 %v3782_v40 }
 0x37e   : > { %1369 = vmatpush.bf16.xpose.msra.mxu1 %v3784_v41 }
 0x383   : > { %1356 = vmatpush.bf16.xpose.msra.mxu0 %v3790_v46 }
 0x386   : > { %1370 = vmatpush.bf16.xpose.msra.mxu1 %v3792_v47 }
 0x3c7   : > { %v960_v51 = vpop.f32.mrf.mxu0 }
 0x3c8   : > { %v961_v52 = vadd.f32 %v3856_v54, %v960_v51 }
 0x3ca   : > { %v974_v53 = vpop.f32.mrf.mxu1 }
 0x3cb   : > { %v975_v55 = vadd.f32 %v974_v53, %v961_v52 }
 0x3cd   : > { %v979_v56 = vsub.f32 0.0, %v975_v55 }
 0x3cf   : > { %v981_v57 = vmul.f32 1.442695, %v979_v56  ;;  %v962_v58 = vpop.f32.mrf.mxu0 }
 0x3d0   : > { %v963_v59 = vadd.f32 %v3856_v54, %v962_v58 }
 0x3d1   : > { %3153 = vpow2.f32 %v981_v57 }
 0x3d2   : > { %v976_v60 = vpop.f32.mrf.mxu1 }
 0x3d3   : > { %v977_v61 = vadd.f32 %v976_v60, %v963_v59 }
 0x3d5   : > { %v980_v62 = vsub.f32 0.0, %v977_v61 }
 0x3d7   : > { %v3154_v63 = vpop.eup %3153  ;;  %v983_v0 = vmul.f32 1.442695, %v980_v62 }
 0x3d8   : > { %v985_v1 = vadd.f32 1.0, %v3154_v63 }
 0x3d9   : > { %3155 = vpow2.f32 %v983_v0 }
 0x3da   : > { %3157 = vrcp.f32 %v985_v1  ;;  %v998_v54 = vand.u32 2147483648, %v985_v1  ;;  %vm992_vm3 = vweird.f32 %v985_v1  ;;  %v996_v18 = vand.u32 2147483647, %v985_v1 }
 0x3dc   : > { %v999_v25 = vor.u32 1.1754944e-38, %v998_v54  ;;  %vm997_vm6 = vcmp.eq.f32.partialorder %v996_v18, 8.507059e+37 }
 0x3df   : > { %v3156_v2 = vpop.eup %3155 }
 0x3e0   : > { %v3158_v4 = vpop.eup %3157  ;;  %v986_v6 = vadd.f32 1.0, %v3156_v2 }
 0x3e1   : > { %v988_v7 = vmul.f32 %v3158_v4, %v985_v1  ;;  %vm993_vm2 = vweird.f32 %v3158_v4 }
 0x3e2   : > { %3159 = vrcp.f32 %v986_v6  ;;  %vm994_vm4 = vmor %vm992_vm3, %vm993_vm2  ;;  %v1013_v19 = vand.u32 2147483648, %v986_v6  ;;  %v1011_v24 = vand.u32 2147483647, %v986_v6  ;;  %vm1007_vm7 = vweird.f32 %v986_v6 }
 0x3e3   : > { %v989_v8 = vsub.f32 1.0, %v988_v7 }
 0x3e4   : > { %v1014_v32 = vor.u32 1.1754944e-38, %v1013_v19  ;;  %vm1012_vm9 = vcmp.eq.f32.partialorder %v1011_v24, 8.507059e+37 }
 0x3e5   : > { %v990_v9 = vmul.f32 %v3158_v4, %v989_v8 }
 0x3e7   : > { %v991_v15 = vadd.f32 %v3158_v4, %v990_v9 }
 0x3e8   : > { %v3160_v12 = vpop.eup %3159 }
 0x3e9   : > { %v1003_v14 = vmul.f32 %v3160_v12, %v986_v6  ;;  %v995_v20 = vsel %vm994_vm4, %v3158_v4, %v991_v15  ;;  %vm1008_vm5 = vweird.f32 %v3160_v12 }
 0x3ea   : > { %v1000_v31 = vsel %vm997_vm6, %v999_v25, %v995_v20  ;;  %vm1009_vm8 = vmor %vm1007_vm7, %vm1008_vm5 }
 0x3eb   : > { %v1004_v13 = vsub.f32 1.0, %v1003_v14  ;;  %vm1017_vm10 = vcmp.lt.f32.partialorder %v2807_v27, %v1000_v31 }
 0x3ed   : > { %v1005_v21 = vmul.f32 %v3160_v12, %v1004_v13 }
 0x3ef   : > { %v1006_v26 = vadd.f32 %v3160_v12, %v1005_v21 }
 0x3f1   : > { %v1010_v33 = vsel %vm1009_vm8, %v3160_v12, %v1006_v26 }
 0x3f2   : > { %v1015_v36 = vsel %vm1012_vm9, %v1014_v32, %v1010_v33 }
 0x3f3   : > { %vm1018_vm11 = vcmp.lt.f32.partialorder %v2808_v30, %v1015_v36 }
 0x3f4   : > { %vm2823_vm12 = vmpackc.low %vm1018_vm11, %vm1017_vm10 }
 0x3f5   : > { %2824 = vmatmul.msk.bf16.vlgmr.msra.gmra.mxu2 %vm2823_vm12, %v3530_v43  ;;  %2826 = vmatmul.msk.bf16.vlgmr.msra.gmra.mxu3 %vm2823_vm12, %v3530_v43 }
 0x3f6   : > { %1427 = vmatpush.bf16.msra.mxu2 %v3740_v3  ;;  %1441 = vmatpush.bf16.msra.mxu3 %v3742_v5 }
 0x3fa   : > { %1428 = vmatpush.bf16.msra.mxu2 %v3748_v10  ;;  %1442 = vmatpush.bf16.msra.mxu3 %v3750_v11 }
 0x3fe   : > { %1429 = vmatpush.bf16.msra.mxu2 %v3754_v16  ;;  %1443 = vmatpush.bf16.msra.mxu3 %v3756_v17 }
 0x402   : > { %1430 = vmatpush.bf16.msra.mxu2 %v3762_v22  ;;  %1444 = vmatpush.bf16.msra.mxu3 %v3764_v23 }
 0x406   : > { %1431 = vmatpush.bf16.msra.mxu2 %v3768_v28  ;;  %1445 = vmatpush.bf16.msra.mxu3 %v3770_v29 }
 0x40a   : > { %1432 = vmatpush.bf16.msra.mxu2 %v3776_v34  ;;  %1446 = vmatpush.bf16.msra.mxu3 %v3778_v35 }
 0x40e   : > { %1433 = vmatpush.bf16.msra.mxu2 %v3782_v40  ;;  %1447 = vmatpush.bf16.msra.mxu3 %v3784_v41 }
 0x412   : > { %1434 = vmatpush.bf16.msra.mxu2 %v3790_v46  ;;  %1448 = vmatpush.bf16.msra.mxu3 %v3792_v47 }
 0x478   : > { %v1038_v37 = vpop.f32.mrf.mxu2  ;;  %v1052_v38 = vpop.f32.mrf.mxu3 }
 0x479   : > { %v1039_v39 = vadd.f32 %v1038_v37, %v3883_v45  ;;  %v1053_v42 = vadd.f32 %v1052_v38, %v3885_v48 }
 0x47b   : > { %v1057_v49 = vsub.f32 0.0, %v1039_v39  ;;  %v1058_v50 = vsub.f32 0.0, %v1053_v42 }
 0x47d   : > { %v1061_v44 = vmul.f32 1.442695, %v1057_v49  ;;  %v1063_v51 = vmul.f32 1.442695, %v1058_v50 }
 0x47f   : > { %3161 = vpow2.f32 %v1061_v44 }
 0x480   : > { %3163 = vpow2.f32 %v1063_v51  ;;  %v1040_v52 = vpop.f32.mrf.mxu2  ;;  %v1054_v53 = vpop.f32.mrf.mxu3 }
 0x481   : > { %v1041_v55 = vadd.f32 %v1040_v52, %v3883_v45  ;;  %v1055_v56 = vadd.f32 %v1054_v53, %v3885_v48 }
 0x483   : > { %v1059_v57 = vsub.f32 0.0, %v1041_v55  ;;  %v1060_v58 = vsub.f32 0.0, %v1055_v56  ;;  %v2817_v55 = vld [vmem:[%s3917_s17 + $0x40] sm:$0xff]  ;;  %v2819_v56 = vld [vmem:[%s3917_s17 + $0x50] sm:$0xff] }
 0x485   : > { %v3162_v59 = vpop.eup %3161  ;;  %v1065_v60 = vmul.f32 1.442695, %v1059_v57  ;;  %v1067_v63 = vmul.f32 1.442695, %v1060_v58 }
 0x486   : > { %v3164_v61 = vpop.eup %3163  ;;  %v1069_v62 = vadd.f32 1.0, %v3162_v59 }
 0x487   : > { %v1070_v0 = vadd.f32 1.0, %v3164_v61  ;;  %3165 = vpow2.f32 %v1065_v60 }
 0x488   : > { %3167 = vrcp.f32 %v1069_v62  ;;  %vm1078_vm14 = vweird.f32 %v1069_v62  ;;  %v1082_v21 = vand.u32 2147483647, %v1069_v62  ;;  %v1084_v24 = vand.u32 2147483648, %v1069_v62 }
 0x489   : > { %3169 = vrcp.f32 %v1070_v0  ;;  %vm1093_vm15 = vweird.f32 %v1070_v0  ;;  %v1097_v30 = vand.u32 2147483647, %v1070_v0  ;;  %v1099_v36 = vand.u32 2147483648, %v1070_v0 }
 0x48a   : > { %3171 = vpow2.f32 %v1067_v63  ;;  %vm1083_vm3 = vcmp.eq.f32.partialorder %v1082_v21, 8.507059e+37  ;;  %v1085_v49 = vor.u32 1.1754944e-38, %v1084_v24 }
 0x48b   : > { %v1100_v61 = vor.u32 1.1754944e-38, %v1099_v36  ;;  %vm1098_vm9 = vcmp.eq.f32.partialorder %v1097_v30, 8.507059e+37 }
 0x48d   : > { %v3166_v1 = vpop.eup %3165 }
 0x48e   : > { %v3168_v2 = vpop.eup %3167  ;;  %v1071_v4 = vadd.f32 1.0, %v3166_v1  ;;  %v2820_v1 = vld [vmem:[%s3917_s17 + $0x58] sm:$0xff] }
 0x48f   : > { %v3170_v6 = vpop.eup %3169  ;;  %v1074_v7 = vmul.f32 %v3168_v2, %v1069_v62  ;;  %vm1079_vm13 = vweird.f32 %v3168_v2 }
 0x490   : > { %v3172_v8 = vpop.eup %3171  ;;  %v1089_v9 = vmul.f32 %v3170_v6, %v1070_v0  ;;  %3173 = vrcp.f32 %v1071_v4  ;;  %v1114_v27 = vand.u32 2147483648, %v1071_v4  ;;  %vm4032_vm0 = vmor %vm1078_vm14, %vm1079_vm13  ;;  %vm1094_vm1 = vweird.f32 %v3170_v6  ;;  %v2818_v0 = vld [vmem:[%s3917_s17 + $0x48] sm:$0xff] }
 0x491   : > { %v1075_v12 = vsub.f32 1.0, %v1074_v7  ;;  %v1072_v14 = vadd.f32 1.0, %v3172_v8  ;;  %v1112_v39 = vand.u32 2147483647, %v1071_v4  ;;  %vm1108_vm4 = vweird.f32 %v1071_v4  ;;  %vm4039_vm5 = vmor %vm1093_vm15, %vm1094_vm1 }
 0x492   : > { %v1090_v15 = vsub.f32 1.0, %v1089_v9  ;;  %v1115_v44 = vor.u32 1.1754944e-38, %v1114_v27  ;;  %v4067_v9 = vld [vmem:[#allocation7] ss:$0 sm:$0xff] }
 0x493   : > { %3175 = vrcp.f32 %v1072_v14  ;;  %v1076_v54 = vmul.f32 %v3168_v2, %v1075_v12  ;;  %v1127_v52 = vand.u32 2147483647, %v1072_v14  ;;  %v1129_v53 = vand.u32 2147483648, %v1072_v14 }
 0x494   : > { %v1091_v18 = vmul.f32 %v3170_v6, %v1090_v15  ;;  %vm1113_vm8 = vcmp.eq.f32.partialorder %v1112_v39, 8.507059e+37  ;;  %vm1123_vm10 = vweird.f32 %v1072_v14 }
 0x495   : > { %v1077_v20 = vadd.f32 %v3168_v2, %v1076_v54  ;;  %vm1128_vm15 = vcmp.eq.f32.partialorder %v1127_v52, 8.507059e+37 }
 0x496   : > { %v3174_v13 = vpop.eup %3173  ;;  %v1092_v33 = vadd.f32 %v3170_v6, %v1091_v18 }
 0x497   : > { %v1104_v19 = vmul.f32 %v3174_v13, %v1071_v4  ;;  %v1081_v37 = vsel %vm4032_vm0, %v3168_v2, %v1077_v20  ;;  %vm1109_vm2 = vweird.f32 %v3174_v13  ;;  %v1130_v4 = vor.u32 1.1754944e-38, %v1129_v53 }
 0x498   : > { %v1086_v57 = vsel %vm1083_vm3, %v1085_v49, %v1081_v37  ;;  %vm1110_vm6 = vmor %vm1108_vm4, %vm1109_vm2  ;;  %v1096_v58 = vsel %vm4039_vm5, %v3170_v6, %v1092_v33 }
 0x499   : > { %v3176_v25 = vpop.eup %3175  ;;  %v1105_v26 = vsub.f32 1.0, %v1104_v19  ;;  %vm1133_vm11 = vcmp.lt.f32.partialorder %v2817_v55, %v1086_v57  ;;  %v1101_v2 = vsel %vm1098_vm9, %v1100_v61, %v1096_v58  ;;  %v2827_v58 = vld [vmem:[%s3734_s16 + $0x30] sm:$0xff] }
 0x49a   : > { %v1119_v31 = vmul.f32 %v3176_v25, %v1072_v14  ;;  %vm1124_vm7 = vweird.f32 %v3176_v25  ;;  %vm1134_vm0 = vcmp.lt.f32.partialorder %v2818_v0, %v1101_v2 }
 0x49b   : > { %v1106_v38 = vmul.f32 %v3174_v13, %v1105_v26  ;;  %vm1125_vm13 = vmor %vm1123_vm10, %vm1124_vm7 }
 0x49c   : > { %v1120_v42 = vsub.f32 1.0, %v1119_v31 }
 0x49d   : > { %v1107_v50 = vadd.f32 %v3174_v13, %v1106_v38 }
 0x49e   : > { %v1121_v59 = vmul.f32 %v3176_v25, %v1120_v42 }
 0x49f   : > { %v1111_v60 = vsel %vm1110_vm6, %v3174_v13, %v1107_v50 }
 0x4a0   : > { %v1116_v62 = vsel %vm1113_vm8, %v1115_v44, %v1111_v60  ;;  %v1122_v63 = vadd.f32 %v3176_v25, %v1121_v59  ;;  %v2828_v59 = vld [vmem:[%s3734_s16 + $0x38] sm:$0xff] }
 0x4a1   : > { %vm1135_vm12 = vcmp.lt.f32.partialorder %v2819_v56, %v1116_v62 }
 0x4a2   : > { %vm2833_vm14 = vmpackc.low %vm1135_vm12, %vm1133_vm11  ;;  %v1126_v7 = vsel %vm1125_vm13, %v3176_v25, %v1122_v63 }
 0x4a3   : > { %2834 = vmatmul.msk.bf16.vlgmr.msrb.gmra.mxu2 %vm2833_vm14, %v3530_v43  ;;  %v1131_v6 = vsel %vm1128_vm15, %v1130_v4, %v1126_v7 }
 0x4a4   : > { %vm1136_vm1 = vcmp.lt.f32.partialorder %v2820_v1, %v1131_v6  ;;  %1548 = vmatpush.bf16.xpose.msrb.mxu2 %v3740_v3 }
 0x4a5   : > { %vm2835_vm2 = vmpackc.low %vm1136_vm1, %vm1134_vm0 }
 0x4a6   : > { %2836 = vmatmul.msk.bf16.vlgmr.msrb.gmra.mxu3 %vm2835_vm2, %v3530_v43 }
 0x4a7   : > { %1562 = vmatpush.bf16.xpose.msrb.mxu3 %v3742_v5 }
 0x4ac   : > { %1549 = vmatpush.bf16.xpose.msrb.mxu2 %v3748_v10 }
 0x4af   : > { %1563 = vmatpush.bf16.xpose.msrb.mxu3 %v3750_v11 }
 0x4b4   : > { %1550 = vmatpush.bf16.xpose.msrb.mxu2 %v3754_v16 }
 0x4b7   : > { %1564 = vmatpush.bf16.xpose.msrb.mxu3 %v3756_v17 }
 0x4bc   : > { %1551 = vmatpush.bf16.xpose.msrb.mxu2 %v3762_v22 }
 0x4bf   : > { %1565 = vmatpush.bf16.xpose.msrb.mxu3 %v3764_v23 }
 0x4c4   : > { %1552 = vmatpush.bf16.xpose.msrb.mxu2 %v3768_v28 }
 0x4c7   : > { %1566 = vmatpush.bf16.xpose.msrb.mxu3 %v3770_v29 }
 0x4cc   : > { %1553 = vmatpush.bf16.xpose.msrb.mxu2 %v3776_v34 }
 0x4cf   : > { %1567 = vmatpush.bf16.xpose.msrb.mxu3 %v3778_v35 }
 0x4d4   : > { %1554 = vmatpush.bf16.xpose.msrb.mxu2 %v3782_v40 }
 0x4d7   : > { %1568 = vmatpush.bf16.xpose.msrb.mxu3 %v3784_v41 }
 0x4dc   : > { %1555 = vmatpush.bf16.xpose.msrb.mxu2 %v3790_v46 }
 0x4df   : > { %1569 = vmatpush.bf16.xpose.msrb.mxu3 %v3792_v47 }
 0x526   : > { %v1159_v8 = vpop.f32.mrf.mxu2 }
 0x527   : > { %v1160_v12 = vadd.f32 %v4067_v9, %v1159_v8 }
 0x529   : > { %v1173_v14 = vpop.f32.mrf.mxu3 }
 0x52a   : > { %v1174_v15 = vadd.f32 %v1173_v14, %v1160_v12 }
 0x52c   : > { %v1178_v54 = vsub.f32 0.0, %v1174_v15 }
 0x52e   : > { %v1180_v13 = vmul.f32 1.442695, %v1178_v54  ;;  %v1161_v18 = vpop.f32.mrf.mxu2 }
 0x52f   : > { %v1162_v19 = vadd.f32 %v4067_v9, %v1161_v18 }
 0x530   : > { %3177 = vpow2.f32 %v1180_v13 }
 0x531   : > { %v1175_v20 = vpop.f32.mrf.mxu3 }
 0x532   : > { %v1176_v21 = vadd.f32 %v1175_v20, %v1162_v19 }
 0x534   : > { %v1179_v24 = vsub.f32 0.0, %v1176_v21 }
 0x536   : > { %v3178_v25 = vpop.eup %3177  ;;  %v1182_v26 = vmul.f32 1.442695, %v1179_v24 }
 0x537   : > { %v1184_v27 = vadd.f32 1.0, %v3178_v25 }
 0x538   : > { %3179 = vpow2.f32 %v1182_v26 }
 0x539   : > { %3181 = vrcp.f32 %v1184_v27  ;;  %v1197_v49 = vand.u32 2147483648, %v1184_v27  ;;  %vm1191_vm4 = vweird.f32 %v1184_v27  ;;  %v1195_v44 = vand.u32 2147483647, %v1184_v27 }
 0x53b   : > { %v1198_v56 = vor.u32 1.1754944e-38, %v1197_v49  ;;  %vm1196_vm7 = vcmp.eq.f32.partialorder %v1195_v44, 8.507059e+37 }
 0x53e   : > { %v3180_v30 = vpop.eup %3179 }
 0x53f   : > { %v3182_v31 = vpop.eup %3181  ;;  %v1185_v32 = vadd.f32 1.0, %v3180_v30 }
 0x540   : > { %v1187_v33 = vmul.f32 %v3182_v31, %v1184_v27  ;;  %vm1192_vm3 = vweird.f32 %v3182_v31 }
 0x541   : > { %3183 = vrcp.f32 %v1185_v32  ;;  %vm1193_vm5 = vmor %vm1191_vm4, %vm1192_vm3  ;;  %v1212_v51 = vand.u32 2147483648, %v1185_v32  ;;  %v1210_v55 = vand.u32 2147483647, %v1185_v32  ;;  %vm1206_vm8 = vweird.f32 %v1185_v32 }
 0x542   : > { %v1188_v36 = vsub.f32 1.0, %v1187_v33 }
 0x543   : > { %v1213_v61 = vor.u32 1.1754944e-38, %v1212_v51  ;;  %vm1211_vm10 = vcmp.eq.f32.partialorder %v1210_v55, 8.507059e+37 }
 0x544   : > { %v1189_v37 = vmul.f32 %v3182_v31, %v1188_v36 }
 0x546   : > { %v1190_v42 = vadd.f32 %v3182_v31, %v1189_v37 }
 0x547   : > { %v3184_v38 = vpop.eup %3183 }
 0x548   : > { %v1202_v39 = vmul.f32 %v3184_v38, %v1185_v32  ;;  %v1194_v52 = vsel %vm1193_vm5, %v3182_v31, %v1190_v42  ;;  %vm1207_vm6 = vweird.f32 %v3184_v38 }
 0x549   : > { %v1199_v60 = vsel %vm1196_vm7, %v1198_v56, %v1194_v52  ;;  %vm1208_vm9 = vmor %vm1206_vm8, %vm1207_vm6 }
 0x54a   : > { %v1203_v50 = vsub.f32 1.0, %v1202_v39  ;;  %vm1216_vm11 = vcmp.lt.f32.partialorder %v2827_v58, %v1199_v60 }
 0x54c   : > { %v1204_v53 = vmul.f32 %v3184_v38, %v1203_v50 }
 0x54e   : > { %v1205_v57 = vadd.f32 %v3184_v38, %v1204_v53 }
 0x550   : > { %v1209_v62 = vsel %vm1208_vm9, %v3184_v38, %v1205_v57 }
 0x551   : > { %v1214_v63 = vsel %vm1211_vm10, %v1213_v61, %v1209_v62 }
 0x552   : > { %vm1217_vm12 = vcmp.lt.f32.partialorder %v2828_v59, %v1214_v63 }
 0x553   : > { %vm2843_vm13 = vmpackc.low %vm1217_vm12, %vm1216_vm11 }
 0x554   : > { %2844 = vmatmul.msk.bf16.vlgmr.msrb.gmra.mxu0 %vm2843_vm13, %v3530_v43  ;;  %2846 = vmatmul.msk.bf16.vlgmr.msrb.gmra.mxu1 %vm2843_vm13, %v3530_v43 }
 0x555   : > { %1626 = vmatpush.bf16.msrb.mxu0 %v3740_v3  ;;  %1640 = vmatpush.bf16.msrb.mxu1 %v3742_v5 }
 0x559   : > { %1627 = vmatpush.bf16.msrb.mxu0 %v3748_v10  ;;  %1641 = vmatpush.bf16.msrb.mxu1 %v3750_v11 }
 0x55d   : > { %1628 = vmatpush.bf16.msrb.mxu0 %v3754_v16  ;;  %1642 = vmatpush.bf16.msrb.mxu1 %v3756_v17 }
 0x561   : > { %1629 = vmatpush.bf16.msrb.mxu0 %v3762_v22  ;;  %1643 = vmatpush.bf16.msrb.mxu1 %v3764_v23 }
 0x565   : > { %1630 = vmatpush.bf16.msrb.mxu0 %v3768_v28  ;;  %1644 = vmatpush.bf16.msrb.mxu1 %v3770_v29 }
 0x569   : > { %1631 = vmatpush.bf16.msrb.mxu0 %v3776_v34  ;;  %1645 = vmatpush.bf16.msrb.mxu1 %v3778_v35 }
 0x56d   : > { %1632 = vmatpush.bf16.msrb.mxu0 %v3782_v40  ;;  %1646 = vmatpush.bf16.msrb.mxu1 %v3784_v41 }
 0x571   : > { %1633 = vmatpush.bf16.msrb.mxu0 %v3790_v46  ;;  %1647 = vmatpush.bf16.msrb.mxu1 %v3792_v47 }
 0x5d1   : > { %v1237_v0 = vpop.f32.mrf.mxu0  ;;  %v1251_v1 = vpop.f32.mrf.mxu1 }
 0x5d2   : > { %v1238_v2 = vadd.f32 %v1237_v0, %v3883_v45  ;;  %v1252_v4 = vadd.f32 %v1251_v1, %v3885_v48 }
 0x5d4   : > { %v1256_v7 = vsub.f32 0.0, %v1238_v2  ;;  %v1257_v6 = vsub.f32 0.0, %v1252_v4 }
 0x5d6   : > { %v1260_v8 = vmul.f32 1.442695, %v1256_v7  ;;  %v1262_v12 = vmul.f32 1.442695, %v1257_v6 }
 0x5d8   : > { %3185 = vpow2.f32 %v1260_v8 }
 0x5d9   : > { %3187 = vpow2.f32 %v1262_v12  ;;  %v1239_v14 = vpop.f32.mrf.mxu0  ;;  %v1253_v15 = vpop.f32.mrf.mxu1 }
 0x5da   : > { %v1240_v54 = vadd.f32 %v1239_v14, %v3883_v45  ;;  %v1254_v13 = vadd.f32 %v1253_v15, %v3885_v48 }
 0x5dc   : > { %v1258_v18 = vsub.f32 0.0, %v1240_v54  ;;  %v1259_v19 = vsub.f32 0.0, %v1254_v13  ;;  %v2837_v13 = vld [vmem:[%s3917_s17 + $0x60] sm:$0xff] }
 0x5de   : > { %v3186_v20 = vpop.eup %3185  ;;  %v1264_v21 = vmul.f32 1.442695, %v1258_v18  ;;  %v1266_v26 = vmul.f32 1.442695, %v1259_v19  ;;  %v2839_v18 = vld [vmem:[%s3917_s17 + $0x70] sm:$0xff] }
 0x5df   : > { %v3188_v24 = vpop.eup %3187  ;;  %v1268_v25 = vadd.f32 1.0, %v3186_v20 }
 0x5e0   : > { %v1269_v27 = vadd.f32 1.0, %v3188_v24  ;;  %3189 = vpow2.f32 %v1264_v21 }
 0x5e1   : > { %3191 = vrcp.f32 %v1268_v25  ;;  %vm1277_vm15 = vweird.f32 %v1268_v25  ;;  %v1281_v55 = vand.u32 2147483647, %v1268_v25  ;;  %v1283_v56 = vand.u32 2147483648, %v1268_v25 }
 0x5e2   : > { %3193 = vrcp.f32 %v1269_v27  ;;  %vm1292_vm0 = vweird.f32 %v1269_v27  ;;  %v1296_v60 = vand.u32 2147483647, %v1269_v27  ;;  %v1298_v0 = vand.u32 2147483648, %v1269_v27 }
 0x5e3   : > { %3195 = vpow2.f32 %v1266_v26  ;;  %vm1282_vm4 = vcmp.eq.f32.partialorder %v1281_v55, 8.507059e+37  ;;  %v1284_v6 = vor.u32 1.1754944e-38, %v1283_v56 }
 0x5e4   : > { %vm1297_vm10 = vcmp.eq.f32.partialorder %v1296_v60, 8.507059e+37 }
 0x5e6   : > { %v3190_v30 = vpop.eup %3189 }
 0x5e7   : > { %v3192_v31 = vpop.eup %3191  ;;  %v1270_v32 = vadd.f32 1.0, %v3190_v30  ;;  %v2838_v30 = vld [vmem:[%s3917_s17 + $0x68] sm:$0xff] }
 0x5e8   : > { %v3194_v33 = vpop.eup %3193  ;;  %v1273_v36 = vmul.f32 %v3192_v31, %v1268_v25  ;;  %vm1278_vm14 = vweird.f32 %v3192_v31  ;;  %v1299_v25 = vor.u32 1.1754944e-38, %v1298_v0 }
 0x5e9   : > { %v3196_v37 = vpop.eup %3195  ;;  %v1288_v38 = vmul.f32 %v3194_v33, %v1269_v27  ;;  %3197 = vrcp.f32 %v1270_v32  ;;  %v1313_v59 = vand.u32 2147483648, %v1270_v32  ;;  %vm4095_vm1 = vmor %vm1277_vm15, %vm1278_vm14  ;;  %vm1293_vm2 = vweird.f32 %v3194_v33 }
 0x5ea   : > { %v1274_v39 = vsub.f32 1.0, %v1273_v36  ;;  %v1271_v42 = vadd.f32 1.0, %v3196_v37  ;;  %v1311_v4 = vand.u32 2147483647, %v1270_v32  ;;  %vm1307_vm5 = vweird.f32 %v1270_v32  ;;  %vm4102_vm6 = vmor %vm1292_vm0, %vm1293_vm2 }
 0x5eb   : > { %v1289_v49 = vsub.f32 1.0, %v1288_v38  ;;  %v1314_v12 = vor.u32 1.1754944e-38, %v1313_v59 }
 0x5ec   : > { %3199 = vrcp.f32 %v1271_v42  ;;  %v1275_v50 = vmul.f32 %v3192_v31, %v1274_v39  ;;  %v1326_v15 = vand.u32 2147483647, %v1271_v42  ;;  %v1328_v54 = vand.u32 2147483648, %v1271_v42 }
 0x5ed   : > { %v1290_v51 = vmul.f32 %v3194_v33, %v1289_v49  ;;  %vm1312_vm9 = vcmp.eq.f32.partialorder %v1311_v4, 8.507059e+37  ;;  %vm1322_vm11 = vweird.f32 %v1271_v42 }
 0x5ee   : > { %v1276_v53 = vadd.f32 %v3192_v31, %v1275_v50  ;;  %v1329_v36 = vor.u32 1.1754944e-38, %v1328_v54  ;;  %vm1327_vm0 = vcmp.eq.f32.partialorder %v1326_v15, 8.507059e+37 }
 0x5ef   : > { %v3198_v44 = vpop.eup %3197  ;;  %v1291_v63 = vadd.f32 %v3194_v33, %v1290_v51 }
 0x5f0   : > { %v1303_v52 = vmul.f32 %v3198_v44, %v1270_v32  ;;  %v1280_v1 = vsel %vm4095_vm1, %v3192_v31, %v1276_v53  ;;  %vm1308_vm3 = vweird.f32 %v3198_v44  ;;  %v2840_v31 = vld [vmem:[%s3917_s17 + $0x78] sm:$0xff] }
 0x5f1   : > { %v1285_v19 = vsel %vm1282_vm4, %v1284_v6, %v1280_v1  ;;  %vm1309_vm7 = vmor %vm1307_vm5, %vm1308_vm3  ;;  %v1295_v20 = vsel %vm4102_vm6, %v3194_v33, %v1291_v63 }
 0x5f2   : > { %v3200_v57 = vpop.eup %3199  ;;  %v1304_v58 = vsub.f32 1.0, %v1303_v52  ;;  %vm1332_vm12 = vcmp.lt.f32.partialorder %v2837_v13, %v1285_v19  ;;  %v1300_v32 = vsel %vm1297_vm10, %v1299_v25, %v1295_v20  ;;  %v2847_v20 = vld [vmem:[%s3734_s16 + $0x40] sm:$0xff] }
 0x5f3   : > { %v1318_v61 = vmul.f32 %v3200_v57, %v1271_v42  ;;  %vm1323_vm8 = vweird.f32 %v3200_v57  ;;  %vm1333_vm1 = vcmp.lt.f32.partialorder %v2838_v30, %v1300_v32 }
 0x5f4   : > { %v1305_v2 = vmul.f32 %v3198_v44, %v1304_v58  ;;  %vm1324_vm14 = vmor %vm1322_vm11, %vm1323_vm8 }
 0x5f5   : > { %v1319_v7 = vsub.f32 1.0, %v1318_v61 }
 0x5f6   : > { %v1306_v8 = vadd.f32 %v3198_v44, %v1305_v2 }
 0x5f7   : > { %v1320_v21 = vmul.f32 %v3200_v57, %v1319_v7 }
 0x5f8   : > { %v1310_v24 = vsel %vm1309_vm7, %v3198_v44, %v1306_v8 }
 0x5f9   : > { %v1315_v26 = vsel %vm1312_vm9, %v1314_v12, %v1310_v24  ;;  %v1321_v27 = vadd.f32 %v3200_v57, %v1320_v21  ;;  %v2848_v21 = vld [vmem:[%s3734_s16 + $0x48] sm:$0xff] }
 0x5fa   : > { %vm1334_vm13 = vcmp.lt.f32.partialorder %v2839_v18, %v1315_v26 }
 0x5fb   : > { %vm2853_vm15 = vmpackc.low %vm1334_vm13, %vm1332_vm12  ;;  %v1325_v37 = vsel %vm1324_vm14, %v3200_v57, %v1321_v27 }
 0x5fc   : > { %2854 = vmatmul.msk.bf16.vlgmr.msra.gmra.mxu0 %vm2853_vm15, %v3530_v43  ;;  %v1330_v33 = vsel %vm1327_vm0, %v1329_v36, %v1325_v37 }
 0x5fd   : > { %vm1335_vm2 = vcmp.lt.f32.partialorder %v2840_v31, %v1330_v33  ;;  %1747 = vmatpush.bf16.xpose.msra.mxu0 %v3740_v3 }
 0x5fe   : > { %vm2855_vm3 = vmpackc.low %vm1335_vm2, %vm1333_vm1 }
 0x5ff   : > { %2856 = vmatmul.msk.bf16.vlgmr.msra.gmra.mxu1 %vm2855_vm3, %v3530_v43 }
 0x600   : > { %1761 = vmatpush.bf16.xpose.msra.mxu1 %v3742_v5 }
 0x605   : > { %1748 = vmatpush.bf16.xpose.msra.mxu0 %v3748_v10 }
 0x608   : > { %1762 = vmatpush.bf16.xpose.msra.mxu1 %v3750_v11 }
 0x60d   : > { %1749 = vmatpush.bf16.xpose.msra.mxu0 %v3754_v16 }
 0x610   : > { %1763 = vmatpush.bf16.xpose.msra.mxu1 %v3756_v17 }
 0x615   : > { %1750 = vmatpush.bf16.xpose.msra.mxu0 %v3762_v22 }
 0x618   : > { %1764 = vmatpush.bf16.xpose.msra.mxu1 %v3764_v23 }
 0x61d   : > { %1751 = vmatpush.bf16.xpose.msra.mxu0 %v3768_v28 }
 0x620   : > { %1765 = vmatpush.bf16.xpose.msra.mxu1 %v3770_v29 }
 0x625   : > { %1752 = vmatpush.bf16.xpose.msra.mxu0 %v3776_v34 }
 0x628   : > { %1766 = vmatpush.bf16.xpose.msra.mxu1 %v3778_v35 }
 0x62d   : > { %1753 = vmatpush.bf16.xpose.msra.mxu0 %v3782_v40 }
 0x630   : > { %1767 = vmatpush.bf16.xpose.msra.mxu1 %v3784_v41 }
 0x635   : > { %1754 = vmatpush.bf16.xpose.msra.mxu0 %v3790_v46 }
 0x638   : > { %1768 = vmatpush.bf16.xpose.msra.mxu1 %v3792_v47 }
 0x679   : > { %v1358_v38 = vpop.f32.mrf.mxu0 }
 0x67a   : > { %v1359_v39 = vadd.f32 %v4067_v9, %v1358_v38 }
 0x67c   : > { %v1372_v42 = vpop.f32.mrf.mxu1 }
 0x67d   : > { %v1373_v49 = vadd.f32 %v1372_v42, %v1359_v39 }
 0x67f   : > { %v1377_v50 = vsub.f32 0.0, %v1373_v49 }
 0x681   : > { %v1379_v44 = vmul.f32 1.442695, %v1377_v50  ;;  %v1360_v51 = vpop.f32.mrf.mxu0 }
 0x682   : > { %v1361_v52 = vadd.f32 %v4067_v9, %v1360_v51 }
 0x683   : > { %3201 = vpow2.f32 %v1379_v44 }
 0x684   : > { %v1374_v53 = vpop.f32.mrf.mxu1 }
 0x685   : > { %v1375_v55 = vadd.f32 %v1374_v53, %v1361_v52 }
 0x687   : > { %v1378_v56 = vsub.f32 0.0, %v1375_v55 }
 0x689   : > { %v3202_v57 = vpop.eup %3201  ;;  %v1381_v58 = vmul.f32 1.442695, %v1378_v56 }
 0x68a   : > { %v1383_v59 = vadd.f32 1.0, %v3202_v57 }
 0x68b   : > { %3203 = vpow2.f32 %v1381_v58 }
 0x68c   : > { %3205 = vrcp.f32 %v1383_v59  ;;  %v1396_v6 = vand.u32 2147483648, %v1383_v59  ;;  %vm1390_vm5 = vweird.f32 %v1383_v59  ;;  %v1394_v12 = vand.u32 2147483647, %v1383_v59 }
 0x68e   : > { %v1397_v18 = vor.u32 1.1754944e-38, %v1396_v6  ;;  %vm1395_vm8 = vcmp.eq.f32.partialorder %v1394_v12, 8.507059e+37 }
 0x691   : > { %v3204_v60 = vpop.eup %3203 }
 0x692   : > { %v3206_v61 = vpop.eup %3205  ;;  %v1384_v62 = vadd.f32 1.0, %v3204_v60 }
 0x693   : > { %v1386_v63 = vmul.f32 %v3206_v61, %v1383_v59  ;;  %vm1391_vm4 = vweird.f32 %v3206_v61 }
 0x694   : > { %3207 = vrcp.f32 %v1384_v62  ;;  %vm1392_vm6 = vmor %vm1390_vm5, %vm1391_vm4  ;;  %v1411_v14 = vand.u32 2147483648, %v1384_v62  ;;  %v1409_v13 = vand.u32 2147483647, %v1384_v62  ;;  %vm1405_vm9 = vweird.f32 %v1384_v62 }
 0x695   : > { %v1387_v0 = vsub.f32 1.0, %v1386_v63 }
 0x696   : > { %v1412_v25 = vor.u32 1.1754944e-38, %v1411_v14  ;;  %vm1410_vm11 = vcmp.eq.f32.partialorder %v1409_v13, 8.507059e+37 }
 0x697   : > { %v1388_v1 = vmul.f32 %v3206_v61, %v1387_v0 }
 0x699   : > { %v1389_v7 = vadd.f32 %v3206_v61, %v1388_v1 }
 0x69a   : > { %v3208_v2 = vpop.eup %3207 }
 0x69b   : > { %v1401_v4 = vmul.f32 %v3208_v2, %v1384_v62  ;;  %v1393_v15 = vsel %vm1392_vm6, %v3206_v61, %v1389_v7  ;;  %vm1406_vm7 = vweird.f32 %v3208_v2 }
 0x69c   : > { %v1398_v24 = vsel %vm1395_vm8, %v1397_v18, %v1393_v15  ;;  %vm1407_vm10 = vmor %vm1405_vm9, %vm1406_vm7 }
 0x69d   : > { %v1402_v8 = vsub.f32 1.0, %v1401_v4  ;;  %vm1415_vm12 = vcmp.lt.f32.partialorder %v2847_v20, %v1398_v24 }
 0x69f   : > { %v1403_v54 = vmul.f32 %v3208_v2, %v1402_v8 }
 0x6a1   : > { %v1404_v19 = vadd.f32 %v3208_v2, %v1403_v54 }
 0x6a3   : > { %v1408_v26 = vsel %vm1407_vm10, %v3208_v2, %v1404_v19 }
 0x6a4   : > { %v1413_v27 = vsel %vm1410_vm11, %v1412_v25, %v1408_v26 }
 0x6a5   : > { %vm1416_vm13 = vcmp.lt.f32.partialorder %v2848_v21, %v1413_v27 }
 0x6a6   : > { %vm2863_vm14 = vmpackc.low %vm1416_vm13, %vm1415_vm12 }
 0x6a7   : > { %2864 = vmatmul.msk.bf16.vlgmr.msra.gmra.mxu2 %vm2863_vm14, %v3530_v43  ;;  %2866 = vmatmul.msk.bf16.vlgmr.msra.gmra.mxu3 %vm2863_vm14, %v3530_v43 }
 0x6a8   : > { %1825 = vmatpush.bf16.msra.mxu2 %v3740_v3  ;;  %1839 = vmatpush.bf16.msra.mxu3 %v3742_v5 }
 0x6ac   : > { %1826 = vmatpush.bf16.msra.mxu2 %v3748_v10  ;;  %1840 = vmatpush.bf16.msra.mxu3 %v3750_v11 }
 0x6b0   : > { %1827 = vmatpush.bf16.msra.mxu2 %v3754_v16  ;;  %1841 = vmatpush.bf16.msra.mxu3 %v3756_v17 }
 0x6b4   : > { %1828 = vmatpush.bf16.msra.mxu2 %v3762_v22  ;;  %1842 = vmatpush.bf16.msra.mxu3 %v3764_v23 }
 0x6b8   : > { %1829 = vmatpush.bf16.msra.mxu2 %v3768_v28  ;;  %1843 = vmatpush.bf16.msra.mxu3 %v3770_v29 }
 0x6bc   : > { %1830 = vmatpush.bf16.msra.mxu2 %v3776_v34  ;;  %1844 = vmatpush.bf16.msra.mxu3 %v3778_v35 }
 0x6c0   : > { %1831 = vmatpush.bf16.msra.mxu2 %v3782_v40  ;;  %1845 = vmatpush.bf16.msra.mxu3 %v3784_v41 }
 0x6c4   : > { %1832 = vmatpush.bf16.msra.mxu2 %v3790_v46  ;;  %1846 = vmatpush.bf16.msra.mxu3 %v3792_v47 }
 0x72a   : > { %v1436_v30 = vpop.f32.mrf.mxu2  ;;  %v1450_v31 = vpop.f32.mrf.mxu3 }
 0x72b   : > { %v1437_v32 = vadd.f32 %v1436_v30, %v3883_v45  ;;  %v1451_v36 = vadd.f32 %v1450_v31, %v3885_v48 }
 0x72d   : > { %v1455_v37 = vsub.f32 0.0, %v1437_v32  ;;  %v1456_v33 = vsub.f32 0.0, %v1451_v36 }
 0x72f   : > { %v1459_v38 = vmul.f32 1.442695, %v1455_v37  ;;  %v1461_v39 = vmul.f32 1.442695, %v1456_v33 }
 0x731   : > { %3209 = vpow2.f32 %v1459_v38 }
 0x732   : > { %3211 = vpow2.f32 %v1461_v39  ;;  %v1438_v42 = vpop.f32.mrf.mxu2  ;;  %v1452_v49 = vpop.f32.mrf.mxu3 }
 0x733   : > { %v1439_v50 = vadd.f32 %v1438_v42, %v3883_v45  ;;  %v1453_v44 = vadd.f32 %v1452_v49, %v3885_v48 }
 0x735   : > { %v1457_v51 = vsub.f32 0.0, %v1439_v50  ;;  %v1458_v52 = vsub.f32 0.0, %v1453_v44  ;;  %v2857_v44 = vld [vmem:[%s3917_s17 + $0x80] sm:$0xff] }
 0x737   : > { %v3210_v53 = vpop.eup %3209  ;;  %v1463_v55 = vmul.f32 1.442695, %v1457_v51  ;;  %v1465_v58 = vmul.f32 1.442695, %v1458_v52  ;;  %v2859_v51 = vld [vmem:[%s3917_s17 + $0x90] sm:$0xff] }
 0x738   : > { %v3212_v56 = vpop.eup %3211  ;;  %v1467_v57 = vadd.f32 1.0, %v3210_v53 }
 0x739   : > { %v1468_v59 = vadd.f32 1.0, %v3212_v56  ;;  %3213 = vpow2.f32 %v1463_v55 }
 0x73a   : > { %3215 = vrcp.f32 %v1467_v57  ;;  %vm1476_vm0 = vweird.f32 %v1467_v57  ;;  %v1480_v13 = vand.u32 2147483647, %v1467_v57  ;;  %v1482_v18 = vand.u32 2147483648, %v1467_v57 }
 0x73b   : > { %3217 = vrcp.f32 %v1468_v59  ;;  %vm1491_vm1 = vweird.f32 %v1468_v59  ;;  %v1495_v24 = vand.u32 2147483647, %v1468_v59  ;;  %v1497_v30 = vand.u32 2147483648, %v1468_v59 }
 0x73c   : > { %3219 = vpow2.f32 %v1465_v58  ;;  %vm1481_vm5 = vcmp.eq.f32.partialorder %v1480_v13, 8.507059e+37  ;;  %v1483_v33 = vor.u32 1.1754944e-38, %v1482_v18 }
 0x73d   : > { %vm1496_vm11 = vcmp.eq.f32.partialorder %v1495_v24, 8.507059e+37 }
 0x73f   : > { %v3214_v60 = vpop.eup %3213 }
 0x740   : > { %v3216_v61 = vpop.eup %3215  ;;  %v1469_v62 = vadd.f32 1.0, %v3214_v60  ;;  %v2858_v60 = vld [vmem:[%s3917_s17 + $0x88] sm:$0xff] }
 0x741   : > { %v3218_v63 = vpop.eup %3217  ;;  %v1472_v0 = vmul.f32 %v3216_v61, %v1467_v57  ;;  %vm1477_vm15 = vweird.f32 %v3216_v61  ;;  %v1498_v57 = vor.u32 1.1754944e-38, %v1497_v30 }
 0x742   : > { %v3220_v1 = vpop.eup %3219  ;;  %v1487_v2 = vmul.f32 %v3218_v63, %v1468_v59  ;;  %3221 = vrcp.f32 %v1469_v62  ;;  %v1512_v21 = vand.u32 2147483648, %v1469_v62  ;;  %vm4156_vm2 = vmor %vm1476_vm0, %vm1477_vm15  ;;  %vm1492_vm3 = vweird.f32 %v3218_v63 }
 0x743   : > { %v1473_v4 = vsub.f32 1.0, %v1472_v0  ;;  %v1470_v7 = vadd.f32 1.0, %v3220_v1  ;;  %v1510_v36 = vand.u32 2147483647, %v1469_v62  ;;  %vm1506_vm6 = vweird.f32 %v1469_v62  ;;  %vm4163_vm7 = vmor %vm1491_vm1, %vm1492_vm3 }
 0x744   : > { %v1488_v6 = vsub.f32 1.0, %v1487_v2  ;;  %v1513_v39 = vor.u32 1.1754944e-38, %v1512_v21 }
 0x745   : > { %3223 = vrcp.f32 %v1470_v7  ;;  %v1474_v8 = vmul.f32 %v3216_v61, %v1473_v4  ;;  %v1525_v49 = vand.u32 2147483647, %v1470_v7  ;;  %v1527_v50 = vand.u32 2147483648, %v1470_v7 }
 0x746   : > { %v1489_v14 = vmul.f32 %v3218_v63, %v1488_v6  ;;  %vm1511_vm10 = vcmp.eq.f32.partialorder %v1510_v36, 8.507059e+37  ;;  %vm1521_vm12 = vweird.f32 %v1470_v7 }
 0x747   : > { %v1475_v54 = vadd.f32 %v3216_v61, %v1474_v8  ;;  %v1528_v0 = vor.u32 1.1754944e-38, %v1527_v50  ;;  %vm1526_vm1 = vcmp.eq.f32.partialorder %v1525_v49, 8.507059e+37 }
 0x748   : > { %v3222_v12 = vpop.eup %3221  ;;  %v1490_v27 = vadd.f32 %v3218_v63, %v1489_v14 }
 0x749   : > { %v1502_v15 = vmul.f32 %v3222_v12, %v1469_v62  ;;  %v1479_v31 = vsel %vm4156_vm2, %v3216_v61, %v1475_v54  ;;  %vm1507_vm4 = vweird.f32 %v3222_v12  ;;  %v2860_v61 = vld [vmem:[%s3917_s17 + $0x98] sm:$0xff] }
 0x74a   : > { %v1484_v52 = vsel %vm1481_vm5, %v1483_v33, %v1479_v31  ;;  %vm1508_vm8 = vmor %vm1506_vm6, %vm1507_vm4  ;;  %v1494_v53 = vsel %vm4163_vm7, %v3218_v63, %v1490_v27 }
 0x74b   : > { %v3224_v19 = vpop.eup %3223  ;;  %v1503_v20 = vsub.f32 1.0, %v1502_v15  ;;  %vm1531_vm13 = vcmp.lt.f32.partialorder %v2857_v44, %v1484_v52  ;;  %v1499_v62 = vsel %vm1496_vm11, %v1498_v57, %v1494_v53  ;;  %v2867_v52 = vld [vmem:[%s3734_s16 + $0x50] sm:$0xff]  ;;  %v2868_v53 = vld [vmem:[%s3734_s16 + $0x58] sm:$0xff] }
 0x74c   : > { %v1517_v25 = vmul.f32 %v3224_v19, %v1470_v7  ;;  %vm1522_vm9 = vweird.f32 %v3224_v19  ;;  %vm1532_vm2 = vcmp.lt.f32.partialorder %v2858_v60, %v1499_v62 }
 0x74d   : > { %v1504_v32 = vmul.f32 %v3222_v12, %v1503_v20  ;;  %vm1523_vm15 = vmor %vm1521_vm12, %vm1522_vm9 }
 0x74e   : > { %v1518_v37 = vsub.f32 1.0, %v1517_v25 }
 0x74f   : > { %v1505_v38 = vadd.f32 %v3222_v12, %v1504_v32 }
 0x750   : > { %v1519_v55 = vmul.f32 %v3224_v19, %v1518_v37 }
 0x751   : > { %v1509_v56 = vsel %vm1508_vm8, %v3222_v12, %v1505_v38 }
 0x752   : > { %v1514_v58 = vsel %vm1511_vm10, %v1513_v39, %v1509_v56  ;;  %v1520_v59 = vadd.f32 %v3224_v19, %v1519_v55 }
 0x753   : > { %vm1533_vm14 = vcmp.lt.f32.partialorder %v2859_v51, %v1514_v58 }
 0x754   : > { %vm2873_vm0 = vmpackc.low %vm1533_vm14, %vm1531_vm13  ;;  %v1524_v1 = vsel %vm1523_vm15, %v3224_v19, %v1520_v59 }
 0x755   : > { %2874 = vmatmul.msk.bf16.vlgmr.msrb.gmra.mxu2 %vm2873_vm0, %v3530_v43  ;;  %v1529_v63 = vsel %vm1526_vm1, %v1528_v0, %v1524_v1 }
 0x756   : > { %vm1534_vm3 = vcmp.lt.f32.partialorder %v2860_v61, %v1529_v63  ;;  %1946 = vmatpush.bf16.xpose.msrb.mxu2 %v3740_v3 }
 0x757   : > { %vm2875_vm4 = vmpackc.low %vm1534_vm3, %vm1532_vm2 }
 0x758   : > { %2876 = vmatmul.msk.bf16.vlgmr.msrb.gmra.mxu3 %vm2875_vm4, %v3530_v43 }
 0x759   : > { %1960 = vmatpush.bf16.xpose.msrb.mxu3 %v3742_v5 }
 0x75e   : > { %1947 = vmatpush.bf16.xpose.msrb.mxu2 %v3748_v10 }
 0x761   : > { %1961 = vmatpush.bf16.xpose.msrb.mxu3 %v3750_v11 }
 0x766   : > { %1948 = vmatpush.bf16.xpose.msrb.mxu2 %v3754_v16 }
 0x769   : > { %1962 = vmatpush.bf16.xpose.msrb.mxu3 %v3756_v17 }
 0x76e   : > { %1949 = vmatpush.bf16.xpose.msrb.mxu2 %v3762_v22 }
 0x771   : > { %1963 = vmatpush.bf16.xpose.msrb.mxu3 %v3764_v23 }
 0x776   : > { %1950 = vmatpush.bf16.xpose.msrb.mxu2 %v3768_v28 }
 0x779   : > { %1964 = vmatpush.bf16.xpose.msrb.mxu3 %v3770_v29 }
 0x77e   : > { %1951 = vmatpush.bf16.xpose.msrb.mxu2 %v3776_v34 }
 0x781   : > { %1965 = vmatpush.bf16.xpose.msrb.mxu3 %v3778_v35 }
 0x786   : > { %1952 = vmatpush.bf16.xpose.msrb.mxu2 %v3782_v40 }
 0x789   : > { %1966 = vmatpush.bf16.xpose.msrb.mxu3 %v3784_v41 }
 0x78e   : > { %1953 = vmatpush.bf16.xpose.msrb.mxu2 %v3790_v46 }
 0x791   : > { %1967 = vmatpush.bf16.xpose.msrb.mxu3 %v3792_v47 }
 0x7d8   : > { %v1557_v2 = vpop.f32.mrf.mxu2 }
 0x7d9   : > { %v1558_v4 = vadd.f32 %v4067_v9, %v1557_v2 }
 0x7db   : > { %v1571_v7 = vpop.f32.mrf.mxu3 }
 0x7dc   : > { %v1572_v6 = vadd.f32 %v1571_v7, %v1558_v4 }
 0x7de   : > { %v1576_v8 = vsub.f32 0.0, %v1572_v6 }
 0x7e0   : > { %v1578_v12 = vmul.f32 1.442695, %v1576_v8  ;;  %v1559_v14 = vpop.f32.mrf.mxu2 }
 0x7e1   : > { %v1560_v15 = vadd.f32 %v4067_v9, %v1559_v14 }
 0x7e2   : > { %3225 = vpow2.f32 %v1578_v12 }
 0x7e3   : > { %v1573_v54 = vpop.f32.mrf.mxu3 }
 0x7e4   : > { %v1574_v13 = vadd.f32 %v1573_v54, %v1560_v15 }
 0x7e6   : > { %v1577_v18 = vsub.f32 0.0, %v1574_v13 }
 0x7e8   : > { %v3226_v19 = vpop.eup %3225  ;;  %v1580_v20 = vmul.f32 1.442695, %v1577_v18 }
 0x7e9   : > { %v1582_v21 = vadd.f32 1.0, %v3226_v19 }
 0x7ea   : > { %3227 = vpow2.f32 %v1580_v20 }
 0x7eb   : > { %3229 = vrcp.f32 %v1582_v21  ;;  %v1595_v9 = vand.u32 2147483648, %v1582_v21  ;;  %vm1589_vm6 = vweird.f32 %v1582_v21  ;;  %v1593_v38 = vand.u32 2147483647, %v1582_v21 }
 0x7ed   : > { %v1596_v44 = vor.u32 1.1754944e-38, %v1595_v9  ;;  %vm1594_vm9 = vcmp.eq.f32.partialorder %v1593_v38, 8.507059e+37 }
 0x7f0   : > { %v3228_v24 = vpop.eup %3227 }
 0x7f1   : > { %v3230_v25 = vpop.eup %3229  ;;  %v1583_v26 = vadd.f32 1.0, %v3228_v24 }
 0x7f2   : > { %v1585_v27 = vmul.f32 %v3230_v25, %v1582_v21  ;;  %vm1590_vm5 = vweird.f32 %v3230_v25 }
 0x7f3   : > { %3231 = vrcp.f32 %v1583_v26  ;;  %vm1591_vm7 = vmor %vm1589_vm6, %vm1590_vm5  ;;  %v1610_v39 = vand.u32 2147483648, %v1583_v26  ;;  %v1608_v50 = vand.u32 2147483647, %v1583_v26  ;;  %vm1604_vm10 = vweird.f32 %v1583_v26 }
 0x7f4   : > { %v1586_v30 = vsub.f32 1.0, %v1585_v27 }
 0x7f5   : > { %v1611_v56 = vor.u32 1.1754944e-38, %v1610_v39  ;;  %vm1609_vm12 = vcmp.eq.f32.partialorder %v1608_v50, 8.507059e+37 }
 0x7f6   : > { %v1587_v31 = vmul.f32 %v3230_v25, %v1586_v30 }
 0x7f8   : > { %v1588_v37 = vadd.f32 %v3230_v25, %v1587_v31 }
 0x7f9   : > { %v3232_v32 = vpop.eup %3231 }
 0x7fa   : > { %v1600_v36 = vmul.f32 %v3232_v32, %v1583_v26  ;;  %v1592_v42 = vsel %vm1591_vm7, %v3230_v25, %v1588_v37  ;;  %vm1605_vm8 = vweird.f32 %v3232_v32 }
 0x7fb   : > { %v1597_v55 = vsel %vm1594_vm9, %v1596_v44, %v1592_v42  ;;  %vm1606_vm11 = vmor %vm1604_vm10, %vm1605_vm8 }
 0x7fc   : > { %v1601_v33 = vsub.f32 1.0, %v1600_v36  ;;  %vm1614_vm13 = vcmp.lt.f32.partialorder %v2867_v52, %v1597_v55 }
 0x7fe   : > { %v1602_v49 = vmul.f32 %v3232_v32, %v1601_v33 }
 0x800   : > { %v1603_v51 = vadd.f32 %v3232_v32, %v1602_v49 }
 0x802   : > { %v1607_v57 = vsel %vm1606_vm11, %v3232_v32, %v1603_v51 }
 0x803   : > { %v1612_v58 = vsel %vm1609_vm12, %v1611_v56, %v1607_v57 }
 0x804   : > { %vm1615_vm14 = vcmp.lt.f32.partialorder %v2868_v53, %v1612_v58 }
 0x805   : > { %vm2883_vm15 = vmpackc.low %vm1615_vm14, %vm1614_vm13 }
 0x806   : > { %2884 = vmatmul.msk.bf16.vlgmr.msrb.gmra.mxu0 %vm2883_vm15, %v3530_v43  ;;  %2886 = vmatmul.msk.bf16.vlgmr.msrb.gmra.mxu1 %vm2883_vm15, %v3530_v43 }
 0x807   : > { %2024 = vmatpush.bf16.msrb.mxu0 %v3740_v3  ;;  %2038 = vmatpush.bf16.msrb.mxu1 %v3742_v5 }
 0x80b   : > { %2025 = vmatpush.bf16.msrb.mxu0 %v3748_v10  ;;  %2039 = vmatpush.bf16.msrb.mxu1 %v3750_v11 }
 0x80f   : > { %2026 = vmatpush.bf16.msrb.mxu0 %v3754_v16  ;;  %2040 = vmatpush.bf16.msrb.mxu1 %v3756_v17 }
 0x813   : > { %2027 = vmatpush.bf16.msrb.mxu0 %v3762_v22  ;;  %2041 = vmatpush.bf16.msrb.mxu1 %v3764_v23 }
 0x817   : > { %2028 = vmatpush.bf16.msrb.mxu0 %v3768_v28  ;;  %2042 = vmatpush.bf16.msrb.mxu1 %v3770_v29 }
 0x81b   : > { %2029 = vmatpush.bf16.msrb.mxu0 %v3776_v34  ;;  %2043 = vmatpush.bf16.msrb.mxu1 %v3778_v35 }
 0x81f   : > { %2030 = vmatpush.bf16.msrb.mxu0 %v3782_v40  ;;  %2044 = vmatpush.bf16.msrb.mxu1 %v3784_v41 }
 0x823   : > { %2031 = vmatpush.bf16.msrb.mxu0 %v3790_v46  ;;  %2045 = vmatpush.bf16.msrb.mxu1 %v3792_v47 }
 0x883   : > { %v1635_v59 = vpop.f32.mrf.mxu0  ;;  %v1649_v60 = vpop.f32.mrf.mxu1 }
 0x884   : > { %v1636_v61 = vadd.f32 %v1635_v59, %v3883_v45  ;;  %v1650_v62 = vadd.f32 %v1649_v60, %v3885_v48 }
 0x886   : > { %v1654_v0 = vsub.f32 0.0, %v1636_v61  ;;  %v1655_v1 = vsub.f32 0.0, %v1650_v62 }
 0x888   : > { %v1658_v63 = vmul.f32 1.442695, %v1654_v0  ;;  %v1660_v2 = vmul.f32 1.442695, %v1655_v1 }
 0x88a   : > { %3233 = vpow2.f32 %v1658_v63 }
 0x88b   : > { %3235 = vpow2.f32 %v1660_v2  ;;  %v1637_v4 = vpop.f32.mrf.mxu0  ;;  %v1651_v7 = vpop.f32.mrf.mxu1 }
 0x88c   : > { %v1638_v6 = vadd.f32 %v1637_v4, %v3883_v45  ;;  %v1652_v8 = vadd.f32 %v1651_v7, %v3885_v48 }
 0x88e   : > { %v1656_v12 = vsub.f32 0.0, %v1638_v6  ;;  %v1657_v14 = vsub.f32 0.0, %v1652_v8  ;;  %v2877_v6 = vld [vmem:[%s3917_s17 + $0xa0] sm:$0xff]  ;;  %v2879_v8 = vld [vmem:[%s3917_s17 + $0xb0] sm:$0xff] }
 0x890   : > { %v3234_v15 = vpop.eup %3233  ;;  %v1662_v54 = vmul.f32 1.442695, %v1656_v12  ;;  %v1664_v19 = vmul.f32 1.442695, %v1657_v14 }
 0x891   : > { %v3236_v13 = vpop.eup %3235  ;;  %v1666_v18 = vadd.f32 1.0, %v3234_v15 }
 0x892   : > { %v1667_v20 = vadd.f32 1.0, %v3236_v13  ;;  %3237 = vpow2.f32 %v1662_v54 }
 0x893   : > { %3239 = vrcp.f32 %v1666_v18  ;;  %vm1675_vm1 = vweird.f32 %v1666_v18  ;;  %v1679_v49 = vand.u32 2147483647, %v1666_v18  ;;  %v1681_v50 = vand.u32 2147483648, %v1666_v18 }
 0x894   : > { %3241 = vrcp.f32 %v1667_v20  ;;  %vm1690_vm2 = vweird.f32 %v1667_v20  ;;  %v1694_v53 = vand.u32 2147483647, %v1667_v20  ;;  %v1696_v58 = vand.u32 2147483648, %v1667_v20 }
 0x895   : > { %3243 = vpow2.f32 %v1664_v19  ;;  %vm1680_vm6 = vcmp.eq.f32.partialorder %v1679_v49, 8.507059e+37  ;;  %v1682_v0 = vor.u32 1.1754944e-38, %v1681_v50 }
 0x896   : > { %v1697_v13 = vor.u32 1.1754944e-38, %v1696_v58  ;;  %vm1695_vm12 = vcmp.eq.f32.partialorder %v1694_v53, 8.507059e+37 }
 0x898   : > { %v3238_v21 = vpop.eup %3237 }
 0x899   : > { %v3240_v24 = vpop.eup %3239  ;;  %v1668_v25 = vadd.f32 1.0, %v3238_v21  ;;  %v2880_v21 = vld [vmem:[%s3917_s17 + $0xb8] sm:$0xff] }
 0x89a   : > { %v3242_v26 = vpop.eup %3241  ;;  %v1671_v27 = vmul.f32 %v3240_v24, %v1666_v18  ;;  %vm1676_vm0 = vweird.f32 %v3240_v24 }
 0x89b   : > { %v3244_v30 = vpop.eup %3243  ;;  %v1686_v31 = vmul.f32 %v3242_v26, %v1667_v20  ;;  %3245 = vrcp.f32 %v1668_v25  ;;  %v1711_v52 = vand.u32 2147483648, %v1668_v25  ;;  %vm4217_vm3 = vmor %vm1675_vm1, %vm1676_vm0  ;;  %vm1691_vm4 = vweird.f32 %v3242_v26  ;;  %v2878_v20 = vld [vmem:[%s3917_s17 + $0xa8] sm:$0xff] }
 0x89c   : > { %v1672_v32 = vsub.f32 1.0, %v1671_v27  ;;  %v1669_v36 = vadd.f32 1.0, %v3244_v30  ;;  %v1709_v61 = vand.u32 2147483647, %v1668_v25  ;;  %vm1705_vm7 = vweird.f32 %v1668_v25  ;;  %vm4224_vm8 = vmor %vm1690_vm2, %vm1691_vm4 }
 0x89d   : > { %v1687_v37 = vsub.f32 1.0, %v1686_v31  ;;  %v1712_v63 = vor.u32 1.1754944e-38, %v1711_v52  ;;  %v4252_v31 = vld [vmem:[#allocation7] ss:$0 sm:$0xff] }
 0x89e   : > { %3247 = vrcp.f32 %v1669_v36  ;;  %v1673_v9 = vmul.f32 %v3240_v24, %v1672_v32  ;;  %v1724_v4 = vand.u32 2147483647, %v1669_v36  ;;  %v1726_v7 = vand.u32 2147483648, %v1669_v36 }
 0x89f   : > { %v1688_v38 = vmul.f32 %v3242_v26, %v1687_v37  ;;  %vm1710_vm11 = vcmp.eq.f32.partialorder %v1709_v61, 8.507059e+37  ;;  %vm1720_vm13 = vweird.f32 %v1669_v36 }
 0x8a0   : > { %v1674_v42 = vadd.f32 %v3240_v24, %v1673_v9  ;;  %vm1725_vm2 = vcmp.eq.f32.partialorder %v1724_v4, 8.507059e+37 }
 0x8a1   : > { %v3246_v33 = vpop.eup %3245  ;;  %v1689_v57 = vadd.f32 %v3242_v26, %v1688_v38 }
 0x8a2   : > { %v1701_v39 = vmul.f32 %v3246_v33, %v1668_v25  ;;  %v1678_v59 = vsel %vm4217_vm3, %v3240_v24, %v1674_v42  ;;  %vm1706_vm5 = vweird.f32 %v3246_v33  ;;  %v1727_v25 = vor.u32 1.1754944e-38, %v1726_v7 }
 0x8a3   : > { %v1683_v12 = vsel %vm1680_vm6, %v1682_v0, %v1678_v59  ;;  %vm1707_vm9 = vmor %vm1705_vm7, %vm1706_vm5  ;;  %v1693_v14 = vsel %vm4224_vm8, %v3242_v26, %v1689_v57 }
 0x8a4   : > { %v3248_v44 = vpop.eup %3247  ;;  %v1702_v51 = vsub.f32 1.0, %v1701_v39  ;;  %vm1730_vm14 = vcmp.lt.f32.partialorder %v2877_v6, %v1683_v12  ;;  %v1698_v24 = vsel %vm1695_vm12, %v1697_v13, %v1693_v14  ;;  %v2887_v14 = vld [vmem:[%s3734_s16 + $0x60] sm:$0xff] }
 0x8a5   : > { %v1716_v55 = vmul.f32 %v3248_v44, %v1669_v36  ;;  %vm1721_vm10 = vweird.f32 %v3248_v44  ;;  %vm1731_vm3 = vcmp.lt.f32.partialorder %v2878_v20, %v1698_v24 }
 0x8a6   : > { %v1703_v60 = vmul.f32 %v3246_v33, %v1702_v51  ;;  %vm1722_vm0 = vmor %vm1720_vm13, %vm1721_vm10 }
 0x8a7   : > { %v1717_v62 = vsub.f32 1.0, %v1716_v55 }
 0x8a8   : > { %v1704_v1 = vadd.f32 %v3246_v33, %v1703_v60 }
 0x8a9   : > { %v1718_v15 = vmul.f32 %v3248_v44, %v1717_v62 }
 0x8aa   : > { %v1708_v54 = vsel %vm1707_vm9, %v3246_v33, %v1704_v1 }
 0x8ab   : > { %v1713_v18 = vsel %vm1710_vm11, %v1712_v63, %v1708_v54  ;;  %v1719_v19 = vadd.f32 %v3248_v44, %v1718_v15  ;;  %v2888_v15 = vld [vmem:[%s3734_s16 + $0x68] sm:$0xff] }
 0x8ac   : > { %vm1732_vm15 = vcmp.lt.f32.partialorder %v2879_v8, %v1713_v18 }
 0x8ad   : > { %vm2893_vm1 = vmpackc.low %vm1732_vm15, %vm1730_vm14  ;;  %v1723_v27 = vsel %vm1722_vm0, %v3248_v44, %v1719_v19 }
 0x8ae   : > { %2894 = vmatmul.msk.bf16.vlgmr.msra.gmra.mxu0 %vm2893_vm1, %v3530_v43  ;;  %v1728_v26 = vsel %vm1725_vm2, %v1727_v25, %v1723_v27 }
 0x8af   : > { %vm1733_vm4 = vcmp.lt.f32.partialorder %v2880_v21, %v1728_v26  ;;  %2145 = vmatpush.bf16.xpose.msra.mxu0 %v3740_v3 }
 0x8b0   : > { %vm2895_vm5 = vmpackc.low %vm1733_vm4, %vm1731_vm3 }
 0x8b1   : > { %2896 = vmatmul.msk.bf16.vlgmr.msra.gmra.mxu1 %vm2895_vm5, %v3530_v43 }
 0x8b2   : > { %2159 = vmatpush.bf16.xpose.msra.mxu1 %v3742_v5 }
 0x8b7   : > { %2146 = vmatpush.bf16.xpose.msra.mxu0 %v3748_v10 }
 0x8ba   : > { %2160 = vmatpush.bf16.xpose.msra.mxu1 %v3750_v11 }
 0x8bf   : > { %2147 = vmatpush.bf16.xpose.msra.mxu0 %v3754_v16 }
 0x8c2   : > { %2161 = vmatpush.bf16.xpose.msra.mxu1 %v3756_v17 }
 0x8c7   : > { %2148 = vmatpush.bf16.xpose.msra.mxu0 %v3762_v22 }
 0x8ca   : > { %2162 = vmatpush.bf16.xpose.msra.mxu1 %v3764_v23 }
 0x8cf   : > { %2149 = vmatpush.bf16.xpose.msra.mxu0 %v3768_v28 }
 0x8d2   : > { %2163 = vmatpush.bf16.xpose.msra.mxu1 %v3770_v29 }
 0x8d7   : > { %2150 = vmatpush.bf16.xpose.msra.mxu0 %v3776_v34 }
 0x8da   : > { %2164 = vmatpush.bf16.xpose.msra.mxu1 %v3778_v35 }
 0x8df   : > { %2151 = vmatpush.bf16.xpose.msra.mxu0 %v3782_v40 }
 0x8e2   : > { %2165 = vmatpush.bf16.xpose.msra.mxu1 %v3784_v41 }
 0x8e7   : > { %2152 = vmatpush.bf16.xpose.msra.mxu0 %v3790_v46 }
 0x8ea   : > { %2166 = vmatpush.bf16.xpose.msra.mxu1 %v3792_v47 }
 0x92b   : > { %v1756_v30 = vpop.f32.mrf.mxu0 }
 0x92c   : > { %v1757_v32 = vadd.f32 %v4252_v31, %v1756_v30 }
 0x92e   : > { %v1770_v36 = vpop.f32.mrf.mxu1 }
 0x92f   : > { %v1771_v37 = vadd.f32 %v1770_v36, %v1757_v32 }
 0x931   : > { %v1775_v9 = vsub.f32 0.0, %v1771_v37 }
 0x933   : > { %v1777_v33 = vmul.f32 1.442695, %v1775_v9  ;;  %v1758_v38 = vpop.f32.mrf.mxu0 }
 0x934   : > { %v1759_v39 = vadd.f32 %v4252_v31, %v1758_v38 }
 0x935   : > { %3249 = vpow2.f32 %v1777_v33 }
 0x936   : > { %v1772_v42 = vpop.f32.mrf.mxu1 }
 0x937   : > { %v1773_v49 = vadd.f32 %v1772_v42, %v1759_v39 }
 0x939   : > { %v1776_v50 = vsub.f32 0.0, %v1773_v49 }
 0x93b   : > { %v3250_v44 = vpop.eup %3249  ;;  %v1779_v51 = vmul.f32 1.442695, %v1776_v50 }
 0x93c   : > { %v1781_v52 = vadd.f32 1.0, %v3250_v44 }
 0x93d   : > { %3251 = vpow2.f32 %v1779_v51 }
 0x93e   : > { %3253 = vrcp.f32 %v1781_v52  ;;  %v1794_v0 = vand.u32 2147483648, %v1781_v52  ;;  %vm1788_vm7 = vweird.f32 %v1781_v52  ;;  %v1792_v63 = vand.u32 2147483647, %v1781_v52 }
 0x940   : > { %v1795_v8 = vor.u32 1.1754944e-38, %v1794_v0  ;;  %vm1793_vm10 = vcmp.eq.f32.partialorder %v1792_v63, 8.507059e+37 }
 0x943   : > { %v3252_v53 = vpop.eup %3251 }
 0x944   : > { %v3254_v55 = vpop.eup %3253  ;;  %v1782_v56 = vadd.f32 1.0, %v3252_v53 }
 0x945   : > { %v1784_v57 = vmul.f32 %v3254_v55, %v1781_v52  ;;  %vm1789_vm6 = vweird.f32 %v3254_v55 }
 0x946   : > { %3255 = vrcp.f32 %v1782_v56  ;;  %vm1790_vm8 = vmor %vm1788_vm7, %vm1789_vm6  ;;  %v1809_v2 = vand.u32 2147483648, %v1782_v56  ;;  %v1807_v6 = vand.u32 2147483647, %v1782_v56  ;;  %vm1803_vm11 = vweird.f32 %v1782_v56 }
 0x947   : > { %v1785_v58 = vsub.f32 1.0, %v1784_v57 }
 0x948   : > { %v1810_v13 = vor.u32 1.1754944e-38, %v1809_v2  ;;  %vm1808_vm13 = vcmp.eq.f32.partialorder %v1807_v6, 8.507059e+37 }
 0x949   : > { %v1786_v59 = vmul.f32 %v3254_v55, %v1785_v58 }
 0x94b   : > { %v1787_v62 = vadd.f32 %v3254_v55, %v1786_v59 }
 0x94c   : > { %v3256_v60 = vpop.eup %3255 }
 0x94d   : > { %v1799_v61 = vmul.f32 %v3256_v60, %v1782_v56  ;;  %v1791_v4 = vsel %vm1790_vm8, %v3254_v55, %v1787_v62  ;;  %vm1804_vm9 = vweird.f32 %v3256_v60 }
 0x94e   : > { %v1796_v54 = vsel %vm1793_vm10, %v1795_v8, %v1791_v4  ;;  %vm1805_vm12 = vmor %vm1803_vm11, %vm1804_vm9 }
 0x94f   : > { %v1800_v1 = vsub.f32 1.0, %v1799_v61  ;;  %vm1813_vm14 = vcmp.lt.f32.partialorder %v2887_v14, %v1796_v54 }
 0x951   : > { %v1801_v7 = vmul.f32 %v3256_v60, %v1800_v1 }
 0x953   : > { %v1802_v12 = vadd.f32 %v3256_v60, %v1801_v7 }
 0x955   : > { %v1806_v18 = vsel %vm1805_vm12, %v3256_v60, %v1802_v12 }
 0x956   : > { %v1811_v19 = vsel %vm1808_vm13, %v1810_v13, %v1806_v18 }
 0x957   : > { %vm1814_vm15 = vcmp.lt.f32.partialorder %v2888_v15, %v1811_v19 }
 0x958   : > { %vm2903_vm0 = vmpackc.low %vm1814_vm15, %vm1813_vm14 }
 0x959   : > { %2904 = vmatmul.msk.bf16.vlgmr.msra.gmra.mxu2 %vm2903_vm0, %v3530_v43  ;;  %2906 = vmatmul.msk.bf16.vlgmr.msra.gmra.mxu3 %vm2903_vm0, %v3530_v43 }
 0x95a   : > { %2223 = vmatpush.bf16.msra.mxu2 %v3740_v3  ;;  %2237 = vmatpush.bf16.msra.mxu3 %v3742_v5 }
 0x95e   : > { %2224 = vmatpush.bf16.msra.mxu2 %v3748_v10  ;;  %2238 = vmatpush.bf16.msra.mxu3 %v3750_v11 }
 0x962   : > { %2225 = vmatpush.bf16.msra.mxu2 %v3754_v16  ;;  %2239 = vmatpush.bf16.msra.mxu3 %v3756_v17 }
 0x966   : > { %2226 = vmatpush.bf16.msra.mxu2 %v3762_v22  ;;  %2240 = vmatpush.bf16.msra.mxu3 %v3764_v23 }
 0x96a   : > { %2227 = vmatpush.bf16.msra.mxu2 %v3768_v28  ;;  %2241 = vmatpush.bf16.msra.mxu3 %v3770_v29 }
 0x96e   : > { %2228 = vmatpush.bf16.msra.mxu2 %v3776_v34  ;;  %2242 = vmatpush.bf16.msra.mxu3 %v3778_v35 }
 0x972   : > { %2229 = vmatpush.bf16.msra.mxu2 %v3782_v40  ;;  %2243 = vmatpush.bf16.msra.mxu3 %v3784_v41 }
 0x976   : > { %2230 = vmatpush.bf16.msra.mxu2 %v3790_v46  ;;  %2244 = vmatpush.bf16.msra.mxu3 %v3792_v47 }
 0x9dc   : > { %v1834_v20 = vpop.f32.mrf.mxu2  ;;  %v1848_v21 = vpop.f32.mrf.mxu3 }
 0x9dd   : > { %v1835_v24 = vadd.f32 %v1834_v20, %v3883_v45  ;;  %v1849_v25 = vadd.f32 %v1848_v21, %v3885_v48 }
 0x9df   : > { %v1853_v27 = vsub.f32 0.0, %v1835_v24  ;;  %v1854_v26 = vsub.f32 0.0, %v1849_v25 }
 0x9e1   : > { %v1857_v30 = vmul.f32 1.442695, %v1853_v27  ;;  %v1859_v32 = vmul.f32 1.442695, %v1854_v26 }
 0x9e3   : > { %3257 = vpow2.f32 %v1857_v30 }
 0x9e4   : > { %3259 = vpow2.f32 %v1859_v32  ;;  %v1836_v36 = vpop.f32.mrf.mxu2  ;;  %v1850_v37 = vpop.f32.mrf.mxu3 }
 0x9e5   : > { %v1837_v9 = vadd.f32 %v1836_v36, %v3883_v45  ;;  %v1851_v33 = vadd.f32 %v1850_v37, %v3885_v48 }
 0x9e7   : > { %v1855_v38 = vsub.f32 0.0, %v1837_v9  ;;  %v1856_v39 = vsub.f32 0.0, %v1851_v33  ;;  %v2897_v33 = vld [vmem:[%s3917_s17 + $0xc0] sm:$0xff] }
 0x9e9   : > { %v3258_v42 = vpop.eup %3257  ;;  %v1861_v49 = vmul.f32 1.442695, %v1855_v38  ;;  %v1863_v51 = vmul.f32 1.442695, %v1856_v39  ;;  %v2899_v38 = vld [vmem:[%s3917_s17 + $0xd0] sm:$0xff] }
 0x9ea   : > { %v3260_v50 = vpop.eup %3259  ;;  %v1865_v44 = vadd.f32 1.0, %v3258_v42 }
 0x9eb   : > { %v1866_v52 = vadd.f32 1.0, %v3260_v50  ;;  %3261 = vpow2.f32 %v1861_v49 }
 0x9ec   : > { %3263 = vrcp.f32 %v1865_v44  ;;  %vm1874_vm2 = vweird.f32 %v1865_v44  ;;  %v1878_v6 = vand.u32 2147483647, %v1865_v44  ;;  %v1880_v8 = vand.u32 2147483648, %v1865_v44 }
 0x9ed   : > { %3265 = vrcp.f32 %v1866_v52  ;;  %vm1889_vm3 = vweird.f32 %v1866_v52  ;;  %v1893_v54 = vand.u32 2147483647, %v1866_v52  ;;  %v1895_v20 = vand.u32 2147483648, %v1866_v52 }
 0x9ee   : > { %3267 = vpow2.f32 %v1863_v51  ;;  %vm1879_vm7 = vcmp.eq.f32.partialorder %v1878_v6, 8.507059e+37  ;;  %v1881_v26 = vor.u32 1.1754944e-38, %v1880_v8 }
 0x9ef   : > { %vm1894_vm13 = vcmp.eq.f32.partialorder %v1893_v54, 8.507059e+37 }
 0x9f1   : > { %v3262_v53 = vpop.eup %3261 }
 0x9f2   : > { %v3264_v55 = vpop.eup %3263  ;;  %v1867_v56 = vadd.f32 1.0, %v3262_v53  ;;  %v2898_v53 = vld [vmem:[%s3917_s17 + $0xc8] sm:$0xff] }
 0x9f3   : > { %v3266_v57 = vpop.eup %3265  ;;  %v1870_v58 = vmul.f32 %v3264_v55, %v1865_v44  ;;  %vm1875_vm1 = vweird.f32 %v3264_v55  ;;  %v1896_v44 = vor.u32 1.1754944e-38, %v1895_v20 }
 0x9f4   : > { %v3268_v59 = vpop.eup %3267  ;;  %v1885_v60 = vmul.f32 %v3266_v57, %v1866_v52  ;;  %3269 = vrcp.f32 %v1867_v56  ;;  %v1910_v15 = vand.u32 2147483648, %v1867_v56  ;;  %vm4280_vm4 = vmor %vm1874_vm2, %vm1875_vm1  ;;  %vm1890_vm5 = vweird.f32 %v3266_v57 }
 0x9f5   : > { %v1871_v61 = vsub.f32 1.0, %v1870_v58  ;;  %v1868_v62 = vadd.f32 1.0, %v3268_v59  ;;  %v1908_v25 = vand.u32 2147483647, %v1867_v56  ;;  %vm1904_vm8 = vweird.f32 %v1867_v56  ;;  %vm4287_vm9 = vmor %vm1889_vm3, %vm1890_vm5 }
 0x9f6   : > { %v1886_v0 = vsub.f32 1.0, %v1885_v60  ;;  %v1911_v32 = vor.u32 1.1754944e-38, %v1910_v15 }
 0x9f7   : > { %3271 = vrcp.f32 %v1868_v62  ;;  %v1872_v1 = vmul.f32 %v3264_v55, %v1871_v61  ;;  %v1923_v37 = vand.u32 2147483647, %v1868_v62  ;;  %v1925_v9 = vand.u32 2147483648, %v1868_v62 }
 0x9f8   : > { %v1887_v2 = vmul.f32 %v3266_v57, %v1886_v0  ;;  %vm1909_vm12 = vcmp.eq.f32.partialorder %v1908_v25, 8.507059e+37  ;;  %vm1919_vm14 = vweird.f32 %v1868_v62 }
 0x9f9   : > { %v1873_v7 = vadd.f32 %v3264_v55, %v1872_v1  ;;  %v1926_v58 = vor.u32 1.1754944e-38, %v1925_v9  ;;  %vm1924_vm3 = vcmp.eq.f32.partialorder %v1923_v37, 8.507059e+37 }
 0x9fa   : > { %v3270_v63 = vpop.eup %3269  ;;  %v1888_v19 = vadd.f32 %v3266_v57, %v1887_v2 }
 0x9fb   : > { %v1900_v4 = vmul.f32 %v3270_v63, %v1867_v56  ;;  %v1877_v21 = vsel %vm4280_vm4, %v3264_v55, %v1873_v7  ;;  %vm1905_vm6 = vweird.f32 %v3270_v63  ;;  %v2900_v55 = vld [vmem:[%s3917_s17 + $0xd8] sm:$0xff] }
 0x9fc   : > { %v1882_v39 = vsel %vm1879_vm7, %v1881_v26, %v1877_v21  ;;  %vm1906_vm10 = vmor %vm1904_vm8, %vm1905_vm6  ;;  %v1892_v42 = vsel %vm4287_vm9, %v3266_v57, %v1888_v19 }
 0x9fd   : > { %v3272_v12 = vpop.eup %3271  ;;  %v1901_v14 = vsub.f32 1.0, %v1900_v4  ;;  %vm1929_vm15 = vcmp.lt.f32.partialorder %v2897_v33, %v1882_v39  ;;  %v1897_v56 = vsel %vm1894_vm13, %v1896_v44, %v1892_v42  ;;  %v2907_v42 = vld [vmem:[%s3734_s16 + $0x70] sm:$0xff] }
 0x9fe   : > { %v1915_v13 = vmul.f32 %v3272_v12, %v1868_v62  ;;  %vm1920_vm11 = vweird.f32 %v3272_v12  ;;  %vm1930_vm4 = vcmp.lt.f32.partialorder %v2898_v53, %v1897_v56 }
 0x9ff   : > { %v1902_v24 = vmul.f32 %v3270_v63, %v1901_v14  ;;  %vm1921_vm1 = vmor %vm1919_vm14, %vm1920_vm11 }
 0xa00   : > { %v1916_v27 = vsub.f32 1.0, %v1915_v13 }
 0xa01   : > { %v1903_v30 = vadd.f32 %v3270_v63, %v1902_v24 }
 0xa02   : > { %v1917_v49 = vmul.f32 %v3272_v12, %v1916_v27 }
 0xa03   : > { %v1907_v50 = vsel %vm1906_vm10, %v3270_v63, %v1903_v30 }
 0xa04   : > { %v1912_v51 = vsel %vm1909_vm12, %v1911_v32, %v1907_v50  ;;  %v1918_v52 = vadd.f32 %v3272_v12, %v1917_v49  ;;  %v2908_v49 = vld [vmem:[%s3734_s16 + $0x78] sm:$0xff] }
 0xa05   : > { %vm1931_vm0 = vcmp.lt.f32.partialorder %v2899_v38, %v1912_v51 }
 0xa06   : > { %vm2913_vm2 = vmpackc.low %vm1931_vm0, %vm1929_vm15  ;;  %v1922_v59 = vsel %vm1921_vm1, %v3272_v12, %v1918_v52 }
 0xa07   : > { %2914 = vmatmul.msk.bf16.vlgmr.msrb.gmra.mxu2 %vm2913_vm2, %v3530_v43  ;;  %v1927_v57 = vsel %vm1924_vm3, %v1926_v58, %v1922_v59 }
 0xa08   : > { %vm1932_vm5 = vcmp.lt.f32.partialorder %v2900_v55, %v1927_v57  ;;  %2344 = vmatpush.bf16.xpose.msrb.mxu2 %v3740_v3 }
 0xa09   : > { %vm2915_vm6 = vmpackc.low %vm1932_vm5, %vm1930_vm4 }
 0xa0a   : > { %2916 = vmatmul.msk.bf16.vlgmr.msrb.gmra.mxu3 %vm2915_vm6, %v3530_v43 }
 0xa0b   : > { %2358 = vmatpush.bf16.xpose.msrb.mxu3 %v3742_v5 }
 0xa10   : > { %2345 = vmatpush.bf16.xpose.msrb.mxu2 %v3748_v10 }
 0xa13   : > { %2359 = vmatpush.bf16.xpose.msrb.mxu3 %v3750_v11 }
 0xa18   : > { %2346 = vmatpush.bf16.xpose.msrb.mxu2 %v3754_v16 }
 0xa1b   : > { %2360 = vmatpush.bf16.xpose.msrb.mxu3 %v3756_v17 }
 0xa20   : > { %2347 = vmatpush.bf16.xpose.msrb.mxu2 %v3762_v22 }
 0xa23   : > { %2361 = vmatpush.bf16.xpose.msrb.mxu3 %v3764_v23 }
 0xa28   : > { %2348 = vmatpush.bf16.xpose.msrb.mxu2 %v3768_v28 }
 0xa2b   : > { %2362 = vmatpush.bf16.xpose.msrb.mxu3 %v3770_v29 }
 0xa30   : > { %2349 = vmatpush.bf16.xpose.msrb.mxu2 %v3776_v34 }
 0xa33   : > { %2363 = vmatpush.bf16.xpose.msrb.mxu3 %v3778_v35 }
 0xa38   : > { %2350 = vmatpush.bf16.xpose.msrb.mxu2 %v3782_v40 }
 0xa3b   : > { %2364 = vmatpush.bf16.xpose.msrb.mxu3 %v3784_v41 }
 0xa40   : > { %2351 = vmatpush.bf16.xpose.msrb.mxu2 %v3790_v46 }
 0xa43   : > { %2365 = vmatpush.bf16.xpose.msrb.mxu3 %v3792_v47 }
 0xa8a   : > { %v1955_v60 = vpop.f32.mrf.mxu2 }
 0xa8b   : > { %v1956_v61 = vadd.f32 %v4252_v31, %v1955_v60 }
 0xa8d   : > { %v1969_v62 = vpop.f32.mrf.mxu3 }
 0xa8e   : > { %v1970_v0 = vadd.f32 %v1969_v62, %v1956_v61 }
 0xa90   : > { %v1974_v1 = vsub.f32 0.0, %v1970_v0 }
 0xa92   : > { %v1976_v63 = vmul.f32 1.442695, %v1974_v1  ;;  %v1957_v2 = vpop.f32.mrf.mxu2 }
 0xa93   : > { %v1958_v4 = vadd.f32 %v4252_v31, %v1957_v2 }
 0xa94   : > { %3273 = vpow2.f32 %v1976_v63 }
 0xa95   : > { %v1971_v7 = vpop.f32.mrf.mxu3 }
 0xa96   : > { %v1972_v6 = vadd.f32 %v1971_v7, %v1958_v4 }
 0xa98   : > { %v1975_v8 = vsub.f32 0.0, %v1972_v6 }
 0xa9a   : > { %v3274_v12 = vpop.eup %3273  ;;  %v1978_v14 = vmul.f32 1.442695, %v1975_v8 }
 0xa9b   : > { %v1980_v15 = vadd.f32 1.0, %v3274_v12 }
 0xa9c   : > { %3275 = vpow2.f32 %v1978_v14 }
 0xa9d   : > { %3277 = vrcp.f32 %v1980_v15  ;;  %v1993_v26 = vand.u32 2147483648, %v1980_v15  ;;  %vm1987_vm8 = vweird.f32 %v1980_v15  ;;  %v1991_v32 = vand.u32 2147483647, %v1980_v15 }
 0xa9f   : > { %v1994_v38 = vor.u32 1.1754944e-38, %v1993_v26  ;;  %vm1992_vm11 = vcmp.eq.f32.partialorder %v1991_v32, 8.507059e+37 }
 0xaa2   : > { %v3276_v54 = vpop.eup %3275 }
 0xaa3   : > { %v3278_v13 = vpop.eup %3277  ;;  %v1981_v18 = vadd.f32 1.0, %v3276_v54 }
 0xaa4   : > { %v1983_v19 = vmul.f32 %v3278_v13, %v1980_v15  ;;  %vm1988_vm7 = vweird.f32 %v3278_v13 }
 0xaa5   : > { %3279 = vrcp.f32 %v1981_v18  ;;  %vm1989_vm9 = vmor %vm1987_vm8, %vm1988_vm7  ;;  %v2008_v36 = vand.u32 2147483648, %v1981_v18  ;;  %v2006_v33 = vand.u32 2147483647, %v1981_v18  ;;  %vm2002_vm12 = vweird.f32 %v1981_v18 }
 0xaa6   : > { %v1984_v20 = vsub.f32 1.0, %v1983_v19 }
 0xaa7   : > { %v2009_v44 = vor.u32 1.1754944e-38, %v2008_v36  ;;  %vm2007_vm14 = vcmp.eq.f32.partialorder %v2006_v33, 8.507059e+37 }
 0xaa8   : > { %v1985_v21 = vmul.f32 %v3278_v13, %v1984_v20 }
 0xaaa   : > { %v1986_v27 = vadd.f32 %v3278_v13, %v1985_v21 }
 0xaab   : > { %v3280_v24 = vpop.eup %3279 }
 0xaac   : > { %v1998_v25 = vmul.f32 %v3280_v24, %v1981_v18  ;;  %v1990_v37 = vsel %vm1989_vm9, %v3278_v13, %v1986_v27  ;;  %vm2003_vm10 = vweird.f32 %v3280_v24 }
 0xaad   : > { %v1995_v50 = vsel %vm1992_vm11, %v1994_v38, %v1990_v37  ;;  %vm2004_vm13 = vmor %vm2002_vm12, %vm2003_vm10 }
 0xaae   : > { %v1999_v30 = vsub.f32 1.0, %v1998_v25  ;;  %vm2012_vm15 = vcmp.lt.f32.partialorder %v2907_v42, %v1995_v50  ;;  %v2919_v50 = vld [vmem:[%s3917_s17 + $0xf0] sm:$0xff] }
 0xab0   : > { %v2000_v9 = vmul.f32 %v3280_v24, %v1999_v30 }
 0xab2   : > { %v2001_v39 = vadd.f32 %v3280_v24, %v2000_v9 }
 0xab4   : > { %v2005_v51 = vsel %vm2004_vm13, %v3280_v24, %v2001_v39  ;;  %v2928_v24 = vld [vmem:[%s3734_s16 + $0x88] sm:$0xff] }
 0xab5   : > { %v2010_v52 = vsel %vm2007_vm14, %v2009_v44, %v2005_v51 }
 0xab6   : > { %vm2013_vm0 = vcmp.lt.f32.partialorder %v2908_v49, %v2010_v52  ;;  %v2917_v49 = vld [vmem:[%s3917_s17 + $0xe0] sm:$0xff] }
 0xab7   : > { %vm2923_vm1 = vmpackc.low %vm2013_vm0, %vm2012_vm15 }
 0xab8   : > { %2924 = vmatmul.msk.bf16.vlgmr.msrb.gmra.mxu0 %vm2923_vm1, %v3530_v43  ;;  %2926 = vmatmul.msk.bf16.vlgmr.msrb.gmra.mxu1 %vm2923_vm1, %v3530_v43 }
 0xab9   : > { %2422 = vmatpush.bf16.msrb.mxu0 %v3740_v3  ;;  %2436 = vmatpush.bf16.msrb.mxu1 %v3742_v5 }
 0xabd   : > { %2423 = vmatpush.bf16.msrb.mxu0 %v3748_v10  ;;  %2437 = vmatpush.bf16.msrb.mxu1 %v3750_v11 }
 0xac1   : > { %2424 = vmatpush.bf16.msrb.mxu0 %v3754_v16  ;;  %2438 = vmatpush.bf16.msrb.mxu1 %v3756_v17 }
 0xac5   : > { %2425 = vmatpush.bf16.msrb.mxu0 %v3762_v22  ;;  %2439 = vmatpush.bf16.msrb.mxu1 %v3764_v23 }
 0xac9   : > { %2426 = vmatpush.bf16.msrb.mxu0 %v3768_v28  ;;  %2440 = vmatpush.bf16.msrb.mxu1 %v3770_v29 }
 0xacd   : > { %2427 = vmatpush.bf16.msrb.mxu0 %v3776_v34  ;;  %2441 = vmatpush.bf16.msrb.mxu1 %v3778_v35 }
 0xad1   : > { %2428 = vmatpush.bf16.msrb.mxu0 %v3782_v40  ;;  %2442 = vmatpush.bf16.msrb.mxu1 %v3784_v41 }
 0xad5   : > { %2429 = vmatpush.bf16.msrb.mxu0 %v3790_v46  ;;  %2443 = vmatpush.bf16.msrb.mxu1 %v3792_v47 }
 0xb35   : > { %v2033_v3 = vpop.f32.mrf.mxu0  ;;  %v2047_v5 = vpop.f32.mrf.mxu1 }
 0xb36   : > { %v2034_v10 = vadd.f32 %v2033_v3, %v3883_v45  ;;  %v2048_v11 = vadd.f32 %v2047_v5, %v3885_v48 }
 0xb38   : > { %v2052_v16 = vsub.f32 0.0, %v2034_v10  ;;  %v2053_v17 = vsub.f32 0.0, %v2048_v11 }
 0xb3a   : > { %v2056_v22 = vmul.f32 1.442695, %v2052_v16  ;;  %v2058_v23 = vmul.f32 1.442695, %v2053_v17  ;;  %v2918_v16 = vld [vmem:[%s3917_s17 + $0xe8] sm:$0xff]  ;;  %v2920_v17 = vld [vmem:[%s3917_s17 + $0xf8] sm:$0xff] }
 0xb3c   : > { %3281 = vpow2.f32 %v2056_v22 }
 0xb3d   : > { %3283 = vpow2.f32 %v2058_v23  ;;  %v2035_v28 = vpop.f32.mrf.mxu0  ;;  %v2049_v29 = vpop.f32.mrf.mxu1 }
 0xb3e   : > { %v2036_v34 = vadd.f32 %v2035_v28, %v3883_v45  ;;  %v2050_v35 = vadd.f32 %v2049_v29, %v3885_v48 }
 0xb40   : > { %v2054_v40 = vsub.f32 0.0, %v2036_v34  ;;  %v2055_v41 = vsub.f32 0.0, %v2050_v35 }
 0xb42   : > { %v3282_v46 = vpop.eup %3281  ;;  %v2060_v47 = vmul.f32 1.442695, %v2054_v40  ;;  %v2062_v56 = vmul.f32 1.442695, %v2055_v41 }
 0xb43   : > { %v3284_v53 = vpop.eup %3283  ;;  %v2064_v55 = vadd.f32 1.0, %v3282_v46 }
 0xb44   : > { %v2065_v58 = vadd.f32 1.0, %v3284_v53  ;;  %3285 = vpow2.f32 %v2060_v47 }
 0xb45   : > { %3287 = vrcp.f32 %v2064_v55  ;;  %vm2073_vm3 = vweird.f32 %v2064_v55  ;;  %v2077_v15 = vand.u32 2147483647, %v2064_v55  ;;  %v2079_v54 = vand.u32 2147483648, %v2064_v55 }
 0xb46   : > { %3289 = vrcp.f32 %v2065_v58  ;;  %vm2088_vm4 = vweird.f32 %v2065_v58  ;;  %v2092_v20 = vand.u32 2147483647, %v2065_v58  ;;  %v2094_v27 = vand.u32 2147483648, %v2065_v58 }
 0xb47   : > { %3291 = vpow2.f32 %v2062_v56  ;;  %vm2078_vm8 = vcmp.eq.f32.partialorder %v2077_v15, 8.507059e+37  ;;  %v2080_v37 = vor.u32 1.1754944e-38, %v2079_v54 }
 0xb48   : > { %v2095_v5 = vor.u32 1.1754944e-38, %v2094_v27  ;;  %vm2093_vm14 = vcmp.eq.f32.partialorder %v2092_v20, 8.507059e+37 }
 0xb4a   : > { %v3286_v59 = vpop.eup %3285 }
 0xb4b   : > { %v3288_v57 = vpop.eup %3287  ;;  %v2066_v60 = vadd.f32 1.0, %v3286_v59 }
 0xb4c   : > { %v3290_v61 = vpop.eup %3289  ;;  %v2069_v62 = vmul.f32 %v3288_v57, %v2064_v55  ;;  %vm2074_vm2 = vweird.f32 %v3288_v57 }
 0xb4d   : > { %v3292_v0 = vpop.eup %3291  ;;  %v2084_v1 = vmul.f32 %v3290_v61, %v2065_v58  ;;  %3293 = vrcp.f32 %v2066_v60  ;;  %v2109_v19 = vand.u32 2147483648, %v2066_v60  ;;  %vm4341_vm5 = vmor %vm2073_vm3, %vm2074_vm2  ;;  %vm2089_vm6 = vweird.f32 %v3290_v61 }
 0xb4e   : > { %v2070_v63 = vsub.f32 1.0, %v2069_v62  ;;  %v2067_v2 = vadd.f32 1.0, %v3292_v0  ;;  %v2107_v32 = vand.u32 2147483647, %v2066_v60  ;;  %vm2103_vm9 = vweird.f32 %v2066_v60  ;;  %vm4348_vm10 = vmor %vm2088_vm4, %vm2089_vm6 }
 0xb4f   : > { %v2085_v4 = vsub.f32 1.0, %v2084_v1  ;;  %v2110_v33 = vor.u32 1.1754944e-38, %v2109_v19 }
 0xb50   : > { %3295 = vrcp.f32 %v2067_v2  ;;  %v2071_v7 = vmul.f32 %v3288_v57, %v2070_v63  ;;  %v2122_v39 = vand.u32 2147483647, %v2067_v2  ;;  %v2124_v42 = vand.u32 2147483648, %v2067_v2 }
 0xb51   : > { %v2086_v8 = vmul.f32 %v3290_v61, %v2085_v4  ;;  %vm2108_vm13 = vcmp.eq.f32.partialorder %v2107_v32, 8.507059e+37  ;;  %vm2118_vm15 = vweird.f32 %v2067_v2 }
 0xb52   : > { %v2072_v14 = vadd.f32 %v3288_v57, %v2071_v7  ;;  %v2125_v23 = vor.u32 1.1754944e-38, %v2124_v42  ;;  %vm2123_vm4 = vcmp.eq.f32.partialorder %v2122_v39, 8.507059e+37 }
 0xb53   : > { %v3294_v6 = vpop.eup %3293  ;;  %v2087_v25 = vadd.f32 %v3290_v61, %v2086_v8 }
 0xb54   : > { %v2099_v12 = vmul.f32 %v3294_v6, %v2066_v60  ;;  %v2076_v26 = vsel %vm4341_vm5, %v3288_v57, %v2072_v14  ;;  %vm2104_vm7 = vweird.f32 %v3294_v6 }
 0xb55   : > { %v2081_v44 = vsel %vm2078_vm8, %v2080_v37, %v2076_v26  ;;  %vm2105_vm11 = vmor %vm2103_vm9, %vm2104_vm7  ;;  %v2091_v51 = vsel %vm4348_vm10, %v3290_v61, %v2087_v25 }
 0xb56   : > { %v3296_v13 = vpop.eup %3295  ;;  %v2100_v18 = vsub.f32 1.0, %v2099_v12  ;;  %vm2128_vm0 = vcmp.lt.f32.partialorder %v2917_v49, %v2081_v44  ;;  %v2096_v22 = vsel %vm2093_vm14, %v2095_v5, %v2091_v51 }
 0xb57   : > { %v2114_v21 = vmul.f32 %v3296_v13, %v2067_v2  ;;  %vm2119_vm12 = vweird.f32 %v3296_v13  ;;  %vm2129_vm5 = vcmp.lt.f32.partialorder %v2918_v16, %v2096_v22 }
 0xb58   : > { %v2101_v30 = vmul.f32 %v3294_v6, %v2100_v18  ;;  %vm2120_vm2 = vmor %vm2118_vm15, %vm2119_vm12 }
 0xb59   : > { %v2115_v36 = vsub.f32 1.0, %v2114_v21  ;;  %v2927_v21 = vld [vmem:[%s3734_s16 + $0x80] sm:$0xff] }
 0xb5a   : > { %v2102_v9 = vadd.f32 %v3294_v6, %v2101_v30 }
 0xb5b   : > { %v2116_v52 = vmul.f32 %v3296_v13, %v2115_v36 }
 0xb5c   : > { %v2106_v3 = vsel %vm2105_vm11, %v3294_v6, %v2102_v9 }
 0xb5d   : > { %v2111_v10 = vsel %vm2108_vm13, %v2110_v33, %v2106_v3  ;;  %v2117_v11 = vadd.f32 %v3296_v13, %v2116_v52 }
 0xb5e   : > { %vm2130_vm1 = vcmp.lt.f32.partialorder %v2919_v50, %v2111_v10 }
 0xb5f   : > { %vm2933_vm3 = vmpackc.low %vm2130_vm1, %vm2128_vm0  ;;  %v2121_v28 = vsel %vm2120_vm2, %v3296_v13, %v2117_v11 }
 0xb60   : > { %2934 = vmatmul.msk.bf16.vlgmr.msra.gmra.mxu0 %vm2933_vm3, %v3530_v43  ;;  %v2126_v29 = vsel %vm2123_vm4, %v2125_v23, %v2121_v28 }
 0xb61   : > { %vm2131_vm6 = vcmp.lt.f32.partialorder %v2920_v17, %v2126_v29 }
 0xb62   : > { %vm2935_vm7 = vmpackc.low %vm2131_vm6, %vm2129_vm5 }
 0xb63   : > { %2936 = vmatmul.msk.bf16.vlgmr.msra.gmra.mxu1 %vm2935_vm7, %v3530_v43 }
 0xbdd   : > { %v2154_v34 = vpop.f32.mrf.mxu0 }
 0xbde   : > { %v2155_v35 = vadd.f32 %v4252_v31, %v2154_v34 }
 0xbe0   : > { %v2168_v40 = vpop.f32.mrf.mxu1 }
 0xbe1   : > { %v2169_v41 = vadd.f32 %v2168_v40, %v2155_v35 }
 0xbe3   : > { %v2173_v46 = vsub.f32 0.0, %v2169_v41 }
 0xbe5   : > { %v2175_v47 = vmul.f32 1.442695, %v2173_v46  ;;  %v2156_v53 = vpop.f32.mrf.mxu0 }
 0xbe6   : > { %v2157_v55 = vadd.f32 %v4252_v31, %v2156_v53 }
 0xbe7   : > { %3297 = vpow2.f32 %v2175_v47 }
 0xbe8   : > { %v2170_v56 = vpop.f32.mrf.mxu1 }
 0xbe9   : > { %v2171_v58 = vadd.f32 %v2170_v56, %v2157_v55 }
 0xbeb   : > { %v2174_v59 = vsub.f32 0.0, %v2171_v58 }
 0xbed   : > { %v3298_v57 = vpop.eup %3297  ;;  %v2177_v60 = vmul.f32 1.442695, %v2174_v59 }
 0xbee   : > { %v2179_v61 = vadd.f32 1.0, %v3298_v57 }
 0xbef   : > { %3299 = vpow2.f32 %v2177_v60 }
 0xbf0   : > { %3301 = vrcp.f32 %v2179_v61  ;;  %v2192_v31 = vand.u32 2147483648, %v2179_v61  ;;  %vm2186_vm9 = vweird.f32 %v2179_v61  ;;  %v2190_v14 = vand.u32 2147483647, %v2179_v61 }
 0xbf2   : > { %v2193_v19 = vor.u32 1.1754944e-38, %v2192_v31  ;;  %vm2191_vm12 = vcmp.eq.f32.partialorder %v2190_v14, 8.507059e+37 }
 0xbf5   : > { %v3300_v62 = vpop.eup %3299 }
 0xbf6   : > { %v3302_v0 = vpop.eup %3301  ;;  %v2180_v1 = vadd.f32 1.0, %v3300_v62 }
 0xbf7   : > { %v2182_v63 = vmul.f32 %v3302_v0, %v2179_v61  ;;  %vm2187_vm8 = vweird.f32 %v3302_v0 }
 0xbf8   : > { %3303 = vrcp.f32 %v2180_v1  ;;  %vm2188_vm10 = vmor %vm2186_vm9, %vm2187_vm8  ;;  %v2207_v15 = vand.u32 2147483648, %v2180_v1  ;;  %v2205_v18 = vand.u32 2147483647, %v2180_v1  ;;  %vm2201_vm13 = vweird.f32 %v2180_v1 }
 0xbf9   : > { %v2183_v2 = vsub.f32 1.0, %v2182_v63 }
 0xbfa   : > { %v2208_v27 = vor.u32 1.1754944e-38, %v2207_v15  ;;  %vm2206_vm15 = vcmp.eq.f32.partialorder %v2205_v18, 8.507059e+37 }
 0xbfb   : > { %v2184_v4 = vmul.f32 %v3302_v0, %v2183_v2 }
 0xbfd   : > { %v2185_v8 = vadd.f32 %v3302_v0, %v2184_v4  ;;  %v2947_v4 = vld [vmem:[%s3734_s16 + $0x90] sm:$0xff] }
 0xbfe   : > { %v3304_v7 = vpop.eup %3303 }
 0xbff   : > { %v2197_v6 = vmul.f32 %v3304_v7, %v2180_v1  ;;  %v2189_v54 = vsel %vm2188_vm10, %v3302_v0, %v2185_v8  ;;  %vm2202_vm11 = vweird.f32 %v3304_v7 }
 0xc00   : > { %v2194_v25 = vsel %vm2191_vm12, %v2193_v19, %v2189_v54  ;;  %vm2203_vm14 = vmor %vm2201_vm13, %vm2202_vm11 }
 0xc01   : > { %v2198_v12 = vsub.f32 1.0, %v2197_v6  ;;  %vm2211_vm0 = vcmp.lt.f32.partialorder %v2927_v21, %v2194_v25  ;;  %v2937_v21 = vld [vmem:[%s3917_s17 + $0x100] sm:$0xff] }
 0xc03   : > { %v2199_v13 = vmul.f32 %v3304_v7, %v2198_v12 }
 0xc05   : > { %v2200_v20 = vadd.f32 %v3304_v7, %v2199_v13 }
 0xc07   : > { %v2204_v26 = vsel %vm2203_vm14, %v3304_v7, %v2200_v20 }
 0xc08   : > { %v2209_v30 = vsel %vm2206_vm15, %v2208_v27, %v2204_v26 }
 0xc09   : > { %vm2212_vm1 = vcmp.lt.f32.partialorder %v2928_v24, %v2209_v30  ;;  %v2939_v24 = vld [vmem:[%s3917_s17 + $0x110] sm:$0xff] }
 0xc0a   : > { %vm2943_vm2 = vmpackc.low %vm2212_vm1, %vm2211_vm0 }
 0xc0b   : > { %2944 = vmatmul.msk.bf16.vlgmr.msra.gmra.mxu2 %vm2943_vm2, %v3530_v43  ;;  %2946 = vmatmul.msk.bf16.vlgmr.msra.gmra.mxu3 %vm2943_vm2, %v3530_v43 }
 0xc8e   : > { %v2232_v32 = vpop.f32.mrf.mxu2  ;;  %v2246_v36 = vpop.f32.mrf.mxu3 }
 0xc8f   : > { %v2233_v37 = vadd.f32 %v2232_v32, %v3883_v45  ;;  %v2247_v9 = vadd.f32 %v2246_v36, %v3885_v48 }
 0xc91   : > { %v2251_v33 = vsub.f32 0.0, %v2233_v37  ;;  %v2252_v38 = vsub.f32 0.0, %v2247_v9  ;;  %v2938_v9 = vld [vmem:[%s3917_s17 + $0x108] sm:$0xff] }
 0xc93   : > { %v2255_v39 = vmul.f32 1.442695, %v2251_v33  ;;  %v2257_v42 = vmul.f32 1.442695, %v2252_v38  ;;  %v2940_v33 = vld [vmem:[%s3917_s17 + $0x118] sm:$0xff] }
 0xc95   : > { %3305 = vpow2.f32 %v2255_v39 }
 0xc96   : > { %3307 = vpow2.f32 %v2257_v42  ;;  %v2234_v49 = vpop.f32.mrf.mxu2  ;;  %v2248_v50 = vpop.f32.mrf.mxu3 }
 0xc97   : > { %v2235_v44 = vadd.f32 %v2234_v49, %v3883_v45  ;;  %v2249_v51 = vadd.f32 %v2248_v50, %v3885_v48 }
 0xc99   : > { %v2253_v52 = vsub.f32 0.0, %v2235_v44  ;;  %v2254_v3 = vsub.f32 0.0, %v2249_v51  ;;  %v3347_v44 = vld [vmem:[#allocation7] ss:$0 sm:$0xff] }
 0xc9b   : > { %v3306_v5 = vpop.eup %3305  ;;  %v2259_v10 = vmul.f32 1.442695, %v2253_v52  ;;  %v2261_v17 = vmul.f32 1.442695, %v2254_v3 }
 0xc9c   : > { %v3308_v11 = vpop.eup %3307  ;;  %v2263_v16 = vadd.f32 1.0, %v3306_v5 }
 0xc9d   : > { %v2264_v22 = vadd.f32 1.0, %v3308_v11  ;;  %3309 = vpow2.f32 %v2259_v10 }
 0xc9e   : > { %3311 = vrcp.f32 %v2263_v16  ;;  %vm2272_vm4 = vweird.f32 %v2263_v16  ;;  %v2276_v60 = vand.u32 2147483647, %v2263_v16  ;;  %v2278_v61 = vand.u32 2147483648, %v2263_v16 }
 0xc9f   : > { %3313 = vrcp.f32 %v2264_v22  ;;  %vm2287_vm5 = vweird.f32 %v2264_v22  ;;  %v2291_v63 = vand.u32 2147483647, %v2264_v22  ;;  %v2293_v6 = vand.u32 2147483648, %v2264_v22 }
 0xca0   : > { %3315 = vpow2.f32 %v2261_v17  ;;  %vm2277_vm9 = vcmp.eq.f32.partialorder %v2276_v60, 8.507059e+37  ;;  %v2279_v15 = vor.u32 1.1754944e-38, %v2278_v61 }
 0xca1   : > { %v2294_v32 = vor.u32 1.1754944e-38, %v2293_v6  ;;  %vm2292_vm15 = vcmp.eq.f32.partialorder %v2291_v63, 8.507059e+37 }
 0xca3   : > { %v3310_v23 = vpop.eup %3309 }
 0xca4   : > { %v3312_v28 = vpop.eup %3311  ;;  %v2265_v29 = vadd.f32 1.0, %v3310_v23 }
 0xca5   : > { %v3314_v34 = vpop.eup %3313  ;;  %v2268_v35 = vmul.f32 %v3312_v28, %v2263_v16  ;;  %vm2273_vm3 = vweird.f32 %v3312_v28 }
 0xca6   : > { %v3316_v40 = vpop.eup %3315  ;;  %v2283_v41 = vmul.f32 %v3314_v34, %v2264_v22  ;;  %3317 = vrcp.f32 %v2265_v29  ;;  %v2308_v1 = vand.u32 2147483648, %v2265_v29  ;;  %vm4370_vm6 = vmor %vm2272_vm4, %vm2273_vm3  ;;  %vm2288_vm7 = vweird.f32 %v3314_v34 }
 0xca7   : > { %v2269_v46 = vsub.f32 1.0, %v2268_v35  ;;  %v2266_v47 = vadd.f32 1.0, %v3316_v40  ;;  %v2306_v12 = vand.u32 2147483647, %v2265_v29  ;;  %vm2302_vm10 = vweird.f32 %v2265_v29  ;;  %vm4377_vm11 = vmor %vm2287_vm5, %vm2288_vm7 }
 0xca8   : > { %v2284_v53 = vsub.f32 1.0, %v2283_v41  ;;  %v2309_v13 = vor.u32 1.1754944e-38, %v2308_v1 }
 0xca9   : > { %3319 = vrcp.f32 %v2266_v47  ;;  %v2270_v55 = vmul.f32 %v3312_v28, %v2269_v46  ;;  %v2321_v19 = vand.u32 2147483647, %v2266_v47  ;;  %v2323_v20 = vand.u32 2147483648, %v2266_v47 }
 0xcaa   : > { %v2285_v58 = vmul.f32 %v3314_v34, %v2284_v53  ;;  %vm2307_vm14 = vcmp.eq.f32.partialorder %v2306_v12, 8.507059e+37  ;;  %vm2317_vm0 = vweird.f32 %v2266_v47 }
 0xcab   : > { %v2271_v57 = vadd.f32 %v3312_v28, %v2270_v55  ;;  %v2324_v39 = vor.u32 1.1754944e-38, %v2323_v20  ;;  %vm2322_vm5 = vcmp.eq.f32.partialorder %v2321_v19, 8.507059e+37 }
 0xcac   : > { %v3318_v56 = vpop.eup %3317  ;;  %v2286_v7 = vadd.f32 %v3314_v34, %v2285_v58 }
 0xcad   : > { %v2298_v59 = vmul.f32 %v3318_v56, %v2265_v29  ;;  %v2275_v8 = vsel %vm4370_vm6, %v3312_v28, %v2271_v57  ;;  %vm2303_vm8 = vweird.f32 %v3318_v56 }
 0xcae   : > { %v2280_v25 = vsel %vm2277_vm9, %v2279_v15, %v2275_v8  ;;  %vm2304_vm12 = vmor %vm2302_vm10, %vm2303_vm8  ;;  %v2290_v27 = vsel %vm4377_vm11, %v3314_v34, %v2286_v7  ;;  %v2948_v7 = vld [vmem:[%s3734_s16 + $0x98] sm:$0xff] }
 0xcaf   : > { %v3320_v62 = vpop.eup %3319  ;;  %v2299_v0 = vsub.f32 1.0, %v2298_v59  ;;  %vm2327_vm1 = vcmp.lt.f32.partialorder %v2937_v21, %v2280_v25  ;;  %v2295_v38 = vsel %vm2292_vm15, %v2294_v32, %v2290_v27 }
 0xcb0   : > { %v2313_v2 = vmul.f32 %v3320_v62, %v2266_v47  ;;  %vm2318_vm13 = vweird.f32 %v3320_v62  ;;  %vm2328_vm6 = vcmp.lt.f32.partialorder %v2938_v9, %v2295_v38 }
 0xcb1   : > { %v2300_v31 = vmul.f32 %v3318_v56, %v2299_v0  ;;  %vm2319_vm3 = vmor %vm2317_vm0, %vm2318_vm13 }
 0xcb2   : > { %v2314_v14 = vsub.f32 1.0, %v2313_v2 }
 0xcb3   : > { %v2301_v54 = vadd.f32 %v3318_v56, %v2300_v31 }
 0xcb4   : > { %v2315_v26 = vmul.f32 %v3320_v62, %v2314_v14 }
 0xcb5   : > { %v2305_v30 = vsel %vm2304_vm12, %v3318_v56, %v2301_v54 }
 0xcb6   : > { %v2310_v36 = vsel %vm2307_vm14, %v2309_v13, %v2305_v30  ;;  %v2316_v37 = vadd.f32 %v3320_v62, %v2315_v26 }
 0xcb7   : > { %vm2329_vm2 = vcmp.lt.f32.partialorder %v2939_v24, %v2310_v36 }
 0xcb8   : > { %vm2953_vm4 = vmpackc.low %vm2329_vm2, %vm2327_vm1  ;;  %v2320_v42 = vsel %vm2319_vm3, %v3320_v62, %v2316_v37 }
 0xcb9   : > { %2954 = vmatmul.msk.bf16.vlgmr.msrb.gmra.mxu2 %vm2953_vm4, %v3530_v43  ;;  %v2325_v49 = vsel %vm2322_vm5, %v2324_v39, %v2320_v42 }
 0xcba   : > { %vm2330_vm7 = vcmp.lt.f32.partialorder %v2940_v33, %v2325_v49 }
 0xcbb   : > { %vm2955_vm8 = vmpackc.low %vm2330_vm7, %vm2328_vm6 }
 0xcbc   : > { %2956 = vmatmul.msk.bf16.vlgmr.msrb.gmra.mxu3 %vm2955_vm8, %v3530_v43 }
 0xd3c   : > { %v2353_v50 = vpop.f32.mrf.mxu2 }
 0xd3d   : > { %v2354_v51 = vadd.f32 %v3347_v44, %v2353_v50 }
 0xd3f   : > { %v2367_v52 = vpop.f32.mrf.mxu3 }
 0xd40   : > { %v2368_v3 = vadd.f32 %v2367_v52, %v2354_v51 }
 0xd42   : > { %v2372_v5 = vsub.f32 0.0, %v2368_v3 }
 0xd44   : > { %v2374_v10 = vmul.f32 1.442695, %v2372_v5  ;;  %v2355_v11 = vpop.f32.mrf.mxu2 }
 0xd45   : > { %v2356_v16 = vadd.f32 %v3347_v44, %v2355_v11 }
 0xd46   : > { %3321 = vpow2.f32 %v2374_v10 }
 0xd47   : > { %v2369_v17 = vpop.f32.mrf.mxu3 }
 0xd48   : > { %v2370_v22 = vadd.f32 %v2369_v17, %v2356_v16 }
 0xd4a   : > { %v2373_v23 = vsub.f32 0.0, %v2370_v22 }
 0xd4c   : > { %v3322_v28 = vpop.eup %3321  ;;  %v2376_v29 = vmul.f32 1.442695, %v2373_v23 }
 0xd4d   : > { %v2378_v34 = vadd.f32 1.0, %v3322_v28 }
 0xd4e   : > { %3323 = vpow2.f32 %v2376_v29  ;;  %v2957_v29 = vld [vmem:[%s3917_s17 + $0x120] sm:$0xff] }
 0xd4f   : > { %3325 = vrcp.f32 %v2378_v34  ;;  %v2391_v59 = vand.u32 2147483648, %v2378_v34  ;;  %vm2385_vm10 = vweird.f32 %v2378_v34  ;;  %v2389_v60 = vand.u32 2147483647, %v2378_v34 }
 0xd51   : > { %v2392_v63 = vor.u32 1.1754944e-38, %v2391_v59  ;;  %vm2390_vm13 = vcmp.eq.f32.partialorder %v2389_v60, 8.507059e+37 }
 0xd54   : > { %v3324_v35 = vpop.eup %3323 }
 0xd55   : > { %v3326_v40 = vpop.eup %3325  ;;  %v2379_v41 = vadd.f32 1.0, %v3324_v35 }
 0xd56   : > { %v2381_v46 = vmul.f32 %v3326_v40, %v2378_v34  ;;  %vm2386_vm9 = vweird.f32 %v3326_v40 }
 0xd57   : > { %3327 = vrcp.f32 %v2379_v41  ;;  %vm2387_vm11 = vmor %vm2385_vm10, %vm2386_vm9  ;;  %v2406_v61 = vand.u32 2147483648, %v2379_v41  ;;  %v2404_v1 = vand.u32 2147483647, %v2379_v41  ;;  %vm2400_vm14 = vweird.f32 %v2379_v41 }
 0xd58   : > { %v2382_v47 = vsub.f32 1.0, %v2381_v46 }
 0xd59   : > { %v2407_v8 = vor.u32 1.1754944e-38, %v2406_v61  ;;  %vm2405_vm0 = vcmp.eq.f32.partialorder %v2404_v1, 8.507059e+37  ;;  %v3531_v61 = vmov 0.0  }
 0xd5a   : > { %v2383_v53 = vmul.f32 %v3326_v40, %v2382_v47 }
 0xd5c   : > { %v2384_v58 = vadd.f32 %v3326_v40, %v2383_v53 }
 0xd5d   : > { %v3328_v55 = vpop.eup %3327 }
 0xd5e   : > { %v2396_v56 = vmul.f32 %v3328_v55, %v2379_v41  ;;  %v2388_v62 = vsel %vm2387_vm11, %v3326_v40, %v2384_v58  ;;  %vm2401_vm12 = vweird.f32 %v3328_v55  ;;  %v2958_v41 = vld [vmem:[%s3917_s17 + $0x128] sm:$0xff] }
 0xd5f   : > { %v2393_v6 = vsel %vm2390_vm13, %v2392_v63, %v2388_v62  ;;  %vm2402_vm15 = vmor %vm2400_vm14, %vm2401_vm12 }
 0xd60   : > { %v2397_v57 = vsub.f32 1.0, %v2396_v56  ;;  %vm2410_vm1 = vcmp.lt.f32.partialorder %v2947_v4, %v2393_v6 }
 0xd62   : > { %v2398_v0 = vmul.f32 %v3328_v55, %v2397_v57 }
 0xd64   : > { %v2399_v2 = vadd.f32 %v3328_v55, %v2398_v0 }
 0xd66   : > { %v2403_v31 = vsel %vm2402_vm15, %v3328_v55, %v2399_v2 }
 0xd67   : > { %v2408_v12 = vsel %vm2405_vm0, %v2407_v8, %v2403_v31  ;;  %v2959_v8 = vld [vmem:[%s3917_s17 + $0x130] sm:$0xff] }
 0xd68   : > { %vm2411_vm2 = vcmp.lt.f32.partialorder %v2948_v7, %v2408_v12 }
 0xd69   : > { %vm2963_vm3 = vmpackc.low %vm2411_vm2, %vm2410_vm1 }
 0xd6a   : > { %2964 = vmatmul.msk.bf16.vlgmr.msrb.gmra.mxu0 %vm2963_vm3, %v3530_v43  ;;  %2966 = vmatmul.msk.bf16.vlgmr.msrb.gmra.mxu1 %vm2963_vm3, %v3530_v43 }
 0xde7   : > { %v2431_v14 = vpop.f32.mrf.mxu0  ;;  %v2445_v15 = vpop.f32.mrf.mxu1 }
 0xde8   : > { %v2432_v54 = vadd.f32 %v2431_v14, %v3883_v45  ;;  %v2446_v13 = vadd.f32 %v2445_v15, %v3885_v48 }
 0xdea   : > { %v2450_v18 = vsub.f32 0.0, %v2432_v54  ;;  %v2451_v19 = vsub.f32 0.0, %v2446_v13 }
 0xdec   : > { %v2454_v20 = vmul.f32 1.442695, %v2450_v18  ;;  %v2456_v21 = vmul.f32 1.442695, %v2451_v19  ;;  %v2960_v18 = vld [vmem:[%s3917_s17 + $0x138] sm:$0xff] }
 0xdee   : > { %3329 = vpow2.f32 %v2454_v20 }
 0xdef   : > { %3331 = vpow2.f32 %v2456_v21  ;;  %v2433_v24 = vpop.f32.mrf.mxu0  ;;  %v2447_v25 = vpop.f32.mrf.mxu1 }
 0xdf0   : > { %v2434_v27 = vadd.f32 %v2433_v24, %v3883_v45  ;;  %v2448_v26 = vadd.f32 %v2447_v25, %v3885_v48 }
 0xdf2   : > { %v2452_v30 = vsub.f32 0.0, %v2434_v27  ;;  %v2453_v43 = vsub.f32 0.0, %v2448_v26 }
 0xdf4   : > { %v3330_v32 = vpop.eup %3329  ;;  %v2458_v36 = vmul.f32 1.442695, %v2452_v30  ;;  %v2460_v33 = vmul.f32 1.442695, %v2453_v43 }
 0xdf5   : > { %v3332_v37 = vpop.eup %3331  ;;  %v2462_v9 = vadd.f32 1.0, %v3330_v32 }
 0xdf6   : > { %v2463_v38 = vadd.f32 1.0, %v3332_v37  ;;  %3333 = vpow2.f32 %v2458_v36 }
 0xdf7   : > { %3335 = vrcp.f32 %v2462_v9  ;;  %v2475_v3 = vand.u32 2147483647, %v2462_v9  ;;  %v2477_v5 = vand.u32 2147483648, %v2462_v9  ;;  %vm2471_vm6 = vweird.f32 %v2462_v9 }
 0xdf8   : > { %3337 = vrcp.f32 %v2463_v38  ;;  %v2492_v16 = vand.u32 2147483648, %v2463_v38  ;;  %v2490_v22 = vand.u32 2147483647, %v2463_v38  ;;  %vm2486_vm8 = vweird.f32 %v2463_v38 }
 0xdf9   : > { %3339 = vpow2.f32 %v2460_v33  ;;  %v2478_v34 = vor.u32 1.1754944e-38, %v2477_v5  ;;  %vm2476_vm9 = vcmp.eq.f32.partialorder %v2475_v3, 8.507059e+37 }
 0xdfa   : > { %v2493_v46 = vor.u32 1.1754944e-38, %v2492_v16  ;;  %vm2491_vm11 = vcmp.eq.f32.partialorder %v2490_v22, 8.507059e+37 }
 0xdfc   : > { %v3334_v39 = vpop.eup %3333 }
 0xdfd   : > { %v3336_v42 = vpop.eup %3335  ;;  %v4397_v49 = vadd.f32 1.0, %v3334_v39 }
 0xdfe   : > { %v3338_v50 = vpop.eup %3337  ;;  %v2467_v45 = vmul.f32 %v3336_v42, %v2462_v9  ;;  %vm2472_vm4 = vweird.f32 %v3336_v42 }
 0xdff   : > { %v3340_v44 = vpop.eup %3339  ;;  %v2482_v48 = vmul.f32 %v3338_v50, %v2463_v38  ;;  %3341 = vrcp.f32 %v4397_v49  ;;  %vm2487_vm5 = vweird.f32 %v3338_v50  ;;  %vm2473_vm7 = vmor %vm2471_vm6, %vm2472_vm4  ;;  %v2507_v57 = vand.u32 2147483648, %v4397_v49 }
 0xe00   : > { %v2468_v51 = vsub.f32 1.0, %v2467_v45  ;;  %v4400_v52 = vadd.f32 1.0, %v3340_v44  ;;  %vm2488_vm10 = vmor %vm2486_vm8, %vm2487_vm5  ;;  %v2505_v1 = vand.u32 2147483647, %v4397_v49  ;;  %vm2501_vm15 = vweird.f32 %v4397_v49 }
 0xe01   : > { %v2483_v10 = vsub.f32 1.0, %v2482_v48  ;;  %v2508_v31 = vor.u32 1.1754944e-38, %v2507_v57 }
 0xe02   : > { %v2469_v11 = vmul.f32 %v3336_v42, %v2468_v51  ;;  %3343 = vrcp.f32 %v4400_v52  ;;  %v2522_v6 = vand.u32 2147483648, %v4400_v52  ;;  %v2520_v14 = vand.u32 2147483647, %v4400_v52 }
 0xe03   : > { %v2484_v17 = vmul.f32 %v3338_v50, %v2483_v10  ;;  %vm2506_vm2 = vcmp.eq.f32.partialorder %v2505_v1, 8.507059e+37  ;;  %vm2516_vm3 = vweird.f32 %v4400_v52 }
 0xe04   : > { %v2470_v23 = vadd.f32 %v3336_v42, %v2469_v11  ;;  %v2523_v19 = vor.u32 1.1754944e-38, %v2522_v6  ;;  %vm2521_vm6 = vcmp.eq.f32.partialorder %v2520_v14, 8.507059e+37 }
 0xe05   : > { %v3342_v28 = vpop.eup %3341  ;;  %v2485_v35 = vadd.f32 %v3338_v50, %v2484_v17 }
 0xe06   : > { %v2474_v40 = vsel %vm2473_vm7, %v3336_v42, %v2470_v23  ;;  %v2497_v47 = vmul.f32 %v3342_v28, %v4397_v49  ;;  %vm2502_vm14 = vweird.f32 %v3342_v28 }
 0xe07   : > { %v2479_v53 = vsel %vm2476_vm9, %v2478_v34, %v2474_v40  ;;  %v2489_v55 = vsel %vm2488_vm10, %v3338_v50, %v2485_v35  ;;  %vm2503_vm0 = vmor %vm2501_vm15, %vm2502_vm14 }
 0xe08   : > { %v3344_v56 = vpop.eup %3343  ;;  %vm2526_vm12 = vcmp.lt.f32.partialorder %v2957_v29, %v2479_v53  ;;  %v2494_v58 = vsel %vm2491_vm11, %v2493_v46, %v2489_v55  ;;  %v2498_v59 = vsub.f32 1.0, %v2497_v47 }
 0xe09   : > { %vm2527_vm13 = vcmp.lt.f32.partialorder %v2958_v41, %v2494_v58  ;;  %v2512_v60 = vmul.f32 %v3344_v56, %v4400_v52  ;;  %v2967_v62 = vsel %vm2526_vm12, 1.0, %v3531_v61  ;;  %vm2517_vm1 = vweird.f32 %v3344_v56 }
 0xe0a   : > { %v2499_v0 = vmul.f32 %v3342_v28, %v2498_v59  ;;  %v2968_v63 = vsel %vm2527_vm13, 1.0, %v3531_v61  ;;  %vm2518_vm5 = vmor %vm2516_vm3, %vm2517_vm1 }
 0xe0b   : > { %v2513_v2 = vsub.f32 1.0, %v2512_v60  ;;  %v2538_v4 = vpack.c.bf16 %v2968_v63, %v2967_v62 }
 0xe0c   : > { %v2500_v7 = vadd.f32 %v3342_v28, %v2499_v0 }
 0xe0d   : > { %v2514_v12 = vmul.f32 %v3344_v56, %v2513_v2  ;;  %2540 = vst [vmem:[%s435_s2] sm:$0xff] %v2538_v4 }
 0xe0e   : > { %v2504_v15 = vsel %vm2503_vm0, %v3342_v28, %v2500_v7 }
 0xe0f   : > { %v2509_v54 = vsel %vm2506_vm2, %v2508_v31, %v2504_v15  ;;  %v2515_v13 = vadd.f32 %v3344_v56, %v2514_v12 }
 0xe10   : > { %vm2528_vm4 = vcmp.lt.f32.partialorder %v2959_v8, %v2509_v54 }
 0xe11   : > { %v2519_v20 = vsel %vm2518_vm5, %v3344_v56, %v2515_v13  ;;  %v2969_v24 = vsel %vm2528_vm4, 1.0, %v3531_v61 }
 0xe12   : > { %v2524_v21 = vsel %vm2521_vm6, %v2523_v19, %v2519_v20 }
 0xe13   : > { %vm2529_vm7 = vcmp.lt.f32.partialorder %v2960_v18, %v2524_v21 }
 0xe14   : > { %v2970_v25 = vsel %vm2529_vm7, 1.0, %v3531_v61 }
 0xe15   : > { %v2539_v27 = vpack.c.bf16 %v2970_v25, %v2969_v24 }
 0xe17   : > { %2541 = vst [vmem:[%s435_s2 + $0x8] sm:$0xff] %v2539_v27 }
 0xe18   : > { %3463 = shalt.err (!%p3460_p8)
}
 0xe19   : > { %s3532_s15 = smov 128   ;;  %s3533_s29 = smov 8  }
 0xe1a   : > { %3032 = dma.vmem_to_hbm [thread:$0]  (%p3621_p11), %s2557_s18, 256, %s2559_s26, %s2543_s14, %s3532_s15, %s3532_s15, %s3533_s29  }
 0xe1b PF: > { %s2573_s20 = sand.u32 1, %s3498_s21   ;;  %p3042_p9 = pnand %p2698_p2, %p3625_p12 }
 0xe1c   : > { %s2574_s17 = scalar_lea.sflag [#allocation4], %s2573_s20 }
 0xe1d   : > { %p3043_p10 = pneg %p3042_p9 }
 0xe1f   : > { %3493 = dma.done.wait (%p3043_p10), %s2574_s17, 256  }
 0xe20   : > { %3495 = vsyncadd (%p3043_p10), %s2574_s17, 4294967040  ;;  %s4504_s12 = sld [smem:[#allocation22_spill]]  ;;  %p23_p1 = scmp.ge.s32.totalorder %s3594_s27, 4  }
 0xe21   : > { %s4505_s23 = sld [smem:[#allocation23_spill]]  ;;  %s4506_s21 = smov %s3502_s22 }
 0xe22   : > { %s4508_s24 = smov %s3594_s27  ;;  %25 = sbr.rel (!%p23_p1) target bundleno = 11 (0xb), region = 149 }
 0xe26   : > { %s4507_s22 = smov %s4504_s12 }
 0xe27   :  { %2580 = vsyncpa [#allocation3], 1 }
 0xe28   :  { %2582 = vsyncpa [#allocation3 + $0x1], 1 }
 0xe29   :  { %2583 = vsyncpa [#allocation6], 1 }
 0xe2a   :  { %2584 = vsyncpa [#allocation9], 1 }
 0xe2b   :  { %2586 = vsyncpa [#allocation9 + $0x1], 1 }
 0xe2c   :  { %2587 = vsyncpa [#allocation4], 1 }
 0xe2d   :  { %2589 = vsyncpa [#allocation4 + $0x1], 1 }

</bundles_post_ra>
